<compile_context>
chip_gen: v6e
topology: v6e:2x2x1
jax: 0.10.0
libtpu: 0.0.40
codegen_flags: <defaults>
</compile_context>

<pallas_src>
import math

import jax
import jax.numpy as jnp
from jax.experimental import pallas as pl
from jax.experimental.pallas import tpu as pltpu


# ----------------------------- shared math -----------------------------

LN_EPS = 1e-5
INV_SQRT2 = 0.7071067811865476
NEG_BIG = -1e30


def _layernorm(x, w, b):
    mu = jnp.mean(x, axis=-1, keepdims=True)
    var = jnp.mean((x - mu) ** 2, axis=-1, keepdims=True)
    return (x - mu) * jax.lax.rsqrt(var + LN_EPS) * w + b


def _erf_approx(x):
    # Abramowitz & Stegun 7.1.26 — erf via exp/mul/add + EUP reciprocal.
    a1, a2, a3, a4, a5 = (0.254829592, -0.284496736, 1.421413741,
                          -1.453152027, 1.061405429)
    p = 0.3275911
    sgn = jnp.where(x < 0.0, -1.0, 1.0)
    ax = jnp.abs(x)
    t = pl.reciprocal(1.0 + p * ax, approx=True)      # EUP, frees the VPU
    poly = ((((a5 * t + a4) * t + a3) * t + a2) * t + a1) * t
    return sgn * (1.0 - poly * jnp.exp(-ax * ax))


def _gelu_exact(x):
    return 0.5 * x * (1.0 + _erf_approx(x * INV_SQRT2))


# ----------------------------- fused Pallas kernel -----------------------------

def make_fused_kernel(num_layers, nhead, d_model, dim_ff, vocab, bs):
    """Whole CharTransformer forward (all blocks + head) in one kernel.

    Refs: x[BS,D], bias[BS,H*BS], head_mask[H*BS,D], block_mat[H*BS,H*BS](bf16),
          vecs[R,256], <11 bf16 weight mats>, out[BS,V].
    """
    D = d_model
    hd = D // nhead
    scale = hd ** (-0.5)

    def kernel(x_ref, bias_ref, hmask_ref, blkm_ref, vec_ref, *rest):
        w_refs = rest[:-1]
        o_ref = rest[-1]

        x = x_ref[...]                      # [BS, D] f32 residual stream
        bias = bias_ref[...]                # [BS, H*BS] additive (0 / -1e30)
        hmask = hmask_ref[...]              # [H*BS, D] 0/1 head block mask
        blkm = blkm_ref[...]                # [H*BS, H*BS] bf16 block indicator

        state = {"v": 0, "w": 0}            # static unpack cursors (trace-time)

        def vec(width):                     # row of the packed 1-D param array
            r = state["v"]; state["v"] += 1
            return vec_ref[r:r + 1, :width]            # [1, width] f32

        def mat():                          # next bf16 weight matrix
            i = state["w"]; state["w"] += 1
            return w_refs[i][...]

        def mm(a, b):                       # bf16 MXU matmul, f32 accumulate
            return jnp.dot(a.astype(jnp.bfloat16), b,
                           preferred_element_type=jnp.float32)

        for _ in range(num_layers):         # static unroll over layers
            ln1_w = vec(D); ln1_b = vec(D); bqkv = vec(3 * D)
            bo = vec(D); ls1 = vec(D)
            ln2_w = vec(D); ln2_b = vec(D); b1cat = vec(2 * dim_ff)
            b2 = vec(D); ls2 = vec(D)
            wqkv = mat(); wo = mat(); w1cat = mat(); w2 = mat()

            # --- norm1 + packed grouped-query attention (all heads at once) ---
            xn = _layernorm(x, ln1_w, ln1_b)
            qkv = mm(xn, wqkv) + bqkv                       # [BS, 3D] f32
            q = qkv[:, :D]
            k_rep = qkv[:, D:2 * D]                         # per-head replicated K
            v_rep = qkv[:, 2 * D:3 * D]                     # per-head replicated V

            # Tile K/V along rows and block-mask the feature lanes so one
            # matmul computes every head's scores / outputs simultaneously.
            kp = (jnp.concatenate([k_rep] * nhead, axis=0) * hmask
                  ).astype(jnp.bfloat16)                    # [H*BS, D]
            vp = (jnp.concatenate([v_rep] * nhead, axis=0) * hmask
                  ).astype(jnp.bfloat16)                    # [H*BS, D]

            s = jax.lax.dot_general(                        # [BS, H*BS] f32
                q.astype(jnp.bfloat16), kp,
                (((1,), (1,)), ((), ())),
                preferred_element_type=jnp.float32)
            s = s * scale + bias
            m = jnp.max(s, axis=-1, keepdims=True)          # shift-invariant
            e = jnp.exp(s - m)
            denom = jnp.dot(e.astype(jnp.bfloat16), blkm,   # per-head block sums
                            preferred_element_type=jnp.float32)
            p = (e * pl.reciprocal(denom, approx=True)).astype(jnp.bfloat16)
            o_cat = jnp.dot(p, vp, preferred_element_type=jnp.float32)  # [BS, D]
            x = x + ls1 * (mm(o_cat, wo) + bo)

            # --- norm2 + SwiGLU feed-forward (fused w1|w1_gate matmul) ---
            xn2 = _layernorm(x, ln2_w, ln2_b)
            h12 = mm(xn2, w1cat) + b1cat                    # [BS, 2*ff]
            h1 = h12[:, :dim_ff]
            hg = h12[:, dim_ff:]
            ff = mm(h1 * (hg * jax.nn.sigmoid(hg)), w2) + b2
            x = x + ls2 * ff

        # --- head: SimpleFeedForward (MoE replacement) + final LN + tied proj ---
        ln_a_w = vec(D); ln_a_b = vec(D); mb1 = vec(2 * dim_ff); mb2 = vec(D)
        ln_b_w = vec(D); ln_b_b = vec(D); nrm_w = vec(D); nrm_b = vec(D)
        out_b = vec(vocab)
        mw1 = mat(); mw2 = mat(); wout = mat()

        h = _layernorm(x, ln_a_w, ln_a_b)
        h = mm(h, mw1) + mb1
        h = _gelu_exact(h)
        h = mm(h, mw2) + mb2
        h = _layernorm(h, ln_b_w, ln_b_b)
        h = _layernorm(h, nrm_w, nrm_b)                     # final model norm
        o_ref[...] = mm(h, wout) + out_b                    # [BS, V] lane-dense

    return kernel


# ----------------------------- parameter packing -----------------------------

def pack_params(params, nhead):
    """Fuse QKV / gate weights, bake in GQA head replication, cast weights to
    bf16, and pack all 1-D params into one [rows, 256] f32 array."""
    V, D = params["embed"].shape
    hd = D // nhead
    dim_ff = params["layers"][0]["w1"].shape[1]
    pack_w = ((max(3 * D, 2 * dim_ff, V, D) + 127) // 128) * 128

    vec_rows, mats = [], []

    def add_vec(v):
        v = jnp.asarray(v, jnp.float32).reshape(-1)
        vec_rows.append(jnp.pad(v, (0, pack_w - v.shape[0])))

    def add_mat(m):
        mats.append(jnp.asarray(m, jnp.float32).astype(jnp.bfloat16))

    for lp in params["layers"]:
        nkv = lp["nkv"]
        groups = nhead // nkv
        rep_w = lambda w: jnp.repeat(
            w.reshape(D, nkv, hd), groups, axis=1).reshape(D, D)
        rep_b = lambda b: jnp.repeat(
            b.reshape(nkv, hd), groups, axis=0).reshape(-1)

        wqkv = jnp.concatenate([lp["wq"], rep_w(lp["wk"]), rep_w(lp["wv"])], axis=1)
        bqkv = jnp.concatenate([lp["bq"].reshape(-1), rep_b(lp["bk"]),
                                rep_b(lp["bv"])])
        w1cat = jnp.concatenate([lp["w1"], lp["w1g"]], axis=1)
        b1cat = jnp.concatenate([lp["b1"].reshape(-1), lp["b1g"].reshape(-1)])

        add_vec(lp["ln1_w"]); add_vec(lp["ln1_b"]); add_vec(bqkv)
        add_vec(lp["bo"]);    add_vec(lp["ls1"])
        add_vec(lp["ln2_w"]); add_vec(lp["ln2_b"]); add_vec(b1cat)
        add_vec(lp["b2"]);    add_vec(lp["ls2"])
        add_mat(wqkv); add_mat(lp["wo"]); add_mat(w1cat); add_mat(lp["w2"])

    mp = params["moe"]
    add_vec(mp["ln_a_w"]); add_vec(mp["ln_a_b"]); add_vec(mp["b1"]); add_vec(mp["b2"])
    add_vec(mp["ln_b_w"]); add_vec(mp["ln_b_b"])
    add_vec(params["norm_w"]); add_vec(params["norm_b"]); add_vec(params["out_b"])
    add_mat(mp["w1"]); add_mat(mp["w2"]); add_mat(params["embed"].T)  # tied weights

    pad = (-len(vec_rows)) % 8
    vec_rows += [jnp.zeros((pack_w,), jnp.float32)] * pad
    return jnp.stack(vec_rows), tuple(mats)


# ----------------------------- wrapper -----------------------------

def build_forward(num_layers, nhead, d_model, dim_ff, vocab, batch, seq):
    BS = batch * seq
    P = nhead * BS
    hd = d_model // nhead
    kernel = make_fused_kernel(num_layers, nhead, d_model, dim_ff, vocab, BS)
    vmem_spec = pl.BlockSpec(memory_space=pltpu.MemorySpace.VMEM)

    @jax.jit
    def forward(embed, vecs, mats, src, mask):
        # Embedding gather (glue in plain JAX), * sqrt(d_model); dropout = identity.
        x = jnp.take(embed, src.reshape(-1), axis=0).astype(jnp.float32)
        x = x * math.sqrt(d_model)                           # [BS, D]

        # Block-diagonal (per-batch) causal additive bias, tiled across heads:
        # 0 where attention is allowed, -1e30 elsewhere (finite -> no NaNs).
        bias_ss = jnp.where(mask == 0.0, jnp.float32(NEG_BIG), jnp.float32(0.0))
        bb = jnp.arange(BS) // seq
        same_batch = bb[:, None] == bb[None, :]
        bias_bs = jnp.where(same_batch, jnp.tile(bias_ss, (batch, batch)),
                            jnp.float32(NEG_BIG))            # [BS, BS]
        bias_packed = jnp.tile(bias_bs, (1, nhead))           # [BS, H*BS]

        # Head block mask for packed K/V (row block h keeps only head-h lanes).
        rh = jnp.arange(P) // BS
        ch = jnp.arange(d_model) // hd
        head_mask = (rh[:, None] == ch[None, :]).astype(jnp.float32)   # [P, D]

        # Block-indicator matrix: per-head softmax denominators via one matmul.
        cb = jnp.arange(P) // BS
        block_mat = (cb[:, None] == cb[None, :]).astype(jnp.bfloat16)  # [P, P]

        n_in = 5 + len(mats)
        logits = pl.pallas_call(
            kernel,
            out_shape=jax.ShapeDtypeStruct((BS, vocab), jnp.float32),
            in_specs=[vmem_spec] * n_in,       # whole arrays, single DMA, no pipeline
            out_specs=vmem_spec,
        )(x, bias_packed, head_mask, block_mat, vecs, *mats)
        return logits.reshape(batch, seq, vocab)

    return forward


# ----------------------------- parameters -----------------------------

def init_params(key, vocab_size, d_model, nhead, num_layers, dim_ff):
    head_dim = d_model // nhead
    keys = iter(jax.random.split(key, 128))

    def nrm(shape, std):
        return (std * jax.random.normal(next(keys), shape)).astype(jnp.float32)

    def xav(fan_in, fan_out):                 # xavier_uniform-ish, gain 1/sqrt(2)
        std = (1.0 / math.sqrt(2.0)) * math.sqrt(2.0 / (fan_in + fan_out))
        return nrm((fan_in, fan_out), std)

    ones = lambda n: jnp.ones((1, n), jnp.float32)
    zeros = lambda n: jnp.zeros((1, n), jnp.float32)

    params = {"embed": jnp.clip(nrm((vocab_size, d_model), 0.02), -0.04, 0.04)}
    layers = []
    for i in range(num_layers):
        nkv = max(1, nhead // (2 ** min(i, 2)))
        kvd = nkv * head_dim
        ls = 0.01 / (i + 1)
        layers.append(dict(
            nkv=nkv,
            ln1_w=ones(d_model), ln1_b=zeros(d_model),
            wq=xav(d_model, d_model), bq=zeros(d_model),
            wk=xav(d_model, kvd), bk=zeros(kvd),
            wv=xav(d_model, kvd), bv=zeros(kvd),
            wo=xav(d_model, d_model), bo=zeros(d_model),
            ls1=ls * ones(d_model),
            ln2_w=ones(d_model), ln2_b=zeros(d_model),
            w1=xav(d_model, dim_ff), b1=zeros(dim_ff),
            w1g=xav(d_model, dim_ff), b1g=zeros(dim_ff),
            w2=xav(dim_ff, d_model), b2=zeros(d_model),
            ls2=ls * ones(d_model),
        ))
    params["layers"] = layers

    d_ff2 = dim_ff * 2
    params["moe"] = dict(
        ln_a_w=ones(d_model), ln_a_b=zeros(d_model),
        w1=nrm((d_model, d_ff2), 0.02), b1=zeros(d_ff2),
        w2=nrm((d_ff2, d_model), 0.02), b2=zeros(d_model),
        ln_b_w=ones(d_model), ln_b_b=zeros(d_model),
    )
    params["norm_w"] = ones(d_model)
    params["norm_b"] = zeros(d_model)
    params["out_b"] = zeros(vocab_size)       # tied output weight = embed.T
    return params


# ----------------------------- pure-JAX reference -----------------------------

def _ref_block(x, mask, lp, nhead):
    B, S, D = x.shape
    hd = D // nhead
    nkv = lp["nkv"]
    groups = nhead // nkv
    scale = hd ** (-0.5)

    xn = _layernorm(x, lp["ln1_w"], lp["ln1_b"])
    q = xn @ lp["wq"] + lp["bq"]
    k = xn @ lp["wk"] + lp["bk"]
    v = xn @ lp["wv"] + lp["bv"]
    q = q.reshape(B, S, nhead, hd).transpose(0, 2, 1, 3)
    k = jnp.repeat(k.reshape(B, S, nkv, hd), groups, axis=2).transpose(0, 2, 1, 3)
    v = jnp.repeat(v.reshape(B, S, nkv, hd), groups, axis=2).transpose(0, 2, 1, 3)
    s = jnp.einsum("bhqd,bhkd->bhqk", q, k) * scale
    s = jnp.where(mask == 0.0, -jnp.inf, s)
    p = jax.nn.softmax(s, axis=-1)
    o = jnp.einsum("bhqk,bhkd->bhqd", p, v).transpose(0, 2, 1, 3).reshape(B, S, D)
    o = o @ lp["wo"] + lp["bo"]
    x = x + lp["ls1"] * o

    xn2 = _layernorm(x, lp["ln2_w"], lp["ln2_b"])
    h1 = xn2 @ lp["w1"] + lp["b1"]
    hg = xn2 @ lp["w1g"] + lp["b1g"]
    ff = (h1 * (hg * jax.nn.sigmoid(hg))) @ lp["w2"] + lp["b2"]
    return x + lp["ls2"] * ff


def reference_forward(params, src, mask, nhead):
    D = params["embed"].shape[1]
    x = jnp.take(params["embed"], src, axis=0).astype(jnp.float32) * math.sqrt(D)
    for lp in params["layers"]:
        x = _ref_block(x, mask, lp, nhead)
    mp = params["moe"]
    h = _layernorm(x, mp["ln_a_w"], mp["ln_a_b"])
    h = h @ mp["w1"] + mp["b1"]
    h = 0.5 * h * (1.0 + jax.lax.erf(h * INV_SQRT2))
    h = h @ mp["w2"] + mp["b2"]
    h = _layernorm(h, mp["ln_b_w"], mp["ln_b_b"])
    h = _layernorm(h, params["norm_w"], params["norm_b"])
    return h @ params["embed"].T + params["out_b"]


# ----------------------------- main -----------------------------

if __name__ == "__main__":
    VOCAB, D_MODEL, NHEAD, NUM_LAYERS, DIM_FF = 128, 64, 4, 2, 128
    B, S = 2, 16

    root = jax.random.PRNGKey(0)
    k_params, k_src = jax.random.split(root)
    params = init_params(k_params, VOCAB, D_MODEL, NHEAD, NUM_LAYERS, DIM_FF)
    src = jax.random.randint(k_src, (B, S), 0, VOCAB, dtype=jnp.int32)

    # Explicit causal mask: 1 on/below the diagonal, 0 above.  Through GQA's
    # `masked_fill(mask == 0, -inf)` this gives standard causal attention.
    # TODO(synk): the module's *default* generated mask (0/-inf float) produces
    # NaN softmax rows through that same code path; not reproduced here.
    mask = jnp.tril(jnp.ones((S, S), jnp.float32))

    vecs, mats = pack_params(params, NHEAD)
    forward = build_forward(NUM_LAYERS, NHEAD, D_MODEL, DIM_FF, VOCAB, B, S)

    logits = forward(params["embed"], vecs, mats, src, mask)
    logits = jax.block_until_ready(logits)

    ref = reference_forward(params, src, mask, NHEAD)
    max_err = float(jnp.max(jnp.abs(logits - ref)))

    assert logits.shape == (B, S, VOCAB), logits.shape
    assert bool(jnp.all(jnp.isfinite(logits))), "non-finite logits"
    assert max_err < 5e-2, f"mismatch vs reference: {max_err}"
    print("KERNEL_OK")
</pallas_src>

<mosaic_0001>
module attributes {stable_mosaic.version = 11 : i64} {
  func.func @kernel(%arg0: memref<32x64xf32, #tpu.memory_space<vmem>>, %arg1: memref<32x128xf32, #tpu.memory_space<vmem>>, %arg2: memref<128x64xf32, #tpu.memory_space<vmem>>, %arg3: memref<128x128xbf16, #tpu.memory_space<vmem>>, %arg4: memref<32x256xf32, #tpu.memory_space<vmem>>, %arg5: memref<64x192xbf16, #tpu.memory_space<vmem>>, %arg6: memref<64x64xbf16, #tpu.memory_space<vmem>>, %arg7: memref<64x256xbf16, #tpu.memory_space<vmem>>, %arg8: memref<128x64xbf16, #tpu.memory_space<vmem>>, %arg9: memref<64x192xbf16, #tpu.memory_space<vmem>>, %arg10: memref<64x64xbf16, #tpu.memory_space<vmem>>, %arg11: memref<64x256xbf16, #tpu.memory_space<vmem>>, %arg12: memref<128x64xbf16, #tpu.memory_space<vmem>>, %arg13: memref<64x256xbf16, #tpu.memory_space<vmem>>, %arg14: memref<256x64xbf16, #tpu.memory_space<vmem>>, %arg15: memref<64x128xbf16, #tpu.memory_space<vmem>>, %arg16: memref<32x128xf32, #tpu.memory_space<vmem>>) attributes {dimension_semantics = [], scalar_prefetch = 0 : i64, scratch_operands = 0 : i64, tpu.core_type = #tpu.core_type<tc>} {
    %c0 = arith.constant 0 : index
    %c0_0 = arith.constant 0 : index
    %0 = vector.load %arg0[%c0, %c0_0] : memref<32x64xf32, #tpu.memory_space<vmem>>, vector<32x64xf32>
    %c0_1 = arith.constant 0 : index
    %c0_2 = arith.constant 0 : index
    %1 = vector.load %arg1[%c0_1, %c0_2] : memref<32x128xf32, #tpu.memory_space<vmem>>, vector<32x128xf32>
    %c0_3 = arith.constant 0 : index
    %c0_4 = arith.constant 0 : index
    %2 = vector.load %arg2[%c0_3, %c0_4] : memref<128x64xf32, #tpu.memory_space<vmem>>, vector<128x64xf32>
    %c0_5 = arith.constant 0 : index
    %c0_6 = arith.constant 0 : index
    %3 = vector.load %arg3[%c0_5, %c0_6] : memref<128x128xbf16, #tpu.memory_space<vmem>>, vector<128x128xbf16>
    %c0_7 = arith.constant 0 : index
    %c0_8 = arith.constant 0 : index
    %4 = vector.load %arg4[%c0_7, %c0_8] : memref<32x256xf32, #tpu.memory_space<vmem>>, vector<1x64xf32>
    %c1 = arith.constant 1 : index
    %c0_9 = arith.constant 0 : index
    %5 = vector.load %arg4[%c1, %c0_9] : memref<32x256xf32, #tpu.memory_space<vmem>>, vector<1x64xf32>
    %c2 = arith.constant 2 : index
    %c0_10 = arith.constant 0 : index
    %6 = vector.load %arg4[%c2, %c0_10] : memref<32x256xf32, #tpu.memory_space<vmem>>, vector<1x192xf32>
    %c3 = arith.constant 3 : index
    %c0_11 = arith.constant 0 : index
    %7 = vector.load %arg4[%c3, %c0_11] : memref<32x256xf32, #tpu.memory_space<vmem>>, vector<1x64xf32>
    %c4 = arith.constant 4 : index
    %c0_12 = arith.constant 0 : index
    %8 = vector.load %arg4[%c4, %c0_12] : memref<32x256xf32, #tpu.memory_space<vmem>>, vector<1x64xf32>
    %c5 = arith.constant 5 : index
    %c0_13 = arith.constant 0 : index
    %9 = vector.load %arg4[%c5, %c0_13] : memref<32x256xf32, #tpu.memory_space<vmem>>, vector<1x64xf32>
    %c6 = arith.constant 6 : index
    %c0_14 = arith.constant 0 : index
    %10 = vector.load %arg4[%c6, %c0_14] : memref<32x256xf32, #tpu.memory_space<vmem>>, vector<1x64xf32>
    %c7 = arith.constant 7 : index
    %c0_15 = arith.constant 0 : index
    %11 = vector.load %arg4[%c7, %c0_15] : memref<32x256xf32, #tpu.memory_space<vmem>>, vector<1x256xf32>
    %c8 = arith.constant 8 : index
    %c0_16 = arith.constant 0 : index
    %12 = vector.load %arg4[%c8, %c0_16] : memref<32x256xf32, #tpu.memory_space<vmem>>, vector<1x64xf32>
    %c9 = arith.constant 9 : index
    %c0_17 = arith.constant 0 : index
    %13 = vector.load %arg4[%c9, %c0_17] : memref<32x256xf32, #tpu.memory_space<vmem>>, vector<1x64xf32>
    %c0_18 = arith.constant 0 : index
    %c0_19 = arith.constant 0 : index
    %14 = vector.load %arg5[%c0_18, %c0_19] : memref<64x192xbf16, #tpu.memory_space<vmem>>, vector<64x192xbf16>
    %c0_20 = arith.constant 0 : index
    %c0_21 = arith.constant 0 : index
    %15 = vector.load %arg6[%c0_20, %c0_21] : memref<64x64xbf16, #tpu.memory_space<vmem>>, vector<64x64xbf16>
    %c0_22 = arith.constant 0 : index
    %c0_23 = arith.constant 0 : index
    %16 = vector.load %arg7[%c0_22, %c0_23] : memref<64x256xbf16, #tpu.memory_space<vmem>>, vector<64x256xbf16>
    %c0_24 = arith.constant 0 : index
    %c0_25 = arith.constant 0 : index
    %17 = vector.load %arg8[%c0_24, %c0_25] : memref<128x64xbf16, #tpu.memory_space<vmem>>, vector<128x64xbf16>
    %cst = arith.constant dense<0.000000e+00> : vector<32xf32>
    %18 = vector.multi_reduction <add>, %0, %cst [1] : vector<32x64xf32> to vector<32xf32>
    %19 = vector.shape_cast %18 : vector<32xf32> to vector<32x1xf32>
    %cst_26 = arith.constant 6.400000e+01 : f32
    %20 = vector.broadcast %cst_26 : f32 to vector<32x1xf32>
    %21 = arith.divf %19, %20 : vector<32x1xf32>
    %22 = vector.broadcast %21 : vector<32x1xf32> to vector<32x64xf32>
    %23 = arith.subf %0, %22 : vector<32x64xf32>
    %24 = arith.mulf %23, %23 : vector<32x64xf32>
    %cst_27 = arith.constant dense<0.000000e+00> : vector<32xf32>
    %25 = vector.multi_reduction <add>, %24, %cst_27 [1] : vector<32x64xf32> to vector<32xf32>
    %26 = vector.shape_cast %25 : vector<32xf32> to vector<32x1xf32>
    %cst_28 = arith.constant 6.400000e+01 : f32
    %27 = vector.broadcast %cst_28 : f32 to vector<32x1xf32>
    %28 = arith.divf %26, %27 : vector<32x1xf32>
    %29 = vector.broadcast %21 : vector<32x1xf32> to vector<32x64xf32>
    %30 = arith.subf %0, %29 : vector<32x64xf32>
    %cst_29 = arith.constant 9.99999974E-6 : f32
    %31 = vector.broadcast %cst_29 : f32 to vector<32x1xf32>
    %32 = arith.addf %28, %31 : vector<32x1xf32>
    %33 = math.rsqrt %32 : vector<32x1xf32>
    %34 = vector.broadcast %33 : vector<32x1xf32> to vector<32x64xf32>
    %35 = arith.mulf %30, %34 : vector<32x64xf32>
    %36 = vector.broadcast %4 : vector<1x64xf32> to vector<32x64xf32>
    %37 = arith.mulf %35, %36 : vector<32x64xf32>
    %38 = vector.broadcast %5 : vector<1x64xf32> to vector<32x64xf32>
    %39 = arith.addf %37, %38 : vector<32x64xf32>
    %40 = arith.truncf %39 : vector<32x64xf32> to vector<32x64xbf16>
    %cst_30 = arith.constant dense<0.000000e+00> : vector<32x192xf32>
    %41 = tpu.matmul %40, %14, %cst_30 {dimension_numbers = #tpu.dot_dimension_numbers<[1], [0], [0], [1], [0, 0, 1, 1], [], []>} : vector<32x64xbf16>, vector<64x192xbf16>, vector<32x192xf32> -> vector<32x192xf32>
    %42 = vector.broadcast %6 : vector<1x192xf32> to vector<32x192xf32>
    %43 = arith.addf %41, %42 : vector<32x192xf32>
    %44 = vector.extract_strided_slice %43 {offsets = [0, 0], sizes = [32, 64], strides = [1, 1]} : vector<32x192xf32> to vector<32x64xf32>
    %45 = vector.extract_strided_slice %43 {offsets = [0, 64], sizes = [32, 64], strides = [1, 1]} : vector<32x192xf32> to vector<32x64xf32>
    %46 = vector.extract_strided_slice %43 {offsets = [0, 128], sizes = [32, 64], strides = [1, 1]} : vector<32x192xf32> to vector<32x64xf32>
    %47 = tpu.concatenate %45, %45, %45, %45 in 0 : vector<32x64xf32>, vector<32x64xf32>, vector<32x64xf32>, vector<32x64xf32> -> vector<128x64xf32>
    %48 = arith.mulf %47, %2 : vector<128x64xf32>
    %49 = arith.truncf %48 : vector<128x64xf32> to vector<128x64xbf16>
    %50 = tpu.concatenate %46, %46, %46, %46 in 0 : vector<32x64xf32>, vector<32x64xf32>, vector<32x64xf32>, vector<32x64xf32> -> vector<128x64xf32>
    %51 = arith.mulf %50, %2 : vector<128x64xf32>
    %52 = arith.truncf %51 : vector<128x64xf32> to vector<128x64xbf16>
    %53 = arith.truncf %44 : vector<32x64xf32> to vector<32x64xbf16>
    %cst_31 = arith.constant dense<0.000000e+00> : vector<32x128xf32>
    %54 = tpu.matmul %53, %49, %cst_31 {dimension_numbers = #tpu.dot_dimension_numbers<[1], [1], [0], [0], [0, 0, 1, 0], [], []>} : vector<32x64xbf16>, vector<128x64xbf16>, vector<32x128xf32> -> vector<32x128xf32>
    %cst_32 = arith.constant 2.500000e-01 : f32
    %55 = vector.broadcast %cst_32 : f32 to vector<32x128xf32>
    %56 = arith.mulf %54, %55 : vector<32x128xf32>
    %57 = arith.addf %56, %1 : vector<32x128xf32>
    %cst_33 = arith.constant dense<0xFF800000> : vector<32xf32>
    %58 = vector.multi_reduction <maximumf>, %57, %cst_33 [1] : vector<32x128xf32> to vector<32xf32>
    %59 = vector.shape_cast %58 : vector<32xf32> to vector<32x1xf32>
    %60 = vector.broadcast %59 : vector<32x1xf32> to vector<32x128xf32>
    %61 = arith.subf %57, %60 : vector<32x128xf32>
    %62 = math.exp %61 : vector<32x128xf32>
    %63 = arith.truncf %62 : vector<32x128xf32> to vector<32x128xbf16>
    %cst_34 = arith.constant dense<0.000000e+00> : vector<32x128xf32>
    %64 = tpu.matmul %63, %3, %cst_34 {dimension_numbers = #tpu.dot_dimension_numbers<[1], [0], [0], [1], [0, 0, 1, 1], [], []>} : vector<32x128xbf16>, vector<128x128xbf16>, vector<32x128xf32> -> vector<32x128xf32>
    %65 = tpu.reciprocal %64 {approx = true} : vector<32x128xf32> -> vector<32x128xf32>
    %66 = arith.mulf %62, %65 : vector<32x128xf32>
    %67 = arith.truncf %66 : vector<32x128xf32> to vector<32x128xbf16>
    %cst_35 = arith.constant dense<0.000000e+00> : vector<32x64xf32>
    %68 = tpu.matmul %67, %52, %cst_35 {dimension_numbers = #tpu.dot_dimension_numbers<[1], [0], [0], [1], [0, 0, 1, 1], [], []>} : vector<32x128xbf16>, vector<128x64xbf16>, vector<32x64xf32> -> vector<32x64xf32>
    %69 = arith.truncf %68 : vector<32x64xf32> to vector<32x64xbf16>
    %cst_36 = arith.constant dense<0.000000e+00> : vector<32x64xf32>
    %70 = tpu.matmul %69, %15, %cst_36 {dimension_numbers = #tpu.dot_dimension_numbers<[1], [0], [0], [1], [0, 0, 1, 1], [], []>} : vector<32x64xbf16>, vector<64x64xbf16>, vector<32x64xf32> -> vector<32x64xf32>
    %71 = vector.broadcast %7 : vector<1x64xf32> to vector<32x64xf32>
    %72 = arith.addf %70, %71 : vector<32x64xf32>
    %73 = vector.broadcast %8 : vector<1x64xf32> to vector<32x64xf32>
    %74 = arith.mulf %73, %72 : vector<32x64xf32>
    %75 = arith.addf %0, %74 : vector<32x64xf32>
    %cst_37 = arith.constant dense<0.000000e+00> : vector<32xf32>
    %76 = vector.multi_reduction <add>, %75, %cst_37 [1] : vector<32x64xf32> to vector<32xf32>
    %77 = vector.shape_cast %76 : vector<32xf32> to vector<32x1xf32>
    %cst_38 = arith.constant 6.400000e+01 : f32
    %78 = vector.broadcast %cst_38 : f32 to vector<32x1xf32>
    %79 = arith.divf %77, %78 : vector<32x1xf32>
    %80 = vector.broadcast %79 : vector<32x1xf32> to vector<32x64xf32>
    %81 = arith.subf %75, %80 : vector<32x64xf32>
    %82 = arith.mulf %81, %81 : vector<32x64xf32>
    %cst_39 = arith.constant dense<0.000000e+00> : vector<32xf32>
    %83 = vector.multi_reduction <add>, %82, %cst_39 [1] : vector<32x64xf32> to vector<32xf32>
    %84 = vector.shape_cast %83 : vector<32xf32> to vector<32x1xf32>
    %cst_40 = arith.constant 6.400000e+01 : f32
    %85 = vector.broadcast %cst_40 : f32 to vector<32x1xf32>
    %86 = arith.divf %84, %85 : vector<32x1xf32>
    %87 = vector.broadcast %79 : vector<32x1xf32> to vector<32x64xf32>
    %88 = arith.subf %75, %87 : vector<32x64xf32>
    %cst_41 = arith.constant 9.99999974E-6 : f32
    %89 = vector.broadcast %cst_41 : f32 to vector<32x1xf32>
    %90 = arith.addf %86, %89 : vector<32x1xf32>
    %91 = math.rsqrt %90 : vector<32x1xf32>
    %92 = vector.broadcast %91 : vector<32x1xf32> to vector<32x64xf32>
    %93 = arith.mulf %88, %92 : vector<32x64xf32>
    %94 = vector.broadcast %9 : vector<1x64xf32> to vector<32x64xf32>
    %95 = arith.mulf %93, %94 : vector<32x64xf32>
    %96 = vector.broadcast %10 : vector<1x64xf32> to vector<32x64xf32>
    %97 = arith.addf %95, %96 : vector<32x64xf32>
    %98 = arith.truncf %97 : vector<32x64xf32> to vector<32x64xbf16>
    %cst_42 = arith.constant dense<0.000000e+00> : vector<32x256xf32>
    %99 = tpu.matmul %98, %16, %cst_42 {dimension_numbers = #tpu.dot_dimension_numbers<[1], [0], [0], [1], [0, 0, 1, 1], [], []>} : vector<32x64xbf16>, vector<64x256xbf16>, vector<32x256xf32> -> vector<32x256xf32>
    %100 = vector.broadcast %11 : vector<1x256xf32> to vector<32x256xf32>
    %101 = arith.addf %99, %100 : vector<32x256xf32>
    %102 = vector.extract_strided_slice %101 {offsets = [0, 0], sizes = [32, 128], strides = [1, 1]} : vector<32x256xf32> to vector<32x128xf32>
    %103 = vector.extract_strided_slice %101 {offsets = [0, 128], sizes = [32, 128], strides = [1, 1]} : vector<32x256xf32> to vector<32x128xf32>
    %104 = arith.negf %103 : vector<32x128xf32>
    %105 = math.exp %104 : vector<32x128xf32>
    %cst_43 = arith.constant 1.000000e+00 : f32
    %106 = vector.broadcast %cst_43 : f32 to vector<32x128xf32>
    %107 = arith.addf %106, %105 : vector<32x128xf32>
    %108 = arith.divf %106, %107 : vector<32x128xf32>
    %109 = arith.mulf %103, %108 : vector<32x128xf32>
    %110 = arith.mulf %102, %109 : vector<32x128xf32>
    %111 = arith.truncf %110 : vector<32x128xf32> to vector<32x128xbf16>
    %cst_44 = arith.constant dense<0.000000e+00> : vector<32x64xf32>
    %112 = tpu.matmul %111, %17, %cst_44 {dimension_numbers = #tpu.dot_dimension_numbers<[1], [0], [0], [1], [0, 0, 1, 1], [], []>} : vector<32x128xbf16>, vector<128x64xbf16>, vector<32x64xf32> -> vector<32x64xf32>
    %113 = vector.broadcast %12 : vector<1x64xf32> to vector<32x64xf32>
    %114 = arith.addf %112, %113 : vector<32x64xf32>
    %115 = vector.broadcast %13 : vector<1x64xf32> to vector<32x64xf32>
    %116 = arith.mulf %115, %114 : vector<32x64xf32>
    %117 = arith.addf %75, %116 : vector<32x64xf32>
    %c10 = arith.constant 10 : index
    %c0_45 = arith.constant 0 : index
    %118 = vector.load %arg4[%c10, %c0_45] : memref<32x256xf32, #tpu.memory_space<vmem>>, vector<1x64xf32>
    %c11 = arith.constant 11 : index
    %c0_46 = arith.constant 0 : index
    %119 = vector.load %arg4[%c11, %c0_46] : memref<32x256xf32, #tpu.memory_space<vmem>>, vector<1x64xf32>
    %c12 = arith.constant 12 : index
    %c0_47 = arith.constant 0 : index
    %120 = vector.load %arg4[%c12, %c0_47] : memref<32x256xf32, #tpu.memory_space<vmem>>, vector<1x192xf32>
    %c13 = arith.constant 13 : index
    %c0_48 = arith.constant 0 : index
    %121 = vector.load %arg4[%c13, %c0_48] : memref<32x256xf32, #tpu.memory_space<vmem>>, vector<1x64xf32>
    %c14 = arith.constant 14 : index
    %c0_49 = arith.constant 0 : index
    %122 = vector.load %arg4[%c14, %c0_49] : memref<32x256xf32, #tpu.memory_space<vmem>>, vector<1x64xf32>
    %c15 = arith.constant 15 : index
    %c0_50 = arith.constant 0 : index
    %123 = vector.load %arg4[%c15, %c0_50] : memref<32x256xf32, #tpu.memory_space<vmem>>, vector<1x64xf32>
    %c16 = arith.constant 16 : index
    %c0_51 = arith.constant 0 : index
    %124 = vector.load %arg4[%c16, %c0_51] : memref<32x256xf32, #tpu.memory_space<vmem>>, vector<1x64xf32>
    %c17 = arith.constant 17 : index
    %c0_52 = arith.constant 0 : index
    %125 = vector.load %arg4[%c17, %c0_52] : memref<32x256xf32, #tpu.memory_space<vmem>>, vector<1x256xf32>
    %c18 = arith.constant 18 : index
    %c0_53 = arith.constant 0 : index
    %126 = vector.load %arg4[%c18, %c0_53] : memref<32x256xf32, #tpu.memory_space<vmem>>, vector<1x64xf32>
    %c19 = arith.constant 19 : index
    %c0_54 = arith.constant 0 : index
    %127 = vector.load %arg4[%c19, %c0_54] : memref<32x256xf32, #tpu.memory_space<vmem>>, vector<1x64xf32>
    %c0_55 = arith.constant 0 : index
    %c0_56 = arith.constant 0 : index
    %128 = vector.load %arg9[%c0_55, %c0_56] : memref<64x192xbf16, #tpu.memory_space<vmem>>, vector<64x192xbf16>
    %c0_57 = arith.constant 0 : index
    %c0_58 = arith.constant 0 : index
    %129 = vector.load %arg10[%c0_57, %c0_58] : memref<64x64xbf16, #tpu.memory_space<vmem>>, vector<64x64xbf16>
    %c0_59 = arith.constant 0 : index
    %c0_60 = arith.constant 0 : index
    %130 = vector.load %arg11[%c0_59, %c0_60] : memref<64x256xbf16, #tpu.memory_space<vmem>>, vector<64x256xbf16>
    %c0_61 = arith.constant 0 : index
    %c0_62 = arith.constant 0 : index
    %131 = vector.load %arg12[%c0_61, %c0_62] : memref<128x64xbf16, #tpu.memory_space<vmem>>, vector<128x64xbf16>
    %cst_63 = arith.constant dense<0.000000e+00> : vector<32xf32>
    %132 = vector.multi_reduction <add>, %117, %cst_63 [1] : vector<32x64xf32> to vector<32xf32>
    %133 = vector.shape_cast %132 : vector<32xf32> to vector<32x1xf32>
    %cst_64 = arith.constant 6.400000e+01 : f32
    %134 = vector.broadcast %cst_64 : f32 to vector<32x1xf32>
    %135 = arith.divf %133, %134 : vector<32x1xf32>
    %136 = vector.broadcast %135 : vector<32x1xf32> to vector<32x64xf32>
    %137 = arith.subf %117, %136 : vector<32x64xf32>
    %138 = arith.mulf %137, %137 : vector<32x64xf32>
    %cst_65 = arith.constant dense<0.000000e+00> : vector<32xf32>
    %139 = vector.multi_reduction <add>, %138, %cst_65 [1] : vector<32x64xf32> to vector<32xf32>
    %140 = vector.shape_cast %139 : vector<32xf32> to vector<32x1xf32>
    %cst_66 = arith.constant 6.400000e+01 : f32
    %141 = vector.broadcast %cst_66 : f32 to vector<32x1xf32>
    %142 = arith.divf %140, %141 : vector<32x1xf32>
    %143 = vector.broadcast %135 : vector<32x1xf32> to vector<32x64xf32>
    %144 = arith.subf %117, %143 : vector<32x64xf32>
    %cst_67 = arith.constant 9.99999974E-6 : f32
    %145 = vector.broadcast %cst_67 : f32 to vector<32x1xf32>
    %146 = arith.addf %142, %145 : vector<32x1xf32>
    %147 = math.rsqrt %146 : vector<32x1xf32>
    %148 = vector.broadcast %147 : vector<32x1xf32> to vector<32x64xf32>
    %149 = arith.mulf %144, %148 : vector<32x64xf32>
    %150 = vector.broadcast %118 : vector<1x64xf32> to vector<32x64xf32>
    %151 = arith.mulf %149, %150 : vector<32x64xf32>
    %152 = vector.broadcast %119 : vector<1x64xf32> to vector<32x64xf32>
    %153 = arith.addf %151, %152 : vector<32x64xf32>
    %154 = arith.truncf %153 : vector<32x64xf32> to vector<32x64xbf16>
    %cst_68 = arith.constant dense<0.000000e+00> : vector<32x192xf32>
    %155 = tpu.matmul %154, %128, %cst_68 {dimension_numbers = #tpu.dot_dimension_numbers<[1], [0], [0], [1], [0, 0, 1, 1], [], []>} : vector<32x64xbf16>, vector<64x192xbf16>, vector<32x192xf32> -> vector<32x192xf32>
    %156 = vector.broadcast %120 : vector<1x192xf32> to vector<32x192xf32>
    %157 = arith.addf %155, %156 : vector<32x192xf32>
    %158 = vector.extract_strided_slice %157 {offsets = [0, 0], sizes = [32, 64], strides = [1, 1]} : vector<32x192xf32> to vector<32x64xf32>
    %159 = vector.extract_strided_slice %157 {offsets = [0, 64], sizes = [32, 64], strides = [1, 1]} : vector<32x192xf32> to vector<32x64xf32>
    %160 = vector.extract_strided_slice %157 {offsets = [0, 128], sizes = [32, 64], strides = [1, 1]} : vector<32x192xf32> to vector<32x64xf32>
    %161 = tpu.concatenate %159, %159, %159, %159 in 0 : vector<32x64xf32>, vector<32x64xf32>, vector<32x64xf32>, vector<32x64xf32> -> vector<128x64xf32>
    %162 = arith.mulf %161, %2 : vector<128x64xf32>
    %163 = arith.truncf %162 : vector<128x64xf32> to vector<128x64xbf16>
    %164 = tpu.concatenate %160, %160, %160, %160 in 0 : vector<32x64xf32>, vector<32x64xf32>, vector<32x64xf32>, vector<32x64xf32> -> vector<128x64xf32>
    %165 = arith.mulf %164, %2 : vector<128x64xf32>
    %166 = arith.truncf %165 : vector<128x64xf32> to vector<128x64xbf16>
    %167 = arith.truncf %158 : vector<32x64xf32> to vector<32x64xbf16>
    %cst_69 = arith.constant dense<0.000000e+00> : vector<32x128xf32>
    %168 = tpu.matmul %167, %163, %cst_69 {dimension_numbers = #tpu.dot_dimension_numbers<[1], [1], [0], [0], [0, 0, 1, 0], [], []>} : vector<32x64xbf16>, vector<128x64xbf16>, vector<32x128xf32> -> vector<32x128xf32>
    %cst_70 = arith.constant 2.500000e-01 : f32
    %169 = vector.broadcast %cst_70 : f32 to vector<32x128xf32>
    %170 = arith.mulf %168, %169 : vector<32x128xf32>
    %171 = arith.addf %170, %1 : vector<32x128xf32>
    %cst_71 = arith.constant dense<0xFF800000> : vector<32xf32>
    %172 = vector.multi_reduction <maximumf>, %171, %cst_71 [1] : vector<32x128xf32> to vector<32xf32>
    %173 = vector.shape_cast %172 : vector<32xf32> to vector<32x1xf32>
    %174 = vector.broadcast %173 : vector<32x1xf32> to vector<32x128xf32>
    %175 = arith.subf %171, %174 : vector<32x128xf32>
    %176 = math.exp %175 : vector<32x128xf32>
    %177 = arith.truncf %176 : vector<32x128xf32> to vector<32x128xbf16>
    %cst_72 = arith.constant dense<0.000000e+00> : vector<32x128xf32>
    %178 = tpu.matmul %177, %3, %cst_72 {dimension_numbers = #tpu.dot_dimension_numbers<[1], [0], [0], [1], [0, 0, 1, 1], [], []>} : vector<32x128xbf16>, vector<128x128xbf16>, vector<32x128xf32> -> vector<32x128xf32>
    %179 = tpu.reciprocal %178 {approx = true} : vector<32x128xf32> -> vector<32x128xf32>
    %180 = arith.mulf %176, %179 : vector<32x128xf32>
    %181 = arith.truncf %180 : vector<32x128xf32> to vector<32x128xbf16>
    %cst_73 = arith.constant dense<0.000000e+00> : vector<32x64xf32>
    %182 = tpu.matmul %181, %166, %cst_73 {dimension_numbers = #tpu.dot_dimension_numbers<[1], [0], [0], [1], [0, 0, 1, 1], [], []>} : vector<32x128xbf16>, vector<128x64xbf16>, vector<32x64xf32> -> vector<32x64xf32>
    %183 = arith.truncf %182 : vector<32x64xf32> to vector<32x64xbf16>
    %cst_74 = arith.constant dense<0.000000e+00> : vector<32x64xf32>
    %184 = tpu.matmul %183, %129, %cst_74 {dimension_numbers = #tpu.dot_dimension_numbers<[1], [0], [0], [1], [0, 0, 1, 1], [], []>} : vector<32x64xbf16>, vector<64x64xbf16>, vector<32x64xf32> -> vector<32x64xf32>
    %185 = vector.broadcast %121 : vector<1x64xf32> to vector<32x64xf32>
    %186 = arith.addf %184, %185 : vector<32x64xf32>
    %187 = vector.broadcast %122 : vector<1x64xf32> to vector<32x64xf32>
    %188 = arith.mulf %187, %186 : vector<32x64xf32>
    %189 = arith.addf %117, %188 : vector<32x64xf32>
    %cst_75 = arith.constant dense<0.000000e+00> : vector<32xf32>
    %190 = vector.multi_reduction <add>, %189, %cst_75 [1] : vector<32x64xf32> to vector<32xf32>
    %191 = vector.shape_cast %190 : vector<32xf32> to vector<32x1xf32>
    %cst_76 = arith.constant 6.400000e+01 : f32
    %192 = vector.broadcast %cst_76 : f32 to vector<32x1xf32>
    %193 = arith.divf %191, %192 : vector<32x1xf32>
    %194 = vector.broadcast %193 : vector<32x1xf32> to vector<32x64xf32>
    %195 = arith.subf %189, %194 : vector<32x64xf32>
    %196 = arith.mulf %195, %195 : vector<32x64xf32>
    %cst_77 = arith.constant dense<0.000000e+00> : vector<32xf32>
    %197 = vector.multi_reduction <add>, %196, %cst_77 [1] : vector<32x64xf32> to vector<32xf32>
    %198 = vector.shape_cast %197 : vector<32xf32> to vector<32x1xf32>
    %cst_78 = arith.constant 6.400000e+01 : f32
    %199 = vector.broadcast %cst_78 : f32 to vector<32x1xf32>
    %200 = arith.divf %198, %199 : vector<32x1xf32>
    %201 = vector.broadcast %193 : vector<32x1xf32> to vector<32x64xf32>
    %202 = arith.subf %189, %201 : vector<32x64xf32>
    %cst_79 = arith.constant 9.99999974E-6 : f32
    %203 = vector.broadcast %cst_79 : f32 to vector<32x1xf32>
    %204 = arith.addf %200, %203 : vector<32x1xf32>
    %205 = math.rsqrt %204 : vector<32x1xf32>
    %206 = vector.broadcast %205 : vector<32x1xf32> to vector<32x64xf32>
    %207 = arith.mulf %202, %206 : vector<32x64xf32>
    %208 = vector.broadcast %123 : vector<1x64xf32> to vector<32x64xf32>
    %209 = arith.mulf %207, %208 : vector<32x64xf32>
    %210 = vector.broadcast %124 : vector<1x64xf32> to vector<32x64xf32>
    %211 = arith.addf %209, %210 : vector<32x64xf32>
    %212 = arith.truncf %211 : vector<32x64xf32> to vector<32x64xbf16>
    %cst_80 = arith.constant dense<0.000000e+00> : vector<32x256xf32>
    %213 = tpu.matmul %212, %130, %cst_80 {dimension_numbers = #tpu.dot_dimension_numbers<[1], [0], [0], [1], [0, 0, 1, 1], [], []>} : vector<32x64xbf16>, vector<64x256xbf16>, vector<32x256xf32> -> vector<32x256xf32>
    %214 = vector.broadcast %125 : vector<1x256xf32> to vector<32x256xf32>
    %215 = arith.addf %213, %214 : vector<32x256xf32>
    %216 = vector.extract_strided_slice %215 {offsets = [0, 0], sizes = [32, 128], strides = [1, 1]} : vector<32x256xf32> to vector<32x128xf32>
    %217 = vector.extract_strided_slice %215 {offsets = [0, 128], sizes = [32, 128], strides = [1, 1]} : vector<32x256xf32> to vector<32x128xf32>
    %218 = arith.negf %217 : vector<32x128xf32>
    %219 = math.exp %218 : vector<32x128xf32>
    %cst_81 = arith.constant 1.000000e+00 : f32
    %220 = vector.broadcast %cst_81 : f32 to vector<32x128xf32>
    %221 = arith.addf %220, %219 : vector<32x128xf32>
    %222 = arith.divf %220, %221 : vector<32x128xf32>
    %223 = arith.mulf %217, %222 : vector<32x128xf32>
    %224 = arith.mulf %216, %223 : vector<32x128xf32>
    %225 = arith.truncf %224 : vector<32x128xf32> to vector<32x128xbf16>
    %cst_82 = arith.constant dense<0.000000e+00> : vector<32x64xf32>
    %226 = tpu.matmul %225, %131, %cst_82 {dimension_numbers = #tpu.dot_dimension_numbers<[1], [0], [0], [1], [0, 0, 1, 1], [], []>} : vector<32x128xbf16>, vector<128x64xbf16>, vector<32x64xf32> -> vector<32x64xf32>
    %227 = vector.broadcast %126 : vector<1x64xf32> to vector<32x64xf32>
    %228 = arith.addf %226, %227 : vector<32x64xf32>
    %229 = vector.broadcast %127 : vector<1x64xf32> to vector<32x64xf32>
    %230 = arith.mulf %229, %228 : vector<32x64xf32>
    %231 = arith.addf %189, %230 : vector<32x64xf32>
    %c20 = arith.constant 20 : index
    %c0_83 = arith.constant 0 : index
    %232 = vector.load %arg4[%c20, %c0_83] : memref<32x256xf32, #tpu.memory_space<vmem>>, vector<1x64xf32>
    %c21 = arith.constant 21 : index
    %c0_84 = arith.constant 0 : index
    %233 = vector.load %arg4[%c21, %c0_84] : memref<32x256xf32, #tpu.memory_space<vmem>>, vector<1x64xf32>
    %c22 = arith.constant 22 : index
    %c0_85 = arith.constant 0 : index
    %234 = vector.load %arg4[%c22, %c0_85] : memref<32x256xf32, #tpu.memory_space<vmem>>, vector<1x256xf32>
    %c23 = arith.constant 23 : index
    %c0_86 = arith.constant 0 : index
    %235 = vector.load %arg4[%c23, %c0_86] : memref<32x256xf32, #tpu.memory_space<vmem>>, vector<1x64xf32>
    %c24 = arith.constant 24 : index
    %c0_87 = arith.constant 0 : index
    %236 = vector.load %arg4[%c24, %c0_87] : memref<32x256xf32, #tpu.memory_space<vmem>>, vector<1x64xf32>
    %c25 = arith.constant 25 : index
    %c0_88 = arith.constant 0 : index
    %237 = vector.load %arg4[%c25, %c0_88] : memref<32x256xf32, #tpu.memory_space<vmem>>, vector<1x64xf32>
    %c26 = arith.constant 26 : index
    %c0_89 = arith.constant 0 : index
    %238 = vector.load %arg4[%c26, %c0_89] : memref<32x256xf32, #tpu.memory_space<vmem>>, vector<1x64xf32>
    %c27 = arith.constant 27 : index
    %c0_90 = arith.constant 0 : index
    %239 = vector.load %arg4[%c27, %c0_90] : memref<32x256xf32, #tpu.memory_space<vmem>>, vector<1x64xf32>
    %c28 = arith.constant 28 : index
    %c0_91 = arith.constant 0 : index
    %240 = vector.load %arg4[%c28, %c0_91] : memref<32x256xf32, #tpu.memory_space<vmem>>, vector<1x128xf32>
    %c0_92 = arith.constant 0 : index
    %c0_93 = arith.constant 0 : index
    %241 = vector.load %arg13[%c0_92, %c0_93] : memref<64x256xbf16, #tpu.memory_space<vmem>>, vector<64x256xbf16>
    %c0_94 = arith.constant 0 : index
    %c0_95 = arith.constant 0 : index
    %242 = vector.load %arg14[%c0_94, %c0_95] : memref<256x64xbf16, #tpu.memory_space<vmem>>, vector<256x64xbf16>
    %c0_96 = arith.constant 0 : index
    %c0_97 = arith.constant 0 : index
    %243 = vector.load %arg15[%c0_96, %c0_97] : memref<64x128xbf16, #tpu.memory_space<vmem>>, vector<64x128xbf16>
    %cst_98 = arith.constant dense<0.000000e+00> : vector<32xf32>
    %244 = vector.multi_reduction <add>, %231, %cst_98 [1] : vector<32x64xf32> to vector<32xf32>
    %245 = vector.shape_cast %244 : vector<32xf32> to vector<32x1xf32>
    %cst_99 = arith.constant 6.400000e+01 : f32
    %246 = vector.broadcast %cst_99 : f32 to vector<32x1xf32>
    %247 = arith.divf %245, %246 : vector<32x1xf32>
    %248 = vector.broadcast %247 : vector<32x1xf32> to vector<32x64xf32>
    %249 = arith.subf %231, %248 : vector<32x64xf32>
    %250 = arith.mulf %249, %249 : vector<32x64xf32>
    %cst_100 = arith.constant dense<0.000000e+00> : vector<32xf32>
    %251 = vector.multi_reduction <add>, %250, %cst_100 [1] : vector<32x64xf32> to vector<32xf32>
    %252 = vector.shape_cast %251 : vector<32xf32> to vector<32x1xf32>
    %cst_101 = arith.constant 6.400000e+01 : f32
    %253 = vector.broadcast %cst_101 : f32 to vector<32x1xf32>
    %254 = arith.divf %252, %253 : vector<32x1xf32>
    %255 = vector.broadcast %247 : vector<32x1xf32> to vector<32x64xf32>
    %256 = arith.subf %231, %255 : vector<32x64xf32>
    %cst_102 = arith.constant 9.99999974E-6 : f32
    %257 = vector.broadcast %cst_102 : f32 to vector<32x1xf32>
    %258 = arith.addf %254, %257 : vector<32x1xf32>
    %259 = math.rsqrt %258 : vector<32x1xf32>
    %260 = vector.broadcast %259 : vector<32x1xf32> to vector<32x64xf32>
    %261 = arith.mulf %256, %260 : vector<32x64xf32>
    %262 = vector.broadcast %232 : vector<1x64xf32> to vector<32x64xf32>
    %263 = arith.mulf %261, %262 : vector<32x64xf32>
    %264 = vector.broadcast %233 : vector<1x64xf32> to vector<32x64xf32>
    %265 = arith.addf %263, %264 : vector<32x64xf32>
    %266 = arith.truncf %265 : vector<32x64xf32> to vector<32x64xbf16>
    %cst_103 = arith.constant dense<0.000000e+00> : vector<32x256xf32>
    %267 = tpu.matmul %266, %241, %cst_103 {dimension_numbers = #tpu.dot_dimension_numbers<[1], [0], [0], [1], [0, 0, 1, 1], [], []>} : vector<32x64xbf16>, vector<64x256xbf16>, vector<32x256xf32> -> vector<32x256xf32>
    %268 = vector.broadcast %234 : vector<1x256xf32> to vector<32x256xf32>
    %269 = arith.addf %267, %268 : vector<32x256xf32>
    %cst_104 = arith.constant 5.000000e-01 : f32
    %270 = vector.broadcast %cst_104 : f32 to vector<32x256xf32>
    %271 = arith.mulf %270, %269 : vector<32x256xf32>
    %cst_105 = arith.constant 0.707106769 : f32
    %272 = vector.broadcast %cst_105 : f32 to vector<32x256xf32>
    %273 = arith.mulf %269, %272 : vector<32x256xf32>
    %cst_106 = arith.constant 0.000000e+00 : f32
    %274 = vector.broadcast %cst_106 : f32 to vector<32x256xf32>
    %275 = arith.cmpf olt, %273, %274 : vector<32x256xf32>
    %cst_107 = arith.constant -1.000000e+00 : f32
    %cst_108 = arith.constant 1.000000e+00 : f32
    %276 = vector.broadcast %cst_107 : f32 to vector<32x256xf32>
    %277 = vector.broadcast %cst_108 : f32 to vector<32x256xf32>
    %278 = arith.select %275, %276, %277 : vector<32x256xi1>, vector<32x256xf32>
    %279 = math.absf %273 : vector<32x256xf32>
    %cst_109 = arith.constant 0.327591091 : f32
    %280 = vector.broadcast %cst_109 : f32 to vector<32x256xf32>
    %281 = arith.mulf %280, %279 : vector<32x256xf32>
    %cst_110 = arith.constant 1.000000e+00 : f32
    %282 = vector.broadcast %cst_110 : f32 to vector<32x256xf32>
    %283 = arith.addf %282, %281 : vector<32x256xf32>
    %284 = tpu.reciprocal %283 {approx = true} : vector<32x256xf32> -> vector<32x256xf32>
    %cst_111 = arith.constant 1.06140542 : f32
    %285 = vector.broadcast %cst_111 : f32 to vector<32x256xf32>
    %286 = arith.mulf %285, %284 : vector<32x256xf32>
    %cst_112 = arith.constant -1.45315206 : f32
    %287 = vector.broadcast %cst_112 : f32 to vector<32x256xf32>
    %288 = arith.addf %286, %287 : vector<32x256xf32>
    %289 = arith.mulf %288, %284 : vector<32x256xf32>
    %cst_113 = arith.constant 1.42141378 : f32
    %290 = vector.broadcast %cst_113 : f32 to vector<32x256xf32>
    %291 = arith.addf %289, %290 : vector<32x256xf32>
    %292 = arith.mulf %291, %284 : vector<32x256xf32>
    %cst_114 = arith.constant -0.284496725 : f32
    %293 = vector.broadcast %cst_114 : f32 to vector<32x256xf32>
    %294 = arith.addf %292, %293 : vector<32x256xf32>
    %295 = arith.mulf %294, %284 : vector<32x256xf32>
    %cst_115 = arith.constant 0.254829586 : f32
    %296 = vector.broadcast %cst_115 : f32 to vector<32x256xf32>
    %297 = arith.addf %295, %296 : vector<32x256xf32>
    %298 = arith.mulf %297, %284 : vector<32x256xf32>
    %cst_116 = arith.constant 0.000000e+00 : f32
    %299 = vector.broadcast %cst_116 : f32 to vector<32x256xf32>
    %300 = arith.subf %299, %279 : vector<32x256xf32>
    %301 = arith.mulf %300, %279 : vector<32x256xf32>
    %302 = math.exp %301 : vector<32x256xf32>
    %303 = arith.mulf %298, %302 : vector<32x256xf32>
    %cst_117 = arith.constant 1.000000e+00 : f32
    %304 = vector.broadcast %cst_117 : f32 to vector<32x256xf32>
    %305 = arith.subf %304, %303 : vector<32x256xf32>
    %306 = arith.mulf %278, %305 : vector<32x256xf32>
    %cst_118 = arith.constant 1.000000e+00 : f32
    %307 = vector.broadcast %cst_118 : f32 to vector<32x256xf32>
    %308 = arith.addf %307, %306 : vector<32x256xf32>
    %309 = arith.mulf %271, %308 : vector<32x256xf32>
    %310 = arith.truncf %309 : vector<32x256xf32> to vector<32x256xbf16>
    %cst_119 = arith.constant dense<0.000000e+00> : vector<32x64xf32>
    %311 = tpu.matmul %310, %242, %cst_119 {dimension_numbers = #tpu.dot_dimension_numbers<[1], [0], [0], [1], [0, 0, 1, 1], [], []>} : vector<32x256xbf16>, vector<256x64xbf16>, vector<32x64xf32> -> vector<32x64xf32>
    %312 = vector.broadcast %235 : vector<1x64xf32> to vector<32x64xf32>
    %313 = arith.addf %311, %312 : vector<32x64xf32>
    %cst_120 = arith.constant dense<0.000000e+00> : vector<32xf32>
    %314 = vector.multi_reduction <add>, %313, %cst_120 [1] : vector<32x64xf32> to vector<32xf32>
    %315 = vector.shape_cast %314 : vector<32xf32> to vector<32x1xf32>
    %cst_121 = arith.constant 6.400000e+01 : f32
    %316 = vector.broadcast %cst_121 : f32 to vector<32x1xf32>
    %317 = arith.divf %315, %316 : vector<32x1xf32>
    %318 = vector.broadcast %317 : vector<32x1xf32> to vector<32x64xf32>
    %319 = arith.subf %313, %318 : vector<32x64xf32>
    %320 = arith.mulf %319, %319 : vector<32x64xf32>
    %cst_122 = arith.constant dense<0.000000e+00> : vector<32xf32>
    %321 = vector.multi_reduction <add>, %320, %cst_122 [1] : vector<32x64xf32> to vector<32xf32>
    %322 = vector.shape_cast %321 : vector<32xf32> to vector<32x1xf32>
    %cst_123 = arith.constant 6.400000e+01 : f32
    %323 = vector.broadcast %cst_123 : f32 to vector<32x1xf32>
    %324 = arith.divf %322, %323 : vector<32x1xf32>
    %325 = vector.broadcast %317 : vector<32x1xf32> to vector<32x64xf32>
    %326 = arith.subf %313, %325 : vector<32x64xf32>
    %cst_124 = arith.constant 9.99999974E-6 : f32
    %327 = vector.broadcast %cst_124 : f32 to vector<32x1xf32>
    %328 = arith.addf %324, %327 : vector<32x1xf32>
    %329 = math.rsqrt %328 : vector<32x1xf32>
    %330 = vector.broadcast %329 : vector<32x1xf32> to vector<32x64xf32>
    %331 = arith.mulf %326, %330 : vector<32x64xf32>
    %332 = vector.broadcast %236 : vector<1x64xf32> to vector<32x64xf32>
    %333 = arith.mulf %331, %332 : vector<32x64xf32>
    %334 = vector.broadcast %237 : vector<1x64xf32> to vector<32x64xf32>
    %335 = arith.addf %333, %334 : vector<32x64xf32>
    %cst_125 = arith.constant dense<0.000000e+00> : vector<32xf32>
    %336 = vector.multi_reduction <add>, %335, %cst_125 [1] : vector<32x64xf32> to vector<32xf32>
    %337 = vector.shape_cast %336 : vector<32xf32> to vector<32x1xf32>
    %cst_126 = arith.constant 6.400000e+01 : f32
    %338 = vector.broadcast %cst_126 : f32 to vector<32x1xf32>
    %339 = arith.divf %337, %338 : vector<32x1xf32>
    %340 = vector.broadcast %339 : vector<32x1xf32> to vector<32x64xf32>
    %341 = arith.subf %335, %340 : vector<32x64xf32>
    %342 = arith.mulf %341, %341 : vector<32x64xf32>
    %cst_127 = arith.constant dense<0.000000e+00> : vector<32xf32>
    %343 = vector.multi_reduction <add>, %342, %cst_127 [1] : vector<32x64xf32> to vector<32xf32>
    %344 = vector.shape_cast %343 : vector<32xf32> to vector<32x1xf32>
    %cst_128 = arith.constant 6.400000e+01 : f32
    %345 = vector.broadcast %cst_128 : f32 to vector<32x1xf32>
    %346 = arith.divf %344, %345 : vector<32x1xf32>
    %347 = vector.broadcast %339 : vector<32x1xf32> to vector<32x64xf32>
    %348 = arith.subf %335, %347 : vector<32x64xf32>
    %cst_129 = arith.constant 9.99999974E-6 : f32
    %349 = vector.broadcast %cst_129 : f32 to vector<32x1xf32>
    %350 = arith.addf %346, %349 : vector<32x1xf32>
    %351 = math.rsqrt %350 : vector<32x1xf32>
    %352 = vector.broadcast %351 : vector<32x1xf32> to vector<32x64xf32>
    %353 = arith.mulf %348, %352 : vector<32x64xf32>
    %354 = vector.broadcast %238 : vector<1x64xf32> to vector<32x64xf32>
    %355 = arith.mulf %353, %354 : vector<32x64xf32>
    %356 = vector.broadcast %239 : vector<1x64xf32> to vector<32x64xf32>
    %357 = arith.addf %355, %356 : vector<32x64xf32>
    %358 = arith.truncf %357 : vector<32x64xf32> to vector<32x64xbf16>
    %cst_130 = arith.constant dense<0.000000e+00> : vector<32x128xf32>
    %359 = tpu.matmul %358, %243, %cst_130 {dimension_numbers = #tpu.dot_dimension_numbers<[1], [0], [0], [1], [0, 0, 1, 1], [], []>} : vector<32x64xbf16>, vector<64x128xbf16>, vector<32x128xf32> -> vector<32x128xf32>
    %360 = vector.broadcast %240 : vector<1x128xf32> to vector<32x128xf32>
    %361 = arith.addf %359, %360 : vector<32x128xf32>
    %c0_131 = arith.constant 0 : index
    %c0_132 = arith.constant 0 : index
    %362 = vector.load %arg16[%c0_131, %c0_132] : memref<32x128xf32, #tpu.memory_space<vmem>>, vector<32x128xf32>
    tpu.vector_store %arg16[%c0_131, %c0_132], %361 {strides = array<i32>} : memref<32x128xf32, #tpu.memory_space<vmem>>, vector<32x128xf32>,
    return
  }
}

</mosaic_0001>

<bundles_post_ra>
// kernel: tile.13
= control target key start
LH: loop header
LB: loop body
LE: loop exit
PB: predicated region body
PF: predicated region fallthrough
CT: control target
= control target key end

     0   :  { %s312_s0 = inlined_call_operand.vmem [shape: f32[16,16], index: 0, kind: input, shape index: {}]   ;;  %s313_s1 = inlined_call_operand.vmem [shape: f32[2,16,2,16], index: 1, kind: output, shape index: {}]  }
   0x1   :  { %v4_v0 = vld [vmem:[%s312_s0] ss:$0 sm:$0xff]  ;;  %v113_v1 = vld [vmem:[%s312_s0 + $0x1] ss:$0 sm:$0xff]  ;;  %v116_v2 = vld [vmem:[%s312_s0 + $0x2] ss:$0 sm:$0xff] }
   0x2   :  { %5 = vst [vmem:[%s313_s1] sm:$0x3] %v4_v0  ;;  %112 = vst [vmem:[%s313_s1 + $0x20] sm:$0x3] %v4_v0  ;;  %v119_v3 = vld [vmem:[%s312_s0 + $0x3] ss:$0 sm:$0xff] }
   0x3   :  { %114 = vst [vmem:[%s313_s1 + $0x2] sm:$0x3] %v113_v1  ;;  %115 = vst [vmem:[%s313_s1 + $0x22] sm:$0x3] %v113_v1  ;;  %v122_v4 = vld [vmem:[%s312_s0 + $0x4] ss:$0 sm:$0xff] }
   0x4   :  { %117 = vst [vmem:[%s313_s1 + $0x4] sm:$0x3] %v116_v2  ;;  %118 = vst [vmem:[%s313_s1 + $0x24] sm:$0x3] %v116_v2  ;;  %v125_v5 = vld [vmem:[%s312_s0 + $0x5] ss:$0 sm:$0xff] }
   0x5   :  { %120 = vst [vmem:[%s313_s1 + $0x6] sm:$0x3] %v119_v3  ;;  %121 = vst [vmem:[%s313_s1 + $0x26] sm:$0x3] %v119_v3  ;;  %v128_v6 = vld [vmem:[%s312_s0 + $0x6] ss:$0 sm:$0xff] }
   0x6   :  { %123 = vst [vmem:[%s313_s1 + $0x8] sm:$0x3] %v122_v4  ;;  %124 = vst [vmem:[%s313_s1 + $0x28] sm:$0x3] %v122_v4  ;;  %v131_v7 = vld [vmem:[%s312_s0 + $0x7] ss:$0 sm:$0xff] }
   0x7   :  { %126 = vst [vmem:[%s313_s1 + $0xa] sm:$0x3] %v125_v5  ;;  %127 = vst [vmem:[%s313_s1 + $0x2a] sm:$0x3] %v125_v5  ;;  %v134_v8 = vld [vmem:[%s312_s0 + $0x8] ss:$0 sm:$0xff] }
   0x8   :  { %129 = vst [vmem:[%s313_s1 + $0xc] sm:$0x3] %v128_v6  ;;  %130 = vst [vmem:[%s313_s1 + $0x2c] sm:$0x3] %v128_v6  ;;  %v137_v9 = vld [vmem:[%s312_s0 + $0x9] ss:$0 sm:$0xff] }
   0x9   :  { %132 = vst [vmem:[%s313_s1 + $0xe] sm:$0x3] %v131_v7  ;;  %133 = vst [vmem:[%s313_s1 + $0x2e] sm:$0x3] %v131_v7  ;;  %v140_v10 = vld [vmem:[%s312_s0 + $0xa] ss:$0 sm:$0xff] }
   0xa   :  { %135 = vst [vmem:[%s313_s1 + $0x10] sm:$0x3] %v134_v8  ;;  %136 = vst [vmem:[%s313_s1 + $0x30] sm:$0x3] %v134_v8  ;;  %v143_v11 = vld [vmem:[%s312_s0 + $0xb] ss:$0 sm:$0xff] }
   0xb   :  { %138 = vst [vmem:[%s313_s1 + $0x12] sm:$0x3] %v137_v9  ;;  %139 = vst [vmem:[%s313_s1 + $0x32] sm:$0x3] %v137_v9  ;;  %v146_v12 = vld [vmem:[%s312_s0 + $0xc] ss:$0 sm:$0xff] }
   0xc   :  { %141 = vst [vmem:[%s313_s1 + $0x14] sm:$0x3] %v140_v10  ;;  %142 = vst [vmem:[%s313_s1 + $0x34] sm:$0x3] %v140_v10  ;;  %v149_v13 = vld [vmem:[%s312_s0 + $0xd] ss:$0 sm:$0xff] }
   0xd   :  { %144 = vst [vmem:[%s313_s1 + $0x16] sm:$0x3] %v143_v11  ;;  %145 = vst [vmem:[%s313_s1 + $0x36] sm:$0x3] %v143_v11  ;;  %v152_v14 = vld [vmem:[%s312_s0 + $0xe] ss:$0 sm:$0xff] }
   0xe   :  { %147 = vst [vmem:[%s313_s1 + $0x18] sm:$0x3] %v146_v12  ;;  %148 = vst [vmem:[%s313_s1 + $0x38] sm:$0x3] %v146_v12  ;;  %v155_v15 = vld [vmem:[%s312_s0 + $0xf] ss:$0 sm:$0xff] }
   0xf   :  { %150 = vst [vmem:[%s313_s1 + $0x1a] sm:$0x3] %v149_v13  ;;  %151 = vst [vmem:[%s313_s1 + $0x3a] sm:$0x3] %v149_v13 }
  0x10   :  { %153 = vst [vmem:[%s313_s1 + $0x1c] sm:$0x3] %v152_v14  ;;  %154 = vst [vmem:[%s313_s1 + $0x3c] sm:$0x3] %v152_v14 }
  0x11   :  { %156 = vst [vmem:[%s313_s1 + $0x1e] sm:$0x3] %v155_v15  ;;  %157 = vst [vmem:[%s313_s1 + $0x3e] sm:$0x3] %v155_v15 }

// kernel: tile.19
= control target key start
LH: loop header
LB: loop body
LE: loop exit
PB: predicated region body
PF: predicated region fallthrough
CT: control target
= control target key end

     0   :  { %vm163_vm0 = vcmask 1047556   ;;  %s399_s10 = smov 96   ;;  %vm165_vm1 = vcmask 261120   ;;  %s401_s21 = smov 32   ;;  %vm202_vm2 = vcmask 1048320   ;;  %vm245_vm3 = vcmask 785920   ;;  %s580_s0 = inlined_call_operand.vmem [shape: f32[32,4,32], index: 0, kind: input, shape index: {}]   ;;  %s581_s1 = inlined_call_operand.vmem [shape: f32[32,128], index: 1, kind: output, shape index: {}]  }
   0x1   :  { %v377_v0 = vld [vmem:[%s580_s0 + $0x1c] sm:$0xf]  ;;  %v378_v1 = vld [vmem:[%s580_s0 + $0x18] sm:$0xf]  ;;  %v379_v2 = vld [vmem:[%s580_s0 + $0x14] sm:$0xf] }
   0x2   :  { %129 = vst [vmem:[#allocation0 + $0x38] sm:$0xf] %v377_v0  ;;  %134 = vst [vmem:[#allocation0 + $0x30] sm:$0xf] %v378_v1  ;;  %v380_v3 = vld [vmem:[%s580_s0 + $0x10] sm:$0xf] }
   0x3   :  { %139 = vst [vmem:[#allocation0 + $0x28] sm:$0xf] %v379_v2  ;;  %v381_v4 = vld [vmem:[%s580_s0 + $0xc] sm:$0xf]  ;;  %v382_v5 = vld [vmem:[%s580_s0 + $0x8] sm:$0xf] }
   0x4   :  { %144 = vst [vmem:[#allocation0 + $0x20] sm:$0xf] %v380_v3  ;;  %149 = vst [vmem:[#allocation0 + $0x18] sm:$0xf] %v381_v4  ;;  %v383_v6 = vld [vmem:[%s580_s0 + $0x4] sm:$0xf] }
   0x5   :  { %154 = vst [vmem:[#allocation0 + $0x10] sm:$0xf] %v382_v5  ;;  %v159_v7 = vld [vmem:[%s580_s0] sm:$0xf]  ;;  %158 = vst [vmem:[#allocation0 + $0x8] sm:$0xf] %v383_v6 }
   0x6   :  { %160 = vst [vmem:[#allocation0] sm:$0xf] %v159_v7  ;;  %v361_v8 = vld [vmem:[%s580_s0 + $0x5c] sm:$0xf]  ;;  %v362_v9 = vld [vmem:[%s580_s0 + $0x58] sm:$0xf] }
   0x7   :  { %v363_v10 = vld [vmem:[%s580_s0 + $0x54] sm:$0xf]  ;;  %49 = vst [vmem:[#allocation0 + $0xb8] sm:$0xf] %v361_v8  ;;  %54 = vst [vmem:[#allocation0 + $0xb0] sm:$0xf] %v362_v9 }
   0x8   :  { %59 = vst [vmem:[#allocation0 + $0xa8] sm:$0xf] %v363_v10  ;;  %v364_v11 = vld [vmem:[%s580_s0 + $0x50] sm:$0xf]  ;;  %v365_v12 = vld [vmem:[%s580_s0 + $0x4c] sm:$0xf] }
   0x9   :  { %v366_v13 = vld [vmem:[%s580_s0 + $0x48] sm:$0xf]  ;;  %64 = vst [vmem:[#allocation0 + $0xa0] sm:$0xf] %v364_v11  ;;  %69 = vst [vmem:[#allocation0 + $0x98] sm:$0xf] %v365_v12 }
   0xa   :  { %74 = vst [vmem:[#allocation0 + $0x90] sm:$0xf] %v366_v13  ;;  %v367_v14 = vld [vmem:[%s580_s0 + $0x44] sm:$0xf]  ;;  %v368_v15 = vld [vmem:[%s580_s0 + $0x40] sm:$0xf] }
   0xb   :  { %v369_v16 = vld [vmem:[%s580_s0 + $0x3c] sm:$0xf]  ;;  %79 = vst [vmem:[#allocation0 + $0x88] sm:$0xf] %v367_v14  ;;  %84 = vst [vmem:[#allocation0 + $0x80] sm:$0xf] %v368_v15 }
   0xc   :  { %89 = vst [vmem:[#allocation0 + $0x78] sm:$0xf] %v369_v16  ;;  %v370_v17 = vld [vmem:[%s580_s0 + $0x38] sm:$0xf]  ;;  %v371_v18 = vld [vmem:[%s580_s0 + $0x34] sm:$0xf] }
   0xd   :  { %v372_v19 = vld [vmem:[%s580_s0 + $0x30] sm:$0xf]  ;;  %94 = vst [vmem:[#allocation0 + $0x70] sm:$0xf] %v370_v17  ;;  %99 = vst [vmem:[#allocation0 + $0x68] sm:$0xf] %v371_v18 }
   0xe   :  { %104 = vst [vmem:[#allocation0 + $0x60] sm:$0xf] %v372_v19  ;;  %v373_v20 = vld [vmem:[%s580_s0 + $0x2c] sm:$0xf]  ;;  %v374_v21 = vld [vmem:[%s580_s0 + $0x28] sm:$0xf] }
   0xf   :  { %v375_v22 = vld [vmem:[%s580_s0 + $0x24] sm:$0xf]  ;;  %109 = vst [vmem:[#allocation0 + $0x58] sm:$0xf] %v373_v20  ;;  %114 = vst [vmem:[#allocation0 + $0x50] sm:$0xf] %v374_v21 }
  0x10   :  { %119 = vst [vmem:[#allocation0 + $0x48] sm:$0xf] %v375_v22  ;;  %v376_v23 = vld [vmem:[%s580_s0 + $0x20] sm:$0xf]  ;;  %v353_v24 = vld [vmem:[%s580_s0 + $0x7c] sm:$0xf] }
  0x11   :  { %v354_v25 = vld [vmem:[%s580_s0 + $0x78] sm:$0xf]  ;;  %124 = vst [vmem:[#allocation0 + $0x40] sm:$0xf] %v376_v23  ;;  %9 = vst [vmem:[#allocation0 + $0xf8] sm:$0xf] %v353_v24 }
  0x12   :  { %v197_v26 = vld [vmem:[#allocation0 + $0x3] ss:$8 sm:$0xf0]   ;;  %14 = vst [vmem:[#allocation0 + $0xf0] sm:$0xf] %v354_v25  ;;  %vm288_vm4 = vcmask 523520  }
  0x13   :  { %v355_v27 = vld [vmem:[%s580_s0 + $0x74] sm:$0xf]  ;;  %v195_v28 = vld [vmem:[#allocation0 + $0x3] ss:$8 sm:$0xf]  }
  0x14   :  { %19 = vst [vmem:[#allocation0 + $0xe8] sm:$0xf] %v355_v27  ;;  %v356_v29 = vld [vmem:[%s580_s0 + $0x70] sm:$0xf]  ;;  %v199_v30 = vsel %vm163_vm0, %v197_v26, %v195_v28  ;;  %v357_v31 = vld [vmem:[%s580_s0 + $0x6c] sm:$0xf] }
  0x15   :  { %24 = vst [vmem:[#allocation0 + $0xe0] sm:$0xf] %v356_v29  ;;  %v358_v32 = vld [vmem:[%s580_s0 + $0x68] sm:$0xf]  ;;  %v359_v33 = vld [vmem:[%s580_s0 + $0x64] sm:$0xf]  ;;  %200 = vrot.lane.b32.xlu0 %v199_v30, %s399_s10 }
  0x16   :  { %v218_v34 = vld [vmem:[#allocation0 + $0x83] ss:$8 sm:$0xf0]   ;;  %29 = vst [vmem:[#allocation0 + $0xd8] sm:$0xf] %v357_v31 }
  0x17   :  { %34 = vst [vmem:[#allocation0 + $0xd0] sm:$0xf] %v358_v32  ;;  %39 = vst [vmem:[#allocation0 + $0xc8] sm:$0xf] %v359_v33  ;;  %v360_v35 = vld [vmem:[%s580_s0 + $0x60] sm:$0xf] }
  0x18   :  { %v216_v36 = vld [vmem:[#allocation0 + $0x83] ss:$8 sm:$0xf]   ;;  %44 = vst [vmem:[#allocation0 + $0xc0] sm:$0xf] %v360_v35  ;;  %s400_s0 = smov 64  }
  0x19   :  { %v220_v37 = vsel %vm163_vm0, %v218_v34, %v216_v36  ;;  %v207_v38 = vld [vmem:[#allocation0 + $0x43] ss:$8 sm:$0xf0]   ;;  %v238_v39 = vld [vmem:[#allocation0 + $0x2] ss:$8 sm:$0xf]  }
  0x1a   :  { %221 = vrot.lane.b32.xlu1 %v220_v37, %s399_s10  ;;  %v205_v40 = vld [vmem:[#allocation0 + $0x43] ss:$8 sm:$0xf]   ;;  %v240_v41 = vld [vmem:[#allocation0 + $0x2] ss:$8 sm:$0xf0]  }
  0x1b   :  { %v209_v42 = vsel %vm163_vm0, %v207_v38, %v205_v40  ;;  %v250_v44 = vld [vmem:[#allocation0 + $0x42] ss:$8 sm:$0xf0]   ;;  %v242_v45 = vsel %vm163_vm0, %v240_v41, %v238_v39  ;;  %v281_v52 = vld [vmem:[#allocation0 + $0x1] ss:$8 sm:$0xf]  }
  0x1c   :  { %210 = vrot.lane.b32.xlu0 %v209_v42, %s399_s10  ;;  %v229_v43 = vld [vmem:[#allocation0 + $0xc3] ss:$8 sm:$0xf0]   ;;  %v248_v46 = vld [vmem:[#allocation0 + $0x42] ss:$8 sm:$0xf]  }
  0x1d   :  { %v259_v47 = vld [vmem:[#allocation0 + $0x82] ss:$8 sm:$0xf]   ;;  %v252_v53 = vsel %vm163_vm0, %v250_v44, %v248_v46  ;;  %v283_v55 = vld [vmem:[#allocation0 + $0x1] ss:$8 sm:$0xf0]  }
  0x1e   :  { %v261_v49 = vld [vmem:[#allocation0 + $0x82] ss:$8 sm:$0xf0]   ;;  %v161_v56 = vld [vmem:[#allocation0] ss:$8 sm:$0xf]   ;;  %v285_v4 = vsel %vm163_vm0, %v283_v55, %v281_v52 }
  0x1f   :  { %v227_v48 = vld [vmem:[#allocation0 + $0xc3] ss:$8 sm:$0xf]   ;;  %v272_v51 = vld [vmem:[#allocation0 + $0xc2] ss:$8 sm:$0xf0]   ;;  %v263_v54 = vsel %vm163_vm0, %v261_v49, %v259_v47 }
  0x20   :  { %v231_v50 = vsel %vm163_vm0, %v229_v43, %v227_v48  ;;  %243 = vrot.lane.b32.xlu0 %v242_v45, %s400_s0  ;;  %v270_v57 = vld [vmem:[#allocation0 + $0xc2] ss:$8 sm:$0xf]   ;;  %v162_v58 = vld [vmem:[#allocation0] ss:$8 sm:$0xf0]  }
  0x21   :  { %232 = vrot.lane.b32.xlu1 %v231_v50, %s399_s10  ;;  %v164_v59 = vsel %vm163_vm0, %v162_v58, %v161_v56  ;;  %v177_v60 = vld [vmem:[#allocation0 + $0x80] ss:$8 sm:$0xf]   ;;  %v291_v62 = vld [vmem:[#allocation0 + $0x41] ss:$8 sm:$0xf]   ;;  %v274_v3 = vsel %vm163_vm0, %v272_v51, %v270_v57 }
  0x22   :  { %v179_v61 = vld [vmem:[#allocation0 + $0x80] ss:$8 sm:$0xf0]   ;;  %v293_v63 = vld [vmem:[#allocation0 + $0x41] ss:$8 sm:$0xf0]  }
  0x23   :  { %166 = vst.msk [vmem:[%s581_s1] sm:$0xff] %vm165_vm1, %v164_v59   ;;  %v181_v0 = vsel %vm163_vm0, %v179_v61, %v177_v60  ;;  %v168_v1 = vld [vmem:[#allocation0 + $0x40] ss:$8 sm:$0xf]   ;;  %v295_v11 = vsel %vm163_vm0, %v293_v63, %v291_v62 }
  0x24   :  { %264 = vrot.lane.b32.xlu0 %v263_v54, %s400_s0  ;;  %v170_v2 = vld [vmem:[#allocation0 + $0x40] ss:$8 sm:$0xf0]   ;;  %385 = vst.msk [vmem:[%s581_s1 + $0x10] sm:$0xff] %vm165_vm1, %v181_v0  }
  0x25   :  { %253 = vrot.lane.b32.xlu1 %v252_v53, %s400_s0  ;;  %v172_v5 = vsel %vm163_vm0, %v170_v2, %v168_v1  ;;  %v186_v6 = vld [vmem:[#allocation0 + $0xc0] ss:$8 sm:$0xf]   ;;  %v302_v8 = vld [vmem:[#allocation0 + $0x81] ss:$8 sm:$0xf]  }
  0x26   :  { %v188_v7 = vld [vmem:[#allocation0 + $0xc0] ss:$8 sm:$0xf0]   ;;  %v304_v9 = vld [vmem:[#allocation0 + $0x81] ss:$8 sm:$0xf0]  }
  0x27   :  { %384 = vst.msk [vmem:[%s581_s1 + $0x8] sm:$0xff] %vm165_vm1, %v172_v5   ;;  %v190_v10 = vsel %vm163_vm0, %v188_v7, %v186_v6  ;;  %v306_v12 = vsel %vm163_vm0, %v304_v9, %v302_v8  ;;  %v313_v13 = vld [vmem:[#allocation0 + $0xc1] ss:$8 sm:$0xf]  }
  0x28   :  { %386 = vst.msk [vmem:[%s581_s1 + $0x18] sm:$0xff] %vm165_vm1, %v190_v10   ;;  %286 = vrot.lane.b32.xlu0 %v285_v4, %s401_s21  ;;  %v315_v14 = vld [vmem:[#allocation0 + $0xc1] ss:$8 sm:$0xf0]  }
  0x29   :  { %275 = vrot.lane.b32.xlu1 %v274_v3, %s400_s0  ;;  %v317_v15 = vsel %vm163_vm0, %v315_v14, %v313_v13 }
  0x2c   :  { %307 = vrot.lane.b32.xlu0 %v306_v12, %s401_s21 }
  0x2d   :  { %296 = vrot.lane.b32.xlu1 %v295_v11, %s401_s21 }
  0x31   :  { %318 = vrot.lane.b32.xlu1 %v317_v15, %s401_s21 }
  0x87   :  { %v201_v16 = vpop.permute.xlu0 %200  }
  0x88   :  { %203 = vst.msk [vmem:[%s581_s1] sm:$0xff] %vm202_vm2, %v201_v16  }
  0x8c   :  { %v222_v17 = vpop.permute.xlu1 %221  }
  0x8d   :  { %388 = vst.msk [vmem:[%s581_s1 + $0x10] sm:$0xff] %vm202_vm2, %v222_v17  }
  0x8e   :  { %v211_v18 = vpop.permute.xlu0 %210  }
  0x8f   :  { %387 = vst.msk [vmem:[%s581_s1 + $0x8] sm:$0xff] %vm202_vm2, %v211_v18  }
  0x92   :  { %v244_v20 = vpop.permute.xlu0 %243  }
  0x93   :  { %v233_v19 = vpop.permute.xlu1 %232   ;;  %246 = vst.msk [vmem:[%s581_s1] sm:$0xff] %vm245_vm3, %v244_v20  }
  0x94   :  { %389 = vst.msk [vmem:[%s581_s1 + $0x18] sm:$0xff] %vm202_vm2, %v233_v19  }
  0x96   :  { %v265_v22 = vpop.permute.xlu0 %264  }
  0x97   :  { %v254_v21 = vpop.permute.xlu1 %253   ;;  %391 = vst.msk [vmem:[%s581_s1 + $0x10] sm:$0xff] %vm245_vm3, %v265_v22  }
  0x98   :  { %390 = vst.msk [vmem:[%s581_s1 + $0x8] sm:$0xff] %vm245_vm3, %v254_v21  }
  0x9a   :  { %v287_v24 = vpop.permute.xlu0 %286  }
  0x9b   :  { %v276_v23 = vpop.permute.xlu1 %275   ;;  %289 = vst.msk [vmem:[%s581_s1] sm:$0xff] %vm288_vm4, %v287_v24  }
  0x9c   :  { %392 = vst.msk [vmem:[%s581_s1 + $0x18] sm:$0xff] %vm245_vm3, %v276_v23  }
  0x9e   :  { %v308_v26 = vpop.permute.xlu0 %307  }
  0x9f   :  { %v297_v25 = vpop.permute.xlu1 %296   ;;  %394 = vst.msk [vmem:[%s581_s1 + $0x10] sm:$0xff] %vm288_vm4, %v308_v26  }
  0xa0   :  { %393 = vst.msk [vmem:[%s581_s1 + $0x8] sm:$0xff] %vm288_vm4, %v297_v25  }
  0xa3   :  { %v319_v27 = vpop.permute.xlu1 %318  }
  0xa4   :  { %395 = vst.msk [vmem:[%s581_s1 + $0x18] sm:$0xff] %vm288_vm4, %v319_v27  }

// kernel: forward.1
= control target key start
LH: loop header
LB: loop body
LE: loop exit
PB: predicated region body
PF: predicated region fallthrough
CT: control target
= control target key end

     0   :  { %s4906_s0 = inlined_call_operand.vmem [shape: f32[32,64], index: 0, kind: input, shape index: {}]   ;;  %s4907_s1 = inlined_call_operand.vmem [shape: f32[32,128], index: 1, kind: input, shape index: {}]   ;;  %s4908_s2 = inlined_call_operand.vmem [shape: f32[128,64], index: 2, kind: input, shape index: {}]   ;;  %s4909_s3 = inlined_call_operand.vmem [shape: bf16[128,128], index: 3, kind: input, shape index: {}]   ;;  %s4910_s4 = inlined_call_operand.vmem [shape: f32[32,256], index: 4, kind: input, shape index: {}]   ;;  %s4911_s5 = inlined_call_operand.vmem [shape: bf16[64,192], index: 5, kind: input, shape index: {}]   ;;  %s4912_s6 = inlined_call_operand.vmem [shape: bf16[64,64], index: 6, kind: input, shape index: {}]   ;;  %s4913_s7 = inlined_call_operand.vmem [shape: bf16[64,256], index: 7, kind: input, shape index: {}]   ;;  %s4914_s8 = inlined_call_operand.vmem [shape: bf16[128,64], index: 8, kind: input, shape index: {}]   ;;  %s4915_s9 = inlined_call_operand.vmem [shape: bf16[64,192], index: 9, kind: input, shape index: {}]   ;;  %s4916_s10 = inlined_call_operand.vmem [shape: bf16[64,64], index: 10, kind: input, shape index: {}]   ;;  %s4917_s11 = inlined_call_operand.vmem [shape: bf16[64,256], index: 11, kind: input, shape index: {}]   ;;  %s4918_s12 = inlined_call_operand.vmem [shape: bf16[128,64], index: 12, kind: input, shape index: {}]   ;;  %s4919_s13 = inlined_call_operand.vmem [shape: bf16[64,256], index: 13, kind: input, shape index: {}]   ;;  %s4920_s14 = inlined_call_operand.vmem [shape: bf16[256,64], index: 14, kind: input, shape index: {}]   ;;  %s4921_s15 = inlined_call_operand.vmem [shape: bf16[64,128], index: 15, kind: input, shape index: {}]   ;;  %s4922_s16 = inlined_call_operand.hbm [shape: f32[32,128], index: 16, kind: output, shape index: {}]  }
   0x1   :  { %4926 = sst [smem:[#allocation5_spill]] %s4906_s0 }
   0x2   :  { %s4927_s23 = sld [smem:[#allocation5_spill]]  ;;  %vm147_vm0 = vcmask 523264  }
   0x8   :  { %v55_v0 = vld [vmem:[%s4927_s23] sm:$0xff]  ;;  %v57_v1 = vld [vmem:[%s4927_s23 + $0x10] sm:$0xff]  ;;  %v56_v2 = vld [vmem:[%s4927_s23 + $0x8] sm:$0xff] }
   0x9   :  { %v148_v3 = vsel %vm147_vm0, %v55_v0, 0.0  ;;  %v154_v4 = vsel %vm147_vm0, %v57_v1, 0.0  ;;  %v58_v5 = vld [vmem:[%s4927_s23 + $0x18] sm:$0xff]  ;;  %v151_v6 = vsel %vm147_vm0, %v56_v2, 0.0 }
   0xa   :  { %149 = vadd.xlane.f32.xlu0 %v148_v3  ;;  %155 = vadd.xlane.f32.xlu1 %v154_v4  ;;  %v157_v7 = vsel %vm147_vm0, %v58_v5, 0.0 }
   0xe   :  { %152 = vadd.xlane.f32.xlu0 %v151_v6  ;;  %158 = vadd.xlane.f32.xlu1 %v157_v7 }
   0xf   :  { %21 = vsyncpa [#allocation3], 0  ;;  %v3316_v28 = vld [vmem:[%s4911_s5 + $0x34] ss:$8 sps:$4 sm:$0xff]   ;;  %v3318_v29 = vld [vmem:[%s4911_s5 + $0x30] ss:$8 sps:$4 sm:$0xff]  }
  0x10   :  { %v3319_v30 = vld [vmem:[%s4911_s5 + $0x24] ss:$8 sps:$4 sm:$0xff]   ;;  %276 = vmatprep.subr.bf16.mxu0 %v3316_v28  ;;  %v3321_v31 = vld [vmem:[%s4911_s5 + $0x20] ss:$8 sps:$4 sm:$0xff]   ;;  %v4924_v32 = vmov 0   ;;  %v3781_v37 = vld [vmem:[%s4908_s2 + $0x78] sm:$0xff] }
  0x11   :  { %277 = vmatpush1.bf16.msra.mxu0 %v3318_v29  ;;  %300 = vmatprep.mubr.bf16.mxu0 %v4924_v32  ;;  %v3322_v33 = vld [vmem:[%s4911_s5 + $0x14] ss:$8 sps:$4 sm:$0xff]   ;;  %v3324_v34 = vld [vmem:[%s4911_s5 + $0x10] ss:$8 sps:$4 sm:$0xff]   ;;  %v3325_v35 = vld [vmem:[%s4911_s5 + $0x4] ss:$8 sps:$4 sm:$0xff]  }
  0x12   :  { %278 = vmatprep.subr.bf16.mxu0 %v3319_v30  ;;  %v3327_v36 = vld [vmem:[%s4911_s5] ss:$8 sps:$4 sm:$0xff]   ;;  %v3786_v38 = vld [vmem:[%s4908_s2 + $0x70] sm:$0xff]  ;;  %s3627_s21 = smov 64   ;;  %v3819_v43 = vld [vmem:[%s4909_s3 + $0x38] sm:$0xff]  }
  0x13   :  { %v3795_v39 = vld [vmem:[%s4908_s2 + $0x60] sm:$0xff]  ;;  %v3800_v40 = vld [vmem:[%s4908_s2 + $0x50] sm:$0xff]  ;;  %v3809_v41 = vld [vmem:[%s4908_s2 + $0x68] sm:$0xff] }
  0x14   :  { %v3814_v42 = vld [vmem:[%s4908_s2 + $0x40] sm:$0xff]  ;;  %v3829_v44 = vld [vmem:[%s4908_s2 + $0x58] sm:$0xff]  ;;  %v3834_v45 = vld [vmem:[%s4908_s2 + $0x30] sm:$0xff] }
  0x15   :  { %279 = vmatpush1.bf16.msra.mxu0 %v3321_v31  ;;  %v3843_v46 = vld [vmem:[%s4908_s2 + $0x48] sm:$0xff]  ;;  %v3848_v47 = vld [vmem:[%s4908_s2 + $0x20] sm:$0xff]  ;;  %v3857_v48 = vld [vmem:[%s4908_s2 + $0x38] sm:$0xff] }
  0x16   :  { %280 = vmatprep.subr.bf16.mxu0 %v3322_v33  ;;  %v3862_v49 = vld [vmem:[%s4908_s2 + $0x10] sm:$0xff]  ;;  %v3871_v50 = vld [vmem:[%s4908_s2 + $0x28] sm:$0xff]  ;;  %v3876_v51 = vld [vmem:[%s4908_s2] sm:$0xff] }
  0x17   :  { %v3885_v52 = vld [vmem:[%s4908_s2 + $0x18] sm:$0xff]  ;;  %v3892_v53 = vld [vmem:[%s4908_s2 + $0x8] sm:$0xff]  ;;  %v95_v4 = vld [vmem:[%s4910_s4] ss:$0 sm:$0xff] }
  0x18   :  { %v3953_v28 = vld [vmem:[%s4909_s3] sm:$0xff]  }
  0x19   :  { %281 = vmatpush1.bf16.msra.mxu0 %v3324_v34 }
  0x1a   :  { %282 = vmatprep.subr.bf16.mxu0 %v3325_v35 }
  0x1d   :  { %283 = vmatpush1.bf16.msra.mxu0 %v3327_v36 }
  0x1e   :  { %3118 = vmatprep.subr.bf16.mxu0 %v3819_v43 }
  0x93   :  { %v150_v8 = vpop.xlane.xlu0 %149  ;;  %v156_v9 = vpop.xlane.xlu1 %155 }
  0x94   :  { %v161_v10 = vmul.f32 0.015625, %v150_v8  ;;  %v163_v11 = vmul.f32 0.015625, %v156_v9  ;;  %v96_v9 = vld [vmem:[%s4910_s4 + $0x1] ss:$0 sm:$0xff] }
  0x96   :  { %v3733_v12 = vsub.f32 %v55_v0, %v161_v10  ;;  %v3735_v13 = vsub.f32 %v57_v1, %v163_v11 }
  0x97   :  { %v153_v14 = vpop.xlane.xlu0 %152  ;;  %v159_v15 = vpop.xlane.xlu1 %158 }
  0x98   :  { %v162_v16 = vmul.f32 0.015625, %v153_v14  ;;  %v164_v17 = vmul.f32 0.015625, %v159_v15  ;;  %v169_v18 = vmul.f32 %v3733_v12, %v3733_v12  ;;  %v171_v19 = vmul.f32 %v3735_v13, %v3735_v13 }
  0x9a   :  { %v3741_v20 = vsub.f32 %v56_v2, %v162_v16  ;;  %v3743_v21 = vsub.f32 %v58_v5, %v164_v17  ;;  %v173_v22 = vsel %vm147_vm0, %v169_v18, 0.0  ;;  %v179_v23 = vsel %vm147_vm0, %v171_v19, 0.0  ;;  %v3909_v19 = vld [vmem:[%s4909_s3 + $0x30] sm:$0xff]  }
  0x9b   :  { %174 = vadd.xlane.f32.xlu0 %v173_v22 }
  0x9c   :  { %v170_v24 = vmul.f32 %v3741_v20, %v3741_v20  ;;  %v172_v25 = vmul.f32 %v3743_v21, %v3743_v21 }
  0x9e   :  { %v176_v26 = vsel %vm147_vm0, %v170_v24, 0.0  ;;  %v182_v27 = vsel %vm147_vm0, %v172_v25, 0.0  ;;  %v3927_v24 = vld [vmem:[%s4909_s3 + $0x20] sm:$0xff]   ;;  %v3934_v25 = vld [vmem:[%s4909_s3 + $0x18] sm:$0xff]  }
  0x9f   :  { %180 = vadd.xlane.f32.xlu0 %v179_v23  ;;  %177 = vadd.xlane.f32.xlu1 %v176_v26  ;;  %v3941_v26 = vld [vmem:[%s4909_s3 + $0x10] sm:$0xff]  }
  0xa3   :  { %183 = vadd.xlane.f32.xlu1 %v182_v27  ;;  %v3948_v27 = vld [vmem:[%s4909_s3 + $0x8] sm:$0xff]  }
  0xb4   :  { %367 = vrot.lane.b32.xlu1 %v3781_v37, %s3627_s21 }
  0xb5   :  { %365 = vrot.lane.b32.xlu0 %v3786_v38, %s3627_s21 }
  0xb8   :  { %361 = vrot.lane.b32.xlu1 %v3795_v39, %s3627_s21 }
  0xb9   :  { %357 = vrot.lane.b32.xlu0 %v3800_v40, %s3627_s21 }
  0xbc   :  { %363 = vrot.lane.b32.xlu1 %v3809_v41, %s3627_s21 }
  0xbd   :  { %353 = vrot.lane.b32.xlu0 %v3814_v42, %s3627_s21 }
  0xc0   :  { %359 = vrot.lane.b32.xlu1 %v3829_v44, %s3627_s21 }
  0xc1   :  { %349 = vrot.lane.b32.xlu0 %v3834_v45, %s3627_s21 }
  0xc4   :  { %355 = vrot.lane.b32.xlu1 %v3843_v46, %s3627_s21 }
  0xc5   :  { %345 = vrot.lane.b32.xlu0 %v3848_v47, %s3627_s21 }
  0xc8   :  { %351 = vrot.lane.b32.xlu1 %v3857_v48, %s3627_s21 }
  0xc9   :  { %341 = vrot.lane.b32.xlu0 %v3862_v49, %s3627_s21 }
  0xcc   :  { %347 = vrot.lane.b32.xlu1 %v3871_v50, %s3627_s21 }
  0xcd   :  { %337 = vrot.lane.b32.xlu0 %v3876_v51, %s3627_s21 }
  0xd0   :  { %343 = vrot.lane.b32.xlu1 %v3885_v52, %s3627_s21 }
  0xd4   :  { %339 = vrot.lane.b32.xlu1 %v3892_v53, %s3627_s21 }
 0x124   :  { %v175_v54 = vpop.xlane.xlu0 %174 }
 0x125   :  { %v185_v55 = vmul.f32 0.015625, %v175_v54  ;;  %v212_v54 = vlaneseq }
 0x127   :  { %v189_v56 = vadd.f32 1e-05, %v185_v55  ;;  %v213_v55 = vshrl.u32 %v212_v54, 7 }
 0x128   :  { %v178_v57 = vpop.xlane.xlu1 %177  ;;  %v181_v58 = vpop.xlane.xlu0 %180 }
 0x129   :  { %3428 = vrsqrt.f32 %v189_v56  ;;  %v186_v59 = vmul.f32 0.015625, %v178_v57  ;;  %v187_v60 = vmul.f32 0.015625, %v181_v58  ;;  %v3977_v58 = vsub.s32 0, %v213_v55 }
 0x12b   :  { %v190_v61 = vadd.f32 1e-05, %v186_v59  ;;  %v191_v62 = vadd.f32 1e-05, %v187_v60  ;;  %v3979_v59 = vsub.s32 1, %v213_v55 }
 0x12c   :  { %v184_v63 = vpop.xlane.xlu1 %183  ;;  %v3965_v33 = vpop.permute.xlu0 %365  ;;  %v2847_v60 = vld [vmem:[%s4910_s4 + $0x2] ss:$8 sm:$0x3] }
 0x12d   :  { %3430 = vrsqrt.f32 %v190_v61  ;;  %v188_v0 = vmul.f32 0.015625, %v184_v63  ;;  %v215_v63 = vrot.slane %v2847_v60, %v3977_v58 }
 0x12e   :  { %3432 = vrsqrt.f32 %v191_v62 }
 0x12f   :  { %v192_v1 = vadd.f32 1e-05, %v188_v0  ;;  %v219_v0 = vrot.slane %v2847_v60, %v3979_v59 }
 0x130   :  { %v3959_v29 = vpop.permute.xlu1 %367  ;;  %v3969_v35 = vpop.permute.xlu0 %357 }
 0x131   :  { %3434 = vrsqrt.f32 %v192_v1 }
 0x134   :  { %v3961_v30 = vpop.permute.xlu1 %361  ;;  %v3973_v56 = vpop.permute.xlu0 %353 }
 0x136   :  { %v3429_v2 = vpop.eup %3428 }
 0x137   :  { %v197_v3 = vmul.f32 %v3429_v2, %v3733_v12 }
 0x138   :  { %v3963_v31 = vpop.permute.xlu1 %363  ;;  %v3984_v61 = vpop.permute.xlu0 %349 }
 0x139   :  { %v201_v7 = vmul.f32 %v197_v3, %v95_v4 }
 0x13a   :  { %v3431_v5 = vpop.eup %3430 }
 0x13b   :  { %v198_v6 = vmul.f32 %v3431_v5, %v3741_v20  ;;  %v3433_v8 = vpop.eup %3432  ;;  %v205_v14 = vadd.f32 %v201_v7, %v96_v9 }
 0x13c   :  { %v199_v16 = vmul.f32 %v3433_v8, %v3735_v13  ;;  %v3918_v13 = vld [vmem:[%s4909_s3 + $0x28] sm:$0xff]   ;;  %v3967_v34 = vpop.permute.xlu1 %359  ;;  %v3990_v5 = vpop.permute.xlu0 %345 }
 0x13d   :  { %v202_v10 = vmul.f32 %v198_v6, %v95_v4 }
 0x13e   :  { %v3435_v11 = vpop.eup %3434  ;;  %v203_v20 = vmul.f32 %v199_v16, %v95_v4 }
 0x13f   :  { %v206_v15 = vadd.f32 %v202_v10, %v96_v9  ;;  %v200_v12 = vmul.f32 %v3435_v11, %v3743_v21 }
 0x140   :  { %v207_v21 = vadd.f32 %v203_v20, %v96_v9  ;;  %v3971_v36 = vpop.permute.xlu1 %355 }
 0x141   :  { %v209_v17 = vpack.c.bf16 %v206_v15, %v205_v14  ;;  %v204_v18 = vmul.f32 %v200_v12, %v95_v4 }
 0x143   :  { %2857 = vmatmul.mubr.msk.bf16.vlgmr.msra.gmra.mxu0 %vm147_vm0, %v209_v17  ;;  %v208_v22 = vadd.f32 %v204_v18, %v96_v9 }
 0x144   :  { %310 = vmatprep.mubr.bf16.mxu0 %v4924_v32  ;;  %3119 = vmatpush3.bf16.msra.mxu0 %v3819_v43  ;;  %v3975_v57 = vpop.permute.xlu1 %351 }
 0x145   :  { %3120 = vmatprep.subr.bf16.mxu0 %v3909_v19  ;;  %v210_v23 = vpack.c.bf16 %v208_v22, %v207_v21  ;;  %v4000_v22 = vpop.permute.xlu0 %341 }
 0x148   :  { %3121 = vmatpush3.bf16.msra.mxu0 %v3909_v19  ;;  %v3986_v62 = vpop.permute.xlu1 %347 }
 0x149   :  { %3122 = vmatprep.subr.bf16.mxu0 %v3918_v13 }
 0x14b   :  { %2858 = vmatmul.mubr.msk.bf16.gmra.mxu0 %vm147_vm0, %v210_v23 }
 0x14c   :  { %3123 = vmatpush3.bf16.msra.mxu0 %v3918_v13  ;;  %v3992_v7 = vpop.permute.xlu1 %343 }
 0x14d   :  { %3124 = vmatprep.subr.bf16.mxu0 %v3927_v24 }
 0x150   :  { %3125 = vmatpush3.bf16.msra.mxu0 %v3927_v24 }
 0x151   :  { %3126 = vmatprep.subr.bf16.mxu0 %v3934_v25 }
 0x154   :  { %3127 = vmatpush3.bf16.msra.mxu0 %v3934_v25 }
 0x155   :  { %3128 = vmatprep.subr.bf16.mxu0 %v3941_v26 }
 0x158   :  { %3129 = vmatpush3.bf16.msra.mxu0 %v3941_v26 }
 0x159   :  { %3130 = vmatprep.subr.bf16.mxu0 %v3948_v27 }
 0x15c   :  { %3131 = vmatpush3.bf16.msra.mxu0 %v3948_v27 }
 0x15d   :  { %3132 = vmatprep.subr.bf16.mxu0 %v3953_v28 }
 0x160   :  { %3133 = vmatpush3.bf16.msra.mxu0 %v3953_v28 }
 0x203   :  { %v302_v1 = vpop.f32.mrf.mxu0 }
 0x204   :  { %v303_v3 = vadd.f32 %v302_v1, %v215_v63  ;;  %v4006_v1 = vpop.permute.xlu1 %339 }
 0x205   :  { %v304_v2 = vpop.f32.mrf.mxu0 }
 0x206   :  { %v305_v4 = vadd.f32 %v304_v2, %v219_v0  ;;  %v397_v14 = vmul.f32 %v3961_v30, %v303_v3 }
 0x207   :  { %v306_v6 = vpop.f32.mrf.mxu0 }
 0x208   :  { %v307_v8 = vadd.f32 %v306_v6, %v215_v63  ;;  %v421_v18 = vmul.f32 %v305_v4, %v3795_v39  ;;  %v417_v23 = vmul.f32 %v305_v4, %v3814_v42  ;;  %v413_v55 = vmul.f32 %v305_v4, %v3848_v47 }
 0x209   :  { %v308_v9 = vpop.f32.mrf.mxu0  ;;  %v393_v39 = vmul.f32 %v3973_v56, %v303_v3 }
 0x20a   :  { %v309_v10 = vadd.f32 %v308_v9, %v219_v0  ;;  %v433_v11 = vpack.c.bf16 %v307_v8, %v303_v3  ;;  %v398_v15 = vmul.f32 %v3963_v31, %v307_v8  ;;  %v394_v17 = vmul.f32 %v3971_v36, %v307_v8 }
 0x20b   :  { %v312_v16 = vpop.f32.mrf.mxu0 }
 0x20c   :  { %3114 = vmatprep.mubr.msk.bf16.mxu1 %vm147_vm0, %v433_v11  ;;  %v407_v12 = vpack.c.bf16 %v398_v15, %v397_v14  ;;  %v422_v20 = vmul.f32 %v309_v10, %v3809_v41  ;;  %v418_v54 = vmul.f32 %v309_v10, %v3843_v46  ;;  %v414_v60 = vmul.f32 %v309_v10, %v3871_v50 }
 0x20d   :  { %v314_v21 = vpop.f32.mrf.mxu0  ;;  %v4008_v2 = vadd.f32 %v312_v16, %v215_v63  ;;  %v390_v41 = vmul.f32 %v3986_v62, %v307_v8  ;;  %v405_v50 = vpack.c.bf16 %v394_v17, %v393_v39  ;;  %v389_v14 = vmul.f32 %v3990_v5, %v303_v3  ;;  %v4030_v17 = vpop.permute.xlu0 %337 }
 0x20e   :  { %455 = vrot.lane.b32.xlu1 %v407_v12, %s3627_s21  ;;  %v315_v6 = vadd.f32 %v314_v21, %v219_v0  ;;  %v4013_v11 = vpack.c.bf16 %v422_v20, %v421_v18  ;;  %v4015_v42 = vpack.c.bf16 %v418_v54, %v417_v23  ;;  %v4017_v46 = vpack.c.bf16 %v414_v60, %v413_v55 }
 0x20f   :  { %v316_v9 = vpop.f32.mrf.mxu0  ;;  %v386_v15 = vmul.f32 %v4006_v1, %v307_v8  ;;  %v409_v12 = vmul.f32 %v305_v4, %v3876_v51  ;;  %v410_v32 = vmul.f32 %v309_v10, %v3892_v53  ;;  %v399_v18 = vmul.f32 %v3965_v33, %v4008_v2 }
 0x210   :  { %v4019_v47 = vadd.f32 %v316_v9, %v215_v63  ;;  %v403_v20 = vpack.c.bf16 %v390_v41, %v389_v14  ;;  %v423_v23 = vmul.f32 %v315_v6, %v3786_v38  ;;  %v419_v51 = vmul.f32 %v315_v6, %v3800_v40 }
 0x211   :  { %v318_v16 = vpop.f32.mrf.mxu0  ;;  %v4036_v53 = vpack.c.bf16 %v410_v32, %v409_v12  ;;  %v415_v54 = vmul.f32 %v315_v6, %v3834_v45  ;;  %v411_v38 = vmul.f32 %v315_v6, %v3862_v49  ;;  %v385_v40 = vmul.f32 %v4030_v17, %v303_v3 }
 0x212   :  { %v319_v21 = vadd.f32 %v318_v16, %v219_v0  ;;  %451 = vrot.lane.b32.xlu1 %v405_v50, %s3627_s21  ;;  %v400_v63 = vmul.f32 %v3959_v29, %v4019_v47  ;;  %v434_v8 = vpack.c.bf16 %v4019_v47, %v4008_v2  ;;  %v396_v10 = vmul.f32 %v3967_v34, %v4019_v47 }
 0x213   :  { %v401_v49 = vpack.c.bf16 %v386_v15, %v385_v40  ;;  %v392_v3 = vmul.f32 %v3975_v57, %v4019_v47  ;;  %v391_v41 = vmul.f32 %v3984_v61, %v4008_v2  ;;  %v388_v9 = vmul.f32 %v3992_v7, %v4019_v47 }
 0x214   :  { %v408_v0 = vpack.c.bf16 %v400_v63, %v399_v18  ;;  %v424_v4 = vmul.f32 %v319_v21, %v3781_v37  ;;  %v420_v55 = vmul.f32 %v319_v21, %v3829_v44  ;;  %v416_v60 = vmul.f32 %v319_v21, %v3857_v48 }
 0x215   :  { %v412_v39 = vmul.f32 %v319_v21, %v3885_v52  ;;  %v395_v37 = vmul.f32 %v3969_v35, %v4008_v2  ;;  %v404_v6 = vpack.c.bf16 %v392_v3, %v391_v41  ;;  %v387_v50 = vmul.f32 %v4000_v22, %v4008_v2  ;;  %v60_v2 = vld [vmem:[%s4907_s1 + $0x8] sm:$0xff] }
 0x216   :  { %457 = vrot.lane.b32.xlu0 %v408_v0, %s3627_s21  ;;  %447 = vrot.lane.b32.xlu1 %v403_v20, %s3627_s21  ;;  %v4049_v32 = vpack.c.bf16 %v424_v4, %v423_v23  ;;  %v4053_v45 = vpack.c.bf16 %v420_v55, %v419_v51  ;;  %v4055_v44 = vpack.c.bf16 %v416_v60, %v415_v54 }
 0x217   :  { %v4057_v48 = vpack.c.bf16 %v412_v39, %v411_v38  ;;  %v406_v52 = vpack.c.bf16 %v396_v10, %v395_v37  ;;  %v402_v14 = vpack.c.bf16 %v388_v9, %v387_v50  ;;  %v59_v37 = vld [vmem:[%s4907_s1] sm:$0xff]  ;;  %v61_v9 = vld [vmem:[%s4907_s1 + $0x10] sm:$0xff] }
 0x218   :  { %3138 = vmatprep.subr.bf16.mxu0 %v4049_v32 }
 0x21a   :  { %453 = vrot.lane.b32.xlu0 %v406_v52, %s3627_s21  ;;  %443 = vrot.lane.b32.xlu1 %v401_v49, %s3627_s21 }
 0x21e   :  { %449 = vrot.lane.b32.xlu0 %v404_v6, %s3627_s21 }
 0x222   :  { %445 = vrot.lane.b32.xlu0 %v402_v14, %s3627_s21 }
 0x280   :  { %v456_v12 = vpop.permute.xlu1 %455 }
 0x281   :  { %v484_v21 = vsel %vm147_vm0, %v456_v12, 0 }
 0x284   :  { %v452_v20 = vpop.permute.xlu1 %451 }
 0x285   :  { %v478_v23 = vsel %vm147_vm0, %v452_v20, 0 }
 0x288   :  { %v458_v15 = vpop.permute.xlu0 %457  ;;  %v448_v4 = vpop.permute.xlu1 %447 }
 0x289   :  { %3294 = vmatprep.subr.msk.bf16.mxu1 %vm147_vm0, %v458_v15  ;;  %v487_v16 = vsel %vm147_vm0, %v458_v15, 0  ;;  %v472_v10 = vsel %vm147_vm0, %v448_v4, 0  ;;  %v62_v15 = vld [vmem:[%s4907_s1 + $0x18] sm:$0xff] }
 0x28a   :  { %3099 = vmatpush3.bf16.xpose.msra.mxu1 %v487_v16 }
 0x28b   :  { %3295 = vmatprep.subr.msk.bf16.mxu1 %vm147_vm0, %v456_v12 }
 0x28c   :  { %v454_v18 = vpop.permute.xlu0 %453  ;;  %v444_v60 = vpop.permute.xlu1 %443 }
 0x28d   :  { %v481_v63 = vsel %vm147_vm0, %v454_v18, 0  ;;  %v466_v38 = vsel %vm147_vm0, %v444_v60, 0 }
 0x290   :  { %v450_v51 = vpop.permute.xlu0 %449 }
 0x291   :  { %v475_v0 = vsel %vm147_vm0, %v450_v51, 0 }
 0x292   :  { %3101 = vmatpush3.bf16.xpose.msra.mxu1 %v484_v21 }
 0x293   :  { %3296 = vmatprep.subr.msk.bf16.mxu1 %vm147_vm0, %v454_v18 }
 0x294   :  { %v446_v54 = vpop.permute.xlu0 %445 }
 0x295   :  { %v469_v55 = vsel %vm147_vm0, %v446_v54, 0 }
 0x29a   :  { %3103 = vmatpush3.bf16.xpose.msra.mxu1 %v481_v63 }
 0x29b   :  { %3297 = vmatprep.subr.msk.bf16.mxu1 %vm147_vm0, %v452_v20 }
 0x2a2   :  { %3105 = vmatpush3.bf16.xpose.msra.mxu1 %v478_v23 }
 0x2a3   :  { %3298 = vmatprep.subr.msk.bf16.mxu1 %vm147_vm0, %v450_v51 }
 0x2aa   :  { %3107 = vmatpush3.bf16.xpose.msra.mxu1 %v475_v0 }
 0x2ab   :  { %3299 = vmatprep.subr.msk.bf16.mxu1 %vm147_vm0, %v448_v4 }
 0x2b2   :  { %3109 = vmatpush3.bf16.xpose.msra.mxu1 %v472_v10 }
 0x2b3   :  { %3300 = vmatprep.subr.msk.bf16.mxu1 %vm147_vm0, %v446_v54 }
 0x2ba   :  { %3111 = vmatpush3.bf16.xpose.msra.mxu1 %v469_v55 }
 0x2bb   :  { %3301 = vmatprep.subr.msk.bf16.mxu1 %vm147_vm0, %v444_v60 }
 0x2c2   :  { %3113 = vmatpush3.bf16.xpose.msra.mxu1 %v466_v38 }
 0x2c9   :  { %3115 = vmatmul.mubr.msk.bf16.vlgmr.msra.gmra.mxu1 %vm147_vm0, %v434_v8 }
 0x389   :  { %v3116_v39 = vpop.f32.mrf.mxu1 }
 0x38a   :  { %v540_v3 = vmul.f32 0.25, %v3116_v39 }
 0x38b   :  { %v523_v40 = vpop.f32.mrf.mxu1 }
 0x38c   :  { %v538_v49 = vmul.f32 0.25, %v523_v40  ;;  %v544_v50 = vadd.f32 %v540_v3, %v61_v9 }
 0x38d   :  { %v3117_v52 = vpop.f32.mrf.mxu1 }
 0x38e   :  { %v542_v41 = vadd.f32 %v538_v49, %v59_v37  ;;  %v541_v8 = vmul.f32 0.25, %v3117_v52 }
 0x38f   :  { %v526_v6 = vpop.f32.mrf.mxu1 }
 0x390   :  { %v539_v47 = vmul.f32 0.25, %v526_v6  ;;  %546 = vmax.xlane.f32.xlu0 %v542_v41  ;;  %v545_v16 = vadd.f32 %v541_v8, %v62_v15  ;;  %v3339_v15 = vld [vmem:[%s4912_s6] sm:$0xff]  }
 0x392   :  { %v543_v14 = vadd.f32 %v539_v47, %v60_v2 }
 0x394   :  { %550 = vmax.xlane.f32.xlu0 %v544_v50  ;;  %548 = vmax.xlane.f32.xlu1 %v543_v14 }
 0x398   :  { %552 = vmax.xlane.f32.xlu0 %v545_v16 }
 0x419   :  { %v547_v12 = vpop.xlane.xlu0 %546 }
 0x41a   :  { %v554_v21 = vsub.f32 %v542_v41, %v547_v12 }
 0x41c   :  { %v558_v20 = vmul.f32 1.442695, %v554_v21 }
 0x41d   :  { %v551_v18 = vpop.xlane.xlu0 %550  ;;  %v549_v63 = vpop.xlane.xlu1 %548 }
 0x41e   :  { %v556_v23 = vsub.f32 %v544_v50, %v551_v18  ;;  %v555_v51 = vsub.f32 %v543_v14, %v549_v63  ;;  %3436 = vpow2.f32 %v558_v20  ;;  %v4928_v50 = vmov 0   ;;  %v3338_v14 = vld [vmem:[%s4912_s6 + $0x8] sm:$0xff]  }
 0x420   :  { %v560_v0 = vmul.f32 1.442695, %v555_v51  ;;  %v562_v4 = vmul.f32 1.442695, %v556_v23  ;;  %v99_v23 = vld [vmem:[%s4910_s4 + $0x3] ss:$0 sm:$0xff] }
 0x421   :  { %v553_v10 = vpop.xlane.xlu0 %552 }
 0x422   :  { %v557_v54 = vsub.f32 %v545_v16, %v553_v10  ;;  %3438 = vpow2.f32 %v560_v0 }
 0x423   :  { %3440 = vpow2.f32 %v562_v4  ;;  %v100_v4 = vld [vmem:[%s4910_s4 + $0x4] ss:$0 sm:$0xff] }
 0x424   :  { %v564_v55 = vmul.f32 1.442695, %v557_v54 }
 0x426   :  { %3442 = vpow2.f32 %v564_v55 }
 0x42b   :  { %v3437_v60 = vpop.eup %3436 }
 0x42f   :  { %v3439_v38 = vpop.eup %3438 }
 0x430   :  { %v566_v39 = vpack.c.bf16 %v3439_v38, %v3437_v60  ;;  %v3441_v40 = vpop.eup %3440 }
 0x432   :  { %3134 = vmatprep.mubr.bf16.mxu0 %v566_v39 }
 0x433   :  { %v3443_v37 = vpop.eup %3442 }
 0x434   :  { %v567_v49 = vpack.c.bf16 %v3443_v37, %v3441_v40 }
 0x436   :  { %3135 = vmatmul.mubr.bf16.vlgmr.msra.gmra.mxu0 %v567_v49 }
 0x437   :  { %3139 = vmatpush3.bf16.msra.mxu0 %v4049_v32 }
 0x438   :  { %3140 = vmatprep.subr.bf16.mxu0 %v4013_v11 }
 0x43b   :  { %3141 = vmatpush3.bf16.msra.mxu0 %v4013_v11  ;;  %v3336_v11 = vld [vmem:[%s4912_s6 + $0x18] sm:$0xff]  }
 0x43c   :  { %3142 = vmatprep.subr.bf16.mxu0 %v4053_v45  ;;  %3158 = vmatprep.subr.bf16.mxu1 %v3336_v11 }
 0x43d   :  { %3159 = vmatpush3.bf16.msra.mxu1 %v3336_v11 }
 0x43f   :  { %3143 = vmatpush3.bf16.msra.mxu0 %v4053_v45 }
 0x440   :  { %3144 = vmatprep.subr.bf16.mxu0 %v4015_v42 }
 0x443   :  { %3145 = vmatpush3.bf16.msra.mxu0 %v4015_v42  ;;  %v3337_v42 = vld [vmem:[%s4912_s6 + $0x10] sm:$0xff]  }
 0x444   :  { %3146 = vmatprep.subr.bf16.mxu0 %v4055_v44  ;;  %3160 = vmatprep.subr.bf16.mxu1 %v3337_v42 }
 0x445   :  { %3161 = vmatpush3.bf16.msra.mxu1 %v3337_v42  ;;  %v3581_v42 = vld [vmem:[%s4927_s23 + $0x10] sm:$0xff] }
 0x446   :  { %3162 = vmatprep.subr.bf16.mxu1 %v3338_v14 }
 0x447   :  { %3147 = vmatpush3.bf16.msra.mxu0 %v4055_v44 }
 0x448   :  { %3148 = vmatprep.subr.bf16.mxu0 %v4017_v46 }
 0x449   :  { %3163 = vmatpush3.bf16.msra.mxu1 %v3338_v14 }
 0x44a   :  { %3164 = vmatprep.subr.bf16.mxu1 %v3339_v15 }
 0x44b   :  { %3149 = vmatpush3.bf16.msra.mxu0 %v4017_v46 }
 0x44c   :  { %3150 = vmatprep.subr.bf16.mxu0 %v4057_v48 }
 0x44d   :  { %3165 = vmatpush3.bf16.msra.mxu1 %v3339_v15 }
 0x44f   :  { %3151 = vmatpush3.bf16.msra.mxu0 %v4057_v48 }
 0x450   :  { %3152 = vmatprep.subr.bf16.mxu0 %v4036_v53 }
 0x453   :  { %3153 = vmatpush3.bf16.msra.mxu0 %v4036_v53 }
 0x4f6   :  { %v3136_v46 = vpop.f32.mrf.mxu0 }
 0x4f8   :  { %v650_v32 = vpop.f32.mrf.mxu0 }
 0x4f9   :  { %3444 = vrcp.f32 %v650_v32 }
 0x4fa   :  { %v3137_v45 = vpop.f32.mrf.mxu0 }
 0x4fb   :  { %3446 = vrcp.f32 %v3137_v45 }
 0x4fc   :  { %3448 = vrcp.f32 %v3136_v46  ;;  %v653_v44 = vpop.f32.mrf.mxu0 }
 0x4fd   :  { %3450 = vrcp.f32 %v653_v44 }
 0x506   :  { %v3445_v53 = vpop.eup %3444 }
 0x507   :  { %v669_v6 = vmul.f32 %v3445_v53, %v3437_v60  ;;  %v3582_v53 = vld [vmem:[%s4927_s23 + $0x8] sm:$0xff] }
 0x508   :  { %v3447_v48 = vpop.eup %3446 }
 0x509   :  { %v3449_v52 = vpop.eup %3448  ;;  %v672_v41 = vmul.f32 %v3447_v48, %v3443_v37  ;;  %v3580_v37 = vld [vmem:[%s4927_s23] sm:$0xff] }
 0x50a   :  { %v3451_v3 = vpop.eup %3450  ;;  %v671_v2 = vmul.f32 %v3449_v52, %v3441_v40  ;;  %v3583_v52 = vld [vmem:[%s4927_s23 + $0x18] sm:$0xff] }
 0x50b   :  { %v670_v9 = vmul.f32 %v3451_v3, %v3439_v38 }
 0x50c   :  { %v674_v8 = vpack.c.bf16 %v672_v41, %v671_v2 }
 0x50d   :  { %v673_v47 = vpack.c.bf16 %v670_v9, %v669_v6 }
 0x50f   :  { %3154 = vmatprep.mubr.bf16.mxu0 %v673_v47 }
 0x510   :  { %3155 = vmatmul.mubr.bf16.vlgmr.msra.gmra.mxu0 %v674_v8 }
 0x511   :  { %964 = vmatprep.mubr.bf16.mxu0 %v4928_v50 }
 0x5d0   :  { %v3156_v16 = vpop.f32.mrf.mxu0 }
 0x5d2   :  { %v709_v12 = vpop.f32.mrf.mxu0 }
 0x5d4   :  { %v3157_v21 = vpop.f32.mrf.mxu0 }
 0x5d5   :  { %v725_v20 = vpack.c.bf16 %v3157_v21, %v3156_v16 }
 0x5d6   :  { %v712_v18 = vpop.f32.mrf.mxu0 }
 0x5d7   :  { %v724_v63 = vpack.c.bf16 %v712_v18, %v709_v12 }
 0x5d9   :  { %3166 = vmatprep.mubr.msk.bf16.mxu1 %vm147_vm0, %v724_v63 }
 0x5da   :  { %3167 = vmatmul.mubr.msk.bf16.vlgmr.msra.gmra.mxu1 %vm147_vm0, %v725_v20 }
 0x69a   :  { %v3168_v51 = vpop.f32.mrf.mxu1 }
 0x69b   :  { %v799_v0 = vadd.f32 %v3168_v51, %v99_v23 }
 0x69c   :  { %v790_v10 = vpop.f32.mrf.mxu1 }
 0x69d   :  { %v791_v54 = vadd.f32 %v790_v10, %v99_v23  ;;  %v807_v60 = vmul.f32 %v799_v0, %v100_v4 }
 0x69e   :  { %v3169_v55 = vpop.f32.mrf.mxu1 }
 0x69f   :  { %v805_v38 = vmul.f32 %v791_v54, %v100_v4  ;;  %v802_v39 = vadd.f32 %v3169_v55, %v99_v23  ;;  %v4148_v46 = vadd.f32 %v3581_v42, %v807_v60  ;;  %v3348_v42 = vld [vmem:[%s4913_s7 + $0x14] ss:$8 sps:$4 sm:$0xff]  }
 0x6a0   :  { %v793_v40 = vpop.f32.mrf.mxu1 }
 0x6a1   :  { %v4143_v49 = vadd.f32 %v3580_v37, %v805_v38  ;;  %v794_v11 = vadd.f32 %v793_v40, %v99_v23  ;;  %v808_v32 = vmul.f32 %v802_v39, %v100_v4  ;;  %v819_v6 = vsel %vm147_vm0, %v4148_v46, 0.0  ;;  %v3342_v39 = vld [vmem:[%s4913_s7 + $0x34] ss:$8 sps:$4 sm:$0xff]   ;;  %v3340_v40 = vld [vmem:[%s4913_s7 + $0x30] ss:$8 sps:$4 sm:$0xff]  }
 0x6a2   :  { %940 = vmatprep.subr.bf16.mxu0 %v3342_v39  ;;  %v3345_v37 = vld [vmem:[%s4913_s7 + $0x24] ss:$8 sps:$4 sm:$0xff]  }
 0x6a3   :  { %v806_v45 = vmul.f32 %v794_v11, %v100_v4  ;;  %v813_v44 = vsel %vm147_vm0, %v4143_v49, 0.0  ;;  %v4160_v3 = vadd.f32 %v3583_v52, %v808_v32  ;;  %941 = vmatpush1.bf16.msra.mxu0 %v3340_v40  ;;  %v3343_v11 = vld [vmem:[%s4913_s7 + $0x20] ss:$8 sps:$4 sm:$0xff]   ;;  %v3346_v32 = vld [vmem:[%s4913_s7 + $0x10] ss:$8 sps:$4 sm:$0xff]  }
 0x6a4   :  { %814 = vadd.xlane.f32.xlu0 %v813_v44  ;;  %942 = vmatprep.subr.bf16.mxu0 %v3345_v37  ;;  %v3349_v44 = vld [vmem:[%s4913_s7] ss:$8 sps:$4 sm:$0xff]  }
 0x6a5   :  { %v4155_v48 = vadd.f32 %v3582_v53, %v806_v45  ;;  %v822_v9 = vsel %vm147_vm0, %v4160_v3, 0.0  ;;  %v3351_v45 = vld [vmem:[%s4913_s7 + $0x4] ss:$8 sps:$4 sm:$0xff]  }
 0x6a7   :  { %v816_v41 = vsel %vm147_vm0, %v4155_v48, 0.0  ;;  %943 = vmatpush1.bf16.msra.mxu0 %v3343_v11 }
 0x6a8   :  { %817 = vadd.xlane.f32.xlu1 %v816_v41  ;;  %820 = vadd.xlane.f32.xlu0 %v819_v6 }
 0x6a9   :  { %944 = vmatprep.subr.bf16.mxu0 %v3348_v42 }
 0x6ab   :  { %945 = vmatpush1.bf16.msra.mxu0 %v3346_v32 }
 0x6ac   :  { %823 = vadd.xlane.f32.xlu1 %v822_v9  ;;  %946 = vmatprep.subr.bf16.mxu0 %v3351_v45 }
 0x6af   :  { %947 = vmatpush1.bf16.msra.mxu0 %v3349_v44 }
 0x72d   :  { %v815_v2 = vpop.xlane.xlu0 %814 }
 0x72e   :  { %v825_v47 = vmul.f32 0.015625, %v815_v2 }
 0x730   :  { %v829_v8 = vsub.f32 %v4143_v49, %v825_v47 }
 0x731   :  { %v818_v14 = vpop.xlane.xlu1 %817  ;;  %v821_v15 = vpop.xlane.xlu0 %820 }
 0x732   :  { %v826_v16 = vmul.f32 0.015625, %v818_v14  ;;  %v827_v12 = vmul.f32 0.015625, %v821_v15  ;;  %v833_v21 = vmul.f32 %v829_v8, %v829_v8 }
 0x734   :  { %v830_v18 = vsub.f32 %v4155_v48, %v826_v16  ;;  %v831_v63 = vsub.f32 %v4148_v46, %v827_v12  ;;  %v837_v20 = vsel %vm147_vm0, %v833_v21, 0.0 }
 0x735   :  { %v824_v23 = vpop.xlane.xlu1 %823  ;;  %838 = vadd.xlane.f32.xlu0 %v837_v20 }
 0x736   :  { %v828_v51 = vmul.f32 0.015625, %v824_v23  ;;  %v834_v0 = vmul.f32 %v830_v18, %v830_v18  ;;  %v835_v4 = vmul.f32 %v831_v63, %v831_v63 }
 0x738   :  { %v832_v10 = vsub.f32 %v4160_v3, %v828_v51  ;;  %v840_v54 = vsel %vm147_vm0, %v834_v0, 0.0  ;;  %v843_v55 = vsel %vm147_vm0, %v835_v4, 0.0  ;;  %v101_v51 = vld [vmem:[%s4910_s4 + $0x5] ss:$0 sm:$0xff] }
 0x739   :  { %841 = vadd.xlane.f32.xlu1 %v840_v54  ;;  %844 = vadd.xlane.f32.xlu0 %v843_v55 }
 0x73a   :  { %v836_v60 = vmul.f32 %v832_v10, %v832_v10 }
 0x73c   :  { %v846_v38 = vsel %vm147_vm0, %v836_v60, 0.0  ;;  %v102_v60 = vld [vmem:[%s4910_s4 + $0x6] ss:$0 sm:$0xff] }
 0x73d   :  { %847 = vadd.xlane.f32.xlu1 %v846_v38 }
 0x7be   :  { %v839_v53 = vpop.xlane.xlu0 %838 }
 0x7bf   :  { %v849_v52 = vmul.f32 0.015625, %v839_v53 }
 0x7c1   :  { %v853_v41 = vadd.f32 1e-05, %v849_v52  ;;  %v3352_v52 = vld [vmem:[%s4914_s8 + $0x38] sm:$0xff]  }
 0x7c2   :  { %v842_v6 = vpop.xlane.xlu1 %841  ;;  %v845_v9 = vpop.xlane.xlu0 %844  ;;  %3170 = vmatprep.subr.bf16.mxu1 %v3352_v52 }
 0x7c3   :  { %3452 = vrsqrt.f32 %v853_v41  ;;  %v850_v2 = vmul.f32 0.015625, %v842_v6  ;;  %v851_v47 = vmul.f32 0.015625, %v845_v9  ;;  %3171 = vmatpush3.bf16.msra.mxu1 %v3352_v52  ;;  %v3355_v41 = vld [vmem:[%s4914_s8 + $0x20] sm:$0xff]   ;;  %v3356_v6 = vld [vmem:[%s4914_s8 + $0x18] sm:$0xff]   ;;  %v3357_v9 = vld [vmem:[%s4914_s8 + $0x10] sm:$0xff]  }
 0x7c5   :  { %v854_v14 = vadd.f32 1e-05, %v850_v2  ;;  %v855_v15 = vadd.f32 1e-05, %v851_v47  ;;  %v3358_v2 = vld [vmem:[%s4914_s8 + $0x8] sm:$0xff]   ;;  %v3359_v47 = vld [vmem:[%s4914_s8] sm:$0xff]  }
 0x7c6   :  { %v848_v16 = vpop.xlane.xlu1 %847 }
 0x7c7   :  { %3454 = vrsqrt.f32 %v854_v14  ;;  %v852_v12 = vmul.f32 0.015625, %v848_v16  ;;  %v2848_v14 = vld [vmem:[%s4910_s4 + $0x7] ss:$8 sm:$0x3] }
 0x7c8   :  { %3456 = vrsqrt.f32 %v855_v15  ;;  %v883_v15 = vrot.slane %v2848_v14, %v3979_v59 }
 0x7c9   :  { %v856_v21 = vadd.f32 1e-05, %v852_v12 }
 0x7cb   :  { %3458 = vrsqrt.f32 %v856_v21 }
 0x7d0   :  { %v3453_v20 = vpop.eup %3452 }
 0x7d1   :  { %v861_v23 = vmul.f32 %v3453_v20, %v829_v8 }
 0x7d3   :  { %v865_v54 = vmul.f32 %v861_v23, %v101_v51 }
 0x7d4   :  { %v3455_v0 = vpop.eup %3454 }
 0x7d5   :  { %v862_v4 = vmul.f32 %v3455_v0, %v830_v18  ;;  %v3457_v55 = vpop.eup %3456  ;;  %v869_v40 = vadd.f32 %v865_v54, %v102_v60 }
 0x7d6   :  { %v863_v11 = vmul.f32 %v3457_v55, %v831_v63  ;;  %v3353_v63 = vld [vmem:[%s4914_s8 + $0x30] sm:$0xff]  }
 0x7d7   :  { %v866_v38 = vmul.f32 %v862_v4, %v101_v51  ;;  %3172 = vmatprep.subr.bf16.mxu1 %v3353_v63 }
 0x7d8   :  { %v3459_v39 = vpop.eup %3458  ;;  %v867_v45 = vmul.f32 %v863_v11, %v101_v51  ;;  %3173 = vmatpush3.bf16.msra.mxu1 %v3353_v63 }
 0x7d9   :  { %v870_v37 = vadd.f32 %v866_v38, %v102_v60  ;;  %v864_v42 = vmul.f32 %v3459_v39, %v832_v10  ;;  %v3354_v10 = vld [vmem:[%s4914_s8 + $0x28] sm:$0xff]  }
 0x7da   :  { %v871_v44 = vadd.f32 %v867_v45, %v102_v60  ;;  %3174 = vmatprep.subr.bf16.mxu1 %v3354_v10 }
 0x7db   :  { %v873_v32 = vpack.c.bf16 %v870_v37, %v869_v40  ;;  %v868_v8 = vmul.f32 %v864_v42, %v101_v51 }
 0x7dc   :  { %3175 = vmatpush3.bf16.msra.mxu1 %v3354_v10  ;;  %v879_v10 = vrot.slane %v2848_v14, %v3977_v58 }
 0x7dd   :  { %2883 = vmatmul.mubr.msk.bf16.vlgmr.msra.gmra.mxu0 %vm147_vm0, %v873_v32  ;;  %v872_v18 = vadd.f32 %v868_v8, %v102_v60  ;;  %3176 = vmatprep.subr.bf16.mxu1 %v3355_v41 }
 0x7de   :  { %974 = vmatprep.mubr.bf16.mxu0 %v4928_v50 }
 0x7df   :  { %v874_v53 = vpack.c.bf16 %v872_v18, %v871_v44 }
 0x7e0   :  { %3177 = vmatpush3.bf16.msra.mxu1 %v3355_v41 }
 0x7e1   :  { %3178 = vmatprep.subr.bf16.mxu1 %v3356_v6 }
 0x7e4   :  { %3179 = vmatpush3.bf16.msra.mxu1 %v3356_v6 }
 0x7e5   :  { %2884 = vmatmul.mubr.msk.bf16.gmra.mxu0 %vm147_vm0, %v874_v53  ;;  %3180 = vmatprep.subr.bf16.mxu1 %v3357_v9 }
 0x7e6   :  { %1327 = vmatprep.mubr.bf16.mxu0 %v4928_v50 }
 0x7e8   :  { %3181 = vmatpush3.bf16.msra.mxu1 %v3357_v9 }
 0x7e9   :  { %3182 = vmatprep.subr.bf16.mxu1 %v3358_v2 }
 0x7ec   :  { %3183 = vmatpush3.bf16.msra.mxu1 %v3358_v2 }
 0x7ed   :  { %3184 = vmatprep.subr.bf16.mxu1 %v3359_v47 }
 0x7f0   :  { %3185 = vmatpush3.bf16.msra.mxu1 %v3359_v47 }
 0x7f1   :  { %3210 = vmatprep.subr.bf16.mxu1 %v3819_v43 }
 0x89d   :  { %v966_v16 = vpop.f32.mrf.mxu0 }
 0x89e   :  { %v967_v9 = vadd.f32 %v966_v16, %v879_v10 }
 0x89f   :  { %v968_v12 = vpop.f32.mrf.mxu0 }
 0x8a0   :  { %v969_v21 = vadd.f32 %v968_v12, %v883_v15 }
 0x8a1   :  { %v970_v20 = vpop.f32.mrf.mxu0 }
 0x8a2   :  { %v2885_v23 = vmul.f32 -1.442695, %v969_v21  ;;  %v971_v2 = vadd.f32 %v970_v20, %v879_v10 }
 0x8a3   :  { %v972_v51 = vpop.f32.mrf.mxu0 }
 0x8a4   :  { %3460 = vpow2.f32 %v2885_v23  ;;  %v973_v0 = vadd.f32 %v972_v51, %v883_v15 }
 0x8a5   :  { %v976_v4 = vpop.f32.mrf.mxu0 }
 0x8a6   :  { %v2886_v54 = vmul.f32 -1.442695, %v973_v0 }
 0x8a7   :  { %v978_v55 = vpop.f32.mrf.mxu0 }
 0x8a8   :  { %3462 = vpow2.f32 %v2886_v54  ;;  %v979_v60 = vadd.f32 %v978_v55, %v883_v15 }
 0x8a9   :  { %v980_v38 = vpop.f32.mrf.mxu0 }
 0x8aa   :  { %v2887_v39 = vmul.f32 -1.442695, %v979_v60 }
 0x8ab   :  { %v982_v40 = vpop.f32.mrf.mxu0 }
 0x8ac   :  { %3464 = vpow2.f32 %v2887_v39  ;;  %v983_v37 = vadd.f32 %v982_v40, %v883_v15  ;;  %v977_v39 = vadd.f32 %v976_v4, %v879_v10  ;;  %v981_v40 = vadd.f32 %v980_v38, %v879_v10 }
 0x8ae   :  { %v2888_v11 = vmul.f32 -1.442695, %v983_v37 }
 0x8b0   :  { %3466 = vpow2.f32 %v2888_v11 }
 0x8b1   :  { %v3461_v42 = vpop.eup %3460 }
 0x8b2   :  { %v997_v32 = vadd.f32 1.0, %v3461_v42 }
 0x8b4   :  { %3468 = vrcp.f32 %v997_v32 }
 0x8b5   :  { %v3463_v8 = vpop.eup %3462 }
 0x8b6   :  { %v998_v45 = vadd.f32 1.0, %v3463_v8 }
 0x8b8   :  { %3470 = vrcp.f32 %v998_v45 }
 0x8b9   :  { %v3465_v18 = vpop.eup %3464 }
 0x8ba   :  { %v999_v44 = vadd.f32 1.0, %v3465_v18 }
 0x8bc   :  { %3472 = vrcp.f32 %v999_v44 }
 0x8bd   :  { %v3467_v53 = vpop.eup %3466 }
 0x8be   :  { %v1000_v52 = vadd.f32 1.0, %v3467_v53 }
 0x8c0   :  { %3474 = vrcp.f32 %v1000_v52 }
 0x8c1   :  { %v3469_v63 = vpop.eup %3468 }
 0x8c2   :  { %v1009_v41 = vmul.f32 %v3469_v63, %v969_v21 }
 0x8c4   :  { %v1013_v15 = vmul.f32 %v1009_v41, %v967_v9 }
 0x8c5   :  { %v3471_v6 = vpop.eup %3470 }
 0x8c6   :  { %v1010_v47 = vmul.f32 %v3471_v6, %v973_v0 }
 0x8c8   :  { %v1014_v12 = vmul.f32 %v1010_v47, %v971_v2 }
 0x8c9   :  { %v3473_v23 = vpop.eup %3472 }
 0x8ca   :  { %v1017_v51 = vpack.c.bf16 %v1014_v12, %v1013_v15  ;;  %v1011_v54 = vmul.f32 %v3473_v23, %v979_v60 }
 0x8cc   :  { %3186 = vmatprep.mubr.bf16.mxu1 %v1017_v51  ;;  %v1015_v42 = vmul.f32 %v1011_v54, %v977_v39 }
 0x8cd   :  { %v3475_v55 = vpop.eup %3474 }
 0x8ce   :  { %v1012_v11 = vmul.f32 %v3475_v55, %v983_v37 }
 0x8d0   :  { %v1016_v32 = vmul.f32 %v1012_v11, %v981_v40 }
 0x8d2   :  { %v1018_v8 = vpack.c.bf16 %v1016_v32, %v1015_v42  ;;  %v3362_v42 = vld [vmem:[%s4915_s9 + $0x34] ss:$8 sps:$4 sm:$0xff]   ;;  %v3360_v32 = vld [vmem:[%s4915_s9 + $0x30] ss:$8 sps:$4 sm:$0xff]  }
 0x8d3   :  { %1303 = vmatprep.subr.bf16.mxu0 %v3362_v42 }
 0x8d4   :  { %3187 = vmatmul.mubr.bf16.vlgmr.msra.gmra.mxu1 %v1018_v8  ;;  %1304 = vmatpush1.bf16.msra.mxu0 %v3360_v32  ;;  %v3365_v8 = vld [vmem:[%s4915_s9 + $0x24] ss:$8 sps:$4 sm:$0xff]   ;;  %v2897_v32 = vld [vmem:[%s4910_s4 + $0x14] ss:$8 sm:$0x3] }
 0x8d5   :  { %3211 = vmatpush3.bf16.msra.mxu1 %v3819_v43  ;;  %v105_v43 = vld [vmem:[%s4910_s4 + $0x10] ss:$0 sm:$0xff]  ;;  %1305 = vmatprep.subr.bf16.mxu0 %v3365_v8  ;;  %v1242_v8 = vrot.slane %v2897_v32, %v3977_v58 }
 0x8d6   :  { %3212 = vmatprep.subr.bf16.mxu1 %v3909_v19 }
 0x8d9   :  { %3213 = vmatpush3.bf16.msra.mxu1 %v3909_v19 }
 0x8da   :  { %3214 = vmatprep.subr.bf16.mxu1 %v3918_v13 }
 0x8dd   :  { %3215 = vmatpush3.bf16.msra.mxu1 %v3918_v13 }
 0x8de   :  { %3216 = vmatprep.subr.bf16.mxu1 %v3927_v24 }
 0x8e1   :  { %3217 = vmatpush3.bf16.msra.mxu1 %v3927_v24  ;;  %v106_v24 = vld [vmem:[%s4910_s4 + $0x11] ss:$0 sm:$0xff] }
 0x8e2   :  { %3218 = vmatprep.subr.bf16.mxu1 %v3934_v25 }
 0x8e5   :  { %3219 = vmatpush3.bf16.msra.mxu1 %v3934_v25 }
 0x8e6   :  { %3220 = vmatprep.subr.bf16.mxu1 %v3941_v26 }
 0x8e9   :  { %3221 = vmatpush3.bf16.msra.mxu1 %v3941_v26 }
 0x8ea   :  { %3222 = vmatprep.subr.bf16.mxu1 %v3948_v27 }
 0x8ed   :  { %3223 = vmatpush3.bf16.msra.mxu1 %v3948_v27 }
 0x8ee   :  { %3224 = vmatprep.subr.bf16.mxu1 %v3953_v28 }
 0x8f1   :  { %3225 = vmatpush3.bf16.msra.mxu1 %v3953_v28 }
 0x994   :  { %v3188_v19 = vpop.f32.mrf.mxu1 }
 0x995   :  { %v1110_v13 = vadd.f32 %v3188_v19, %v105_v43  ;;  %v3366_v19 = vld [vmem:[%s4915_s9 + $0x10] ss:$8 sps:$4 sm:$0xff]  }
 0x996   :  { %v1101_v25 = vpop.f32.mrf.mxu1 }
 0x997   :  { %v1102_v26 = vadd.f32 %v1101_v25, %v105_v43  ;;  %v1118_v16 = vmul.f32 %v1110_v13, %v106_v24  ;;  %v3368_v13 = vld [vmem:[%s4915_s9 + $0x14] ss:$8 sps:$4 sm:$0xff]   ;;  %v3369_v25 = vld [vmem:[%s4915_s9] ss:$8 sps:$4 sm:$0xff]  }
 0x998   :  { %v3189_v14 = vpop.f32.mrf.mxu1 }
 0x999   :  { %v1116_v21 = vmul.f32 %v1102_v26, %v106_v24  ;;  %v1113_v27 = vadd.f32 %v3189_v14, %v105_v43  ;;  %v4265_v4 = vadd.f32 %v1118_v16, %v4148_v46 }
 0x99a   :  { %v1104_v20 = vpop.f32.mrf.mxu1 }
 0x99b   :  { %v4262_v0 = vadd.f32 %v1116_v21, %v4143_v49  ;;  %v1105_v28 = vadd.f32 %v1104_v20, %v105_v43  ;;  %v1119_v60 = vmul.f32 %v1113_v27, %v106_v24  ;;  %v1182_v44 = vsel %vm147_vm0, %v4265_v4, 0.0  ;;  %v3363_v43 = vld [vmem:[%s4915_s9 + $0x20] ss:$8 sps:$4 sm:$0xff]  }
 0x99c   :  { %1306 = vmatpush1.bf16.msra.mxu0 %v3363_v43 }
 0x99d   :  { %v1117_v38 = vmul.f32 %v1105_v28, %v106_v24  ;;  %v1176_v37 = vsel %vm147_vm0, %v4262_v0, 0.0  ;;  %v4273_v18 = vadd.f32 %v1119_v60, %v4160_v3  ;;  %v3371_v24 = vld [vmem:[%s4915_s9 + $0x4] ss:$8 sps:$4 sm:$0xff]   ;;  %1307 = vmatprep.subr.bf16.mxu0 %v3368_v13  ;;  %s3629_s9 = smov [#allocation2]  }
 0x99e   :  { %1177 = vadd.xlane.f32.xlu0 %v1176_v37  ;;  %s2836_s3 = sshll.u32 %s3629_s9, 4  ;;  %s2837_s3 = int_to_ptr.vmem [resolvable:$true] %s2836_s3 }
 0x99f   :  { %v4270_v45 = vadd.f32 %v1117_v38, %v4155_v48  ;;  %v1185_v46 = vsel %vm147_vm0, %v4273_v18, 0.0  ;;  %s3604_s28 = scalar_lea.vmem %s2837_s3, 512  ;;  %p3609_p1 = scmp.lt.s32.totalorder %s2837_s3, %s2837_s3 }
 0x9a0   :  { %1308 = vmatpush1.bf16.msra.mxu0 %v3366_v19  ;;  %p3605_p0 = scmp.ne.s32.totalorder %s2837_s3, %s3604_s28  ;;  %p3610_p2 = scmp.lt.s32.totalorder %s3604_s28, %s3604_s28 }
 0x9a1   :  { %v1179_v49 = vsel %vm147_vm0, %v4270_v45, 0.0  ;;  %1309 = vmatprep.subr.bf16.mxu0 %v3371_v24 }
 0x9a2   :  { %1180 = vadd.xlane.f32.xlu1 %v1179_v49  ;;  %1183 = vadd.xlane.f32.xlu0 %v1182_v44  ;;  %p3611_p3 = por %p3610_p2, %p3609_p1 }
 0x9a4   :  { %1310 = vmatpush1.bf16.msra.mxu0 %v3369_v25  ;;  %p3612_p4 = pnand %p3611_p3, %p3605_p0 }
 0x9a6   :  { %1186 = vadd.xlane.f32.xlu1 %v1185_v46 }
 0xa27   :  { %v1178_v53 = vpop.xlane.xlu0 %1177 }
 0xa28   :  { %v1188_v52 = vmul.f32 0.015625, %v1178_v53 }
 0xa2a   :  { %v1192_v48 = vsub.f32 %v4262_v0, %v1188_v52  ;;  %v1124_v52 = vld [vmem:[%s4910_s4 + $0x12] ss:$0 sm:$0xff] }
 0xa2b   :  { %v1181_v63 = vpop.xlane.xlu1 %1180  ;;  %v1184_v10 = vpop.xlane.xlu0 %1183 }
 0xa2c   :  { %v1189_v3 = vmul.f32 0.015625, %v1181_v63  ;;  %v1190_v41 = vmul.f32 0.015625, %v1184_v10  ;;  %v1196_v6 = vmul.f32 %v1192_v48, %v1192_v48 }
 0xa2e   :  { %v1193_v9 = vsub.f32 %v4270_v45, %v1189_v3  ;;  %v1194_v2 = vsub.f32 %v4265_v4, %v1190_v41  ;;  %v1200_v47 = vsel %vm147_vm0, %v1196_v6, 0.0  ;;  %v1125_v6 = vld [vmem:[%s4910_s4 + $0x13] ss:$0 sm:$0xff] }
 0xa2f   :  { %v1187_v15 = vpop.xlane.xlu1 %1186  ;;  %1201 = vadd.xlane.f32.xlu0 %v1200_v47 }
 0xa30   :  { %v1191_v12 = vmul.f32 0.015625, %v1187_v15  ;;  %v1197_v23 = vmul.f32 %v1193_v9, %v1193_v9  ;;  %v1198_v51 = vmul.f32 %v1194_v2, %v1194_v2 }
 0xa32   :  { %v1195_v54 = vsub.f32 %v4273_v18, %v1191_v12  ;;  %v1203_v55 = vsel %vm147_vm0, %v1197_v23, 0.0  ;;  %v1206_v39 = vsel %vm147_vm0, %v1198_v51, 0.0 }
 0xa33   :  { %1204 = vadd.xlane.f32.xlu1 %v1203_v55  ;;  %1207 = vadd.xlane.f32.xlu0 %v1206_v39 }
 0xa34   :  { %v1199_v40 = vmul.f32 %v1195_v54, %v1195_v54 }
 0xa36   :  { %v1209_v11 = vsel %vm147_vm0, %v1199_v40, 0.0 }
 0xa37   :  { %1210 = vadd.xlane.f32.xlu1 %v1209_v11 }
 0xab8   :  { %v1202_v26 = vpop.xlane.xlu0 %1201 }
 0xab9   :  { %v1212_v14 = vmul.f32 0.015625, %v1202_v26 }
 0xabb   :  { %v1216_v16 = vadd.f32 1e-05, %v1212_v14 }
 0xabc   :  { %v1205_v21 = vpop.xlane.xlu1 %1204  ;;  %v1208_v27 = vpop.xlane.xlu0 %1207 }
 0xabd   :  { %3476 = vrsqrt.f32 %v1216_v16  ;;  %v1213_v20 = vmul.f32 0.015625, %v1205_v21  ;;  %v1214_v28 = vmul.f32 0.015625, %v1208_v27 }
 0xabf   :  { %v1217_v60 = vadd.f32 1e-05, %v1213_v20  ;;  %v1218_v38 = vadd.f32 1e-05, %v1214_v28 }
 0xac0   :  { %v1211_v37 = vpop.xlane.xlu1 %1210 }
 0xac1   :  { %3478 = vrsqrt.f32 %v1217_v60  ;;  %v1215_v49 = vmul.f32 0.015625, %v1211_v37  ;;  %v3584_v60 = vld [vmem:[%s4908_s2 + $0x60] sm:$0xff]  ;;  %v3585_v37 = vld [vmem:[%s4908_s2 + $0x68] sm:$0xff] }
 0xac2   :  { %3480 = vrsqrt.f32 %v1218_v38 }
 0xac3   :  { %v1219_v44 = vadd.f32 1e-05, %v1215_v49 }
 0xac5   :  { %3482 = vrsqrt.f32 %v1219_v44 }
 0xaca   :  { %v3477_v46 = vpop.eup %3476 }
 0xacb   :  { %v1224_v53 = vmul.f32 %v3477_v46, %v1192_v48 }
 0xacd   :  { %v1228_v10 = vmul.f32 %v1224_v53, %v1124_v52  ;;  %v3587_v53 = vld [vmem:[%s4908_s2 + $0x48] sm:$0xff] }
 0xace   :  { %v3479_v63 = vpop.eup %3478 }
 0xacf   :  { %v1225_v3 = vmul.f32 %v3479_v63, %v1193_v9  ;;  %v3481_v41 = vpop.eup %3480  ;;  %v1232_v12 = vadd.f32 %v1228_v10, %v1125_v6  ;;  %v3588_v63 = vld [vmem:[%s4908_s2 + $0x20] sm:$0xff] }
 0xad0   :  { %v1226_v51 = vmul.f32 %v3481_v41, %v1194_v2  ;;  %v1246_v2 = vrot.slane %v2897_v32, %v3979_v59  ;;  %v3591_v32 = vld [vmem:[%s4908_s2 + $0x8] sm:$0xff] }
 0xad1   :  { %v1229_v47 = vmul.f32 %v1225_v3, %v1124_v52  ;;  %v3589_v3 = vld [vmem:[%s4908_s2 + $0x28] sm:$0xff] }
 0xad2   :  { %v3483_v15 = vpop.eup %3482  ;;  %v1230_v40 = vmul.f32 %v1226_v51, %v1124_v52 }
 0xad3   :  { %v1233_v23 = vadd.f32 %v1229_v47, %v1125_v6  ;;  %v1227_v55 = vmul.f32 %v3483_v15, %v1195_v54 }
 0xad4   :  { %v1234_v9 = vadd.f32 %v1230_v40, %v1125_v6 }
 0xad5   :  { %v1236_v39 = vpack.c.bf16 %v1233_v23, %v1232_v12  ;;  %v1231_v48 = vmul.f32 %v1227_v55, %v1124_v52 }
 0xad7   :  { %2907 = vmatmul.mubr.msk.bf16.vlgmr.msra.gmra.mxu0 %vm147_vm0, %v1236_v39  ;;  %v1235_v11 = vadd.f32 %v1231_v48, %v1125_v6  ;;  %v3590_v39 = vld [vmem:[%s4908_s2] sm:$0xff] }
 0xad8   :  { %1337 = vmatprep.mubr.bf16.mxu0 %v4928_v50 }
 0xad9   :  { %v1237_v42 = vpack.c.bf16 %v1235_v11, %v1234_v9 }
 0xadf   :  { %2908 = vmatmul.mubr.msk.bf16.gmra.mxu0 %vm147_vm0, %v1237_v42 }
 0xb97   :  { %v1329_v54 = vpop.f32.mrf.mxu0 }
 0xb98   :  { %v4327_v19 = vadd.f32 %v1329_v54, %v1242_v8 }
 0xb99   :  { %v1331_v43 = vpop.f32.mrf.mxu0 }
 0xb9a   :  { %v1332_v13 = vadd.f32 %v1331_v43, %v1246_v2  ;;  %v1360_v21 = vmul.f32 %v4327_v19, %v3961_v30  ;;  %v3586_v30 = vld [vmem:[%s4908_s2 + $0x40] sm:$0xff]  ;;  %v1356_v55 = vmul.f32 %v4327_v19, %v3973_v56 }
 0xb9b   :  { %v1333_v24 = vpop.f32.mrf.mxu0 }
 0xb9c   :  { %v4329_v25 = vadd.f32 %v1333_v24, %v1242_v8  ;;  %v1384_v38 = vmul.f32 %v3584_v60, %v1332_v13  ;;  %v1380_v44 = vmul.f32 %v3586_v30, %v1332_v13  ;;  %v1376_v10 = vmul.f32 %v3588_v63, %v1332_v13  ;;  %v3593_v24 = vld [vmem:[%s4908_s2 + $0x50] sm:$0xff] }
 0xb9d   :  { %v1335_v26 = vpop.f32.mrf.mxu0  ;;  %v1372_v48 = vmul.f32 %v3590_v39, %v1332_v13 }
 0xb9e   :  { %v1336_v14 = vadd.f32 %v1335_v26, %v1246_v2  ;;  %v1396_v16 = vpack.c.bf16 %v4329_v25, %v4327_v19  ;;  %v1361_v27 = vmul.f32 %v4329_v25, %v3963_v31  ;;  %v1357_v42 = vmul.f32 %v4329_v25, %v3971_v36 }
 0xb9f   :  { %v1339_v20 = vpop.f32.mrf.mxu0 }
 0xba0   :  { %3206 = vmatprep.mubr.msk.bf16.mxu0 %vm147_vm0, %v1396_v16  ;;  %v1370_v28 = vpack.c.bf16 %v1361_v27, %v1360_v21  ;;  %v1385_v49 = vmul.f32 %v3585_v37, %v1336_v14  ;;  %v4347_v31 = vadd.f32 %v1339_v20, %v1242_v8  ;;  %v1381_v52 = vmul.f32 %v3587_v53, %v1336_v14  ;;  %v3595_v21 = vld [vmem:[%s4908_s2 + $0x58] sm:$0xff] }
 0xba1   :  { %v1341_v46 = vpop.f32.mrf.mxu0  ;;  %v1377_v41 = vmul.f32 %v3589_v3, %v1336_v14  ;;  %v1373_v56 = vmul.f32 %v3591_v32, %v1336_v14 }
 0xba2   :  { %1418 = vrot.lane.b32.xlu1 %v1370_v28, %s3627_s21  ;;  %v1342_v6 = vadd.f32 %v1341_v46, %v1246_v2  ;;  %v4359_v15 = vpack.c.bf16 %v1385_v49, %v1384_v38  ;;  %v4361_v12 = vpack.c.bf16 %v1381_v52, %v1380_v44  ;;  %v1362_v11 = vmul.f32 %v4347_v31, %v3965_v33  ;;  %v3597_v28 = vld [vmem:[%s4908_s2 + $0x38] sm:$0xff]  ;;  %v3598_v38 = vld [vmem:[%s4908_s2 + $0x10] sm:$0xff] }
 0xba3   :  { %v1343_v47 = vpop.f32.mrf.mxu0  ;;  %v4363_v23 = vpack.c.bf16 %v1377_v41, %v1376_v10  ;;  %v1358_v9 = vmul.f32 %v4347_v31, %v3969_v35  ;;  %v3592_v35 = vld [vmem:[%s4908_s2 + $0x70] sm:$0xff]  ;;  %v3599_v49 = vld [vmem:[%s4908_s2 + $0x18] sm:$0xff]  ;;  %v1354_v46 = vmul.f32 %v4347_v31, %v3984_v61  ;;  %v1368_v10 = vpack.c.bf16 %v1357_v42, %v1356_v55 }
 0xba4   :  { %v4365_v51 = vadd.f32 %v1343_v47, %v1242_v8  ;;  %v1386_v36 = vmul.f32 %v3592_v35, %v1342_v6  ;;  %v1382_v26 = vmul.f32 %v3593_v24, %v1342_v6  ;;  %v1374_v37 = vmul.f32 %v3598_v38, %v1342_v6 }
 0xba5   :  { %v1345_v40 = vpop.f32.mrf.mxu0  ;;  %v1353_v41 = vmul.f32 %v4329_v25, %v3986_v62  ;;  %v1352_v61 = vmul.f32 %v4327_v19, %v3990_v5  ;;  %v1350_v47 = vmul.f32 %v4347_v31, %v4000_v22  ;;  %v1349_v55 = vmul.f32 %v4329_v25, %v4006_v1 }
 0xba6   :  { %v1397_v8 = vpack.c.bf16 %v4365_v51, %v4347_v31  ;;  %v1346_v54 = vadd.f32 %v1345_v40, %v1246_v2  ;;  %v1363_v43 = vmul.f32 %v4365_v51, %v3959_v29  ;;  %v1359_v33 = vmul.f32 %v4365_v51, %v3967_v34  ;;  %v3594_v34 = vld [vmem:[%s4908_s2 + $0x78] sm:$0xff]  ;;  %v3601_v31 = vld [vmem:[%s4907_s1 + $0x10] sm:$0xff] }
 0xba7   :  { %v1355_v13 = vmul.f32 %v4365_v51, %v3975_v57  ;;  %v4395_v2 = vpack.c.bf16 %v1373_v56, %v1372_v48  ;;  %v3596_v57 = vld [vmem:[%s4908_s2 + $0x30] sm:$0xff]  ;;  %v1366_v39 = vpack.c.bf16 %v1353_v41, %v1352_v61  ;;  %v1348_v62 = vmul.f32 %v4327_v19, %v4030_v17 }
 0xba8   :  { %v1371_v14 = vpack.c.bf16 %v1363_v43, %v1362_v11  ;;  %v1369_v29 = vpack.c.bf16 %v1359_v33, %v1358_v9  ;;  %v1387_v16 = vmul.f32 %v3594_v34, %v1346_v54  ;;  %v1383_v27 = vmul.f32 %v3595_v21, %v1346_v54 }
 0xba9   :  { %v1378_v20 = vmul.f32 %v3596_v57, %v1342_v6  ;;  %v1379_v60 = vmul.f32 %v3597_v28, %v1346_v54  ;;  %v1375_v30 = vmul.f32 %v3599_v49, %v1346_v54  ;;  %v1367_v3 = vpack.c.bf16 %v1355_v13, %v1354_v46 }
 0xbaa   :  { %1420 = vrot.lane.b32.xlu0 %v1371_v14, %s3627_s21  ;;  %1416 = vrot.lane.b32.xlu1 %v1369_v29, %s3627_s21  ;;  %v4417_v44 = vpack.c.bf16 %v1387_v16, %v1386_v36  ;;  %v4421_v53 = vpack.c.bf16 %v1383_v27, %v1382_v26  ;;  %v1351_v6 = vmul.f32 %v4365_v51, %v3992_v7  ;;  %v3600_v29 = vld [vmem:[%s4907_s1] sm:$0xff] }
 0xbab   :  { %v4423_v52 = vpack.c.bf16 %v1379_v60, %v1378_v20  ;;  %v4425_v63 = vpack.c.bf16 %v1375_v30, %v1374_v37  ;;  %v1364_v7 = vpack.c.bf16 %v1349_v55, %v1348_v62  ;;  %v3603_v20 = vld [vmem:[%s4907_s1 + $0x18] sm:$0xff] }
 0xbac   :  { %3230 = vmatprep.subr.bf16.mxu1 %v4417_v44  ;;  %v1365_v48 = vpack.c.bf16 %v1351_v6, %v1350_v47 }
 0xbae   :  { %1414 = vrot.lane.b32.xlu1 %v1368_v10, %s3627_s21  ;;  %1412 = vrot.lane.b32.xlu0 %v1367_v3, %s3627_s21 }
 0xbb2   :  { %1410 = vrot.lane.b32.xlu1 %v1366_v39, %s3627_s21  ;;  %1408 = vrot.lane.b32.xlu0 %v1365_v48, %s3627_s21 }
 0xbb6   :  { %1406 = vrot.lane.b32.xlu1 %v1364_v7, %s3627_s21 }
 0xc14   :  { %v1419_v22 = vpop.permute.xlu1 %1418 }
 0xc15   :  { %v1447_v1 = vsel %vm147_vm0, %v1419_v22, 0 }
 0xc1c   :  { %v1421_v40 = vpop.permute.xlu0 %1420  ;;  %v1417_v25 = vpop.permute.xlu1 %1416 }
 0xc1d   :  { %v1450_v5 = vsel %vm147_vm0, %v1421_v40, 0  ;;  %3302 = vmatprep.subr.msk.bf16.mxu0 %vm147_vm0, %v1421_v40  ;;  %v1444_v17 = vsel %vm147_vm0, %v1417_v25, 0 }
 0xc1e   :  { %3191 = vmatpush3.bf16.xpose.msra.mxu0 %v1450_v5 }
 0xc1f   :  { %3303 = vmatprep.subr.msk.bf16.mxu0 %vm147_vm0, %v1419_v22 }
 0xc20   :  { %v1415_v19 = vpop.permute.xlu1 %1414  ;;  %v1413_v9 = vpop.permute.xlu0 %1412 }
 0xc21   :  { %v1441_v11 = vsel %vm147_vm0, %v1415_v19, 0  ;;  %v1438_v42 = vsel %vm147_vm0, %v1413_v9, 0 }
 0xc24   :  { %v1411_v32 = vpop.permute.xlu1 %1410  ;;  %v1409_v54 = vpop.permute.xlu0 %1408 }
 0xc25   :  { %v1435_v56 = vsel %vm147_vm0, %v1411_v32, 0  ;;  %v1432_v43 = vsel %vm147_vm0, %v1409_v54, 0 }
 0xc26   :  { %3193 = vmatpush3.bf16.xpose.msra.mxu0 %v1447_v1 }
 0xc27   :  { %3304 = vmatprep.subr.msk.bf16.mxu0 %vm147_vm0, %v1417_v25 }
 0xc28   :  { %v1407_v33 = vpop.permute.xlu1 %1406 }
 0xc29   :  { %v1429_v35 = vsel %vm147_vm0, %v1407_v33, 0 }
 0xc2e   :  { %3195 = vmatpush3.bf16.xpose.msra.mxu0 %v1444_v17 }
 0xc2f   :  { %3305 = vmatprep.subr.msk.bf16.mxu0 %vm147_vm0, %v1415_v19 }
 0xc36   :  { %3197 = vmatpush3.bf16.xpose.msra.mxu0 %v1441_v11 }
 0xc37   :  { %3306 = vmatprep.subr.msk.bf16.mxu0 %vm147_vm0, %v1413_v9 }
 0xc3e   :  { %3199 = vmatpush3.bf16.xpose.msra.mxu0 %v1438_v42  ;;  %v3374_v42 = vld [vmem:[%s4916_s10 + $0x8] sm:$0xff]  }
 0xc3f   :  { %3307 = vmatprep.subr.msk.bf16.mxu0 %vm147_vm0, %v1411_v32  ;;  %v3375_v32 = vld [vmem:[%s4916_s10] sm:$0xff]  }
 0xc46   :  { %3201 = vmatpush3.bf16.xpose.msra.mxu0 %v1435_v56 }
 0xc47   :  { %3308 = vmatprep.subr.msk.bf16.mxu0 %vm147_vm0, %v1409_v54 }
 0xc4e   :  { %3203 = vmatpush3.bf16.xpose.msra.mxu0 %v1432_v43 }
 0xc4f   :  { %3309 = vmatprep.subr.msk.bf16.mxu0 %vm147_vm0, %v1407_v33 }
 0xc56   :  { %3205 = vmatpush3.bf16.xpose.msra.mxu0 %v1429_v35 }
 0xc5d   :  { %3207 = vmatmul.mubr.msk.bf16.vlgmr.msra.gmra.mxu0 %vm147_vm0, %v1397_v8  ;;  %v3602_v8 = vld [vmem:[%s4907_s1 + $0x8] sm:$0xff] }
 0xd1d   :  { %v3208_v36 = vpop.f32.mrf.mxu0 }
 0xd1e   :  { %v1503_v14 = vmul.f32 0.25, %v3208_v36 }
 0xd1f   :  { %v1486_v13 = vpop.f32.mrf.mxu0 }
 0xd20   :  { %v1501_v24 = vmul.f32 0.25, %v1486_v13  ;;  %v1507_v51 = vadd.f32 %v3601_v31, %v1503_v14  ;;  %v1128_v13 = vld [vmem:[%s4910_s4 + $0x15] ss:$0 sm:$0xff]  ;;  %v1129_v14 = vld [vmem:[%s4910_s4 + $0x16] ss:$0 sm:$0xff] }
 0xd21   :  { %v3209_v26 = vpop.f32.mrf.mxu0 }
 0xd22   :  { %v1505_v34 = vadd.f32 %v3600_v29, %v1501_v24  ;;  %v1504_v27 = vmul.f32 0.25, %v3209_v26 }
 0xd23   :  { %v1489_v16 = vpop.f32.mrf.mxu0 }
 0xd24   :  { %v1502_v21 = vmul.f32 0.25, %v1489_v16  ;;  %1509 = vmax.xlane.f32.xlu0 %v1505_v34  ;;  %v1508_v28 = vadd.f32 %v3603_v20, %v1504_v27 }
 0xd26   :  { %v1506_v57 = vadd.f32 %v3602_v8, %v1502_v21 }
 0xd28   :  { %1513 = vmax.xlane.f32.xlu0 %v1507_v51  ;;  %1511 = vmax.xlane.f32.xlu1 %v1506_v57 }
 0xd2c   :  { %1515 = vmax.xlane.f32.xlu0 %v1508_v28 }
 0xdad   :  { %v1510_v60 = vpop.xlane.xlu0 %1509 }
 0xdae   :  { %v1517_v38 = vsub.f32 %v1505_v34, %v1510_v60 }
 0xdb0   :  { %v1521_v30 = vmul.f32 1.442695, %v1517_v38 }
 0xdb1   :  { %v1514_v37 = vpop.xlane.xlu0 %1513  ;;  %v1512_v49 = vpop.xlane.xlu1 %1511 }
 0xdb2   :  { %v1519_v46 = vsub.f32 %v1507_v51, %v1514_v37  ;;  %v1518_v10 = vsub.f32 %v1506_v57, %v1512_v49  ;;  %3484 = vpow2.f32 %v1521_v30 }
 0xdb4   :  { %v1523_v3 = vmul.f32 1.442695, %v1518_v10  ;;  %v1525_v41 = vmul.f32 1.442695, %v1519_v46 }
 0xdb5   :  { %v1516_v6 = vpop.xlane.xlu0 %1515 }
 0xdb6   :  { %v1520_v61 = vsub.f32 %v1508_v28, %v1516_v6  ;;  %3486 = vpow2.f32 %v1523_v3 }
 0xdb7   :  { %3488 = vpow2.f32 %v1525_v41 }
 0xdb8   :  { %v1527_v47 = vmul.f32 1.442695, %v1520_v61 }
 0xdba   :  { %3490 = vpow2.f32 %v1527_v47 }
 0xdbf   :  { %v3485_v39 = vpop.eup %3484 }
 0xdc3   :  { %v3487_v48 = vpop.eup %3486 }
 0xdc4   :  { %v1529_v55 = vpack.c.bf16 %v3487_v48, %v3485_v39  ;;  %v3489_v62 = vpop.eup %3488 }
 0xdc6   :  { %3226 = vmatprep.mubr.bf16.mxu1 %v1529_v55 }
 0xdc7   :  { %v3491_v7 = vpop.eup %3490 }
 0xdc8   :  { %v1530_v40 = vpack.c.bf16 %v3491_v7, %v3489_v62 }
 0xdca   :  { %3227 = vmatmul.mubr.bf16.vlgmr.msra.gmra.mxu1 %v1530_v40 }
 0xdcb   :  { %3231 = vmatpush3.bf16.msra.mxu1 %v4417_v44 }
 0xdcc   :  { %3232 = vmatprep.subr.bf16.mxu1 %v4359_v15 }
 0xdcf   :  { %3233 = vmatpush3.bf16.msra.mxu1 %v4359_v15  ;;  %v3372_v15 = vld [vmem:[%s4916_s10 + $0x18] sm:$0xff]  }
 0xdd0   :  { %3234 = vmatprep.subr.bf16.mxu1 %v4421_v53  ;;  %3250 = vmatprep.subr.bf16.mxu0 %v3372_v15 }
 0xdd1   :  { %3251 = vmatpush3.bf16.msra.mxu0 %v3372_v15 }
 0xdd3   :  { %3235 = vmatpush3.bf16.msra.mxu1 %v4421_v53 }
 0xdd4   :  { %3236 = vmatprep.subr.bf16.mxu1 %v4361_v12 }
 0xdd7   :  { %3237 = vmatpush3.bf16.msra.mxu1 %v4361_v12  ;;  %v3373_v12 = vld [vmem:[%s4916_s10 + $0x10] sm:$0xff]  }
 0xdd8   :  { %3238 = vmatprep.subr.bf16.mxu1 %v4423_v52  ;;  %3252 = vmatprep.subr.bf16.mxu0 %v3373_v12 }
 0xdd9   :  { %3253 = vmatpush3.bf16.msra.mxu0 %v3373_v12 }
 0xdda   :  { %3254 = vmatprep.subr.bf16.mxu0 %v3374_v42 }
 0xddb   :  { %3239 = vmatpush3.bf16.msra.mxu1 %v4423_v52 }
 0xddc   :  { %3240 = vmatprep.subr.bf16.mxu1 %v4363_v23 }
 0xddd   :  { %3255 = vmatpush3.bf16.msra.mxu0 %v3374_v42 }
 0xdde   :  { %3256 = vmatprep.subr.bf16.mxu0 %v3375_v32 }
 0xddf   :  { %3241 = vmatpush3.bf16.msra.mxu1 %v4363_v23 }
 0xde0   :  { %3242 = vmatprep.subr.bf16.mxu1 %v4425_v63 }
 0xde1   :  { %3257 = vmatpush3.bf16.msra.mxu0 %v3375_v32 }
 0xde3   :  { %3243 = vmatpush3.bf16.msra.mxu1 %v4425_v63 }
 0xde4   :  { %3244 = vmatprep.subr.bf16.mxu1 %v4395_v2 }
 0xde7   :  { %3245 = vmatpush3.bf16.msra.mxu1 %v4395_v2 }
 0xe8a   :  { %v3228_v23 = vpop.f32.mrf.mxu1 }
 0xe8c   :  { %v1565_v44 = vpop.f32.mrf.mxu1 }
 0xe8d   :  { %3492 = vrcp.f32 %v1565_v44 }
 0xe8e   :  { %v3229_v53 = vpop.f32.mrf.mxu1 }
 0xe8f   :  { %3494 = vrcp.f32 %v3229_v53 }
 0xe90   :  { %3496 = vrcp.f32 %v3228_v23  ;;  %v1568_v52 = vpop.f32.mrf.mxu1 }
 0xe91   :  { %3498 = vrcp.f32 %v1568_v52  ;;  %v3378_v52 = vld [vmem:[%s4917_s11 + $0x34] ss:$8 sps:$4 sm:$0xff]  }
 0xe92   :  { %1855 = vmatprep.subr.bf16.mxu1 %v3378_v52 }
 0xe9a   :  { %v3493_v2 = vpop.eup %3492 }
 0xe9b   :  { %v1584_v25 = vmul.f32 %v3493_v2, %v3485_v39  ;;  %v3376_v2 = vld [vmem:[%s4917_s11 + $0x30] ss:$8 sps:$4 sm:$0xff]  }
 0xe9c   :  { %v3495_v63 = vpop.eup %3494 }
 0xe9d   :  { %v3497_v5 = vpop.eup %3496  ;;  %v1587_v1 = vmul.f32 %v3495_v63, %v3491_v7  ;;  %v3381_v63 = vld [vmem:[%s4917_s11 + $0x24] ss:$8 sps:$4 sm:$0xff]  }
 0xe9e   :  { %v3499_v22 = vpop.eup %3498  ;;  %v1586_v19 = vmul.f32 %v3497_v5, %v3489_v62  ;;  %v3379_v5 = vld [vmem:[%s4917_s11 + $0x20] ss:$8 sps:$4 sm:$0xff]  }
 0xe9f   :  { %v1585_v17 = vmul.f32 %v3499_v22, %v3487_v48  ;;  %v3384_v22 = vld [vmem:[%s4917_s11 + $0x14] ss:$8 sps:$4 sm:$0xff]  }
 0xea0   :  { %v1589_v9 = vpack.c.bf16 %v1587_v1, %v1586_v19  ;;  %v3382_v1 = vld [vmem:[%s4917_s11 + $0x10] ss:$8 sps:$4 sm:$0xff]  }
 0xea1   :  { %v1588_v11 = vpack.c.bf16 %v1585_v17, %v1584_v25  ;;  %v3387_v25 = vld [vmem:[%s4917_s11 + $0x4] ss:$8 sps:$4 sm:$0xff]   ;;  %v3385_v17 = vld [vmem:[%s4917_s11] ss:$8 sps:$4 sm:$0xff]  }
 0xea3   :  { %3246 = vmatprep.mubr.bf16.mxu1 %v1588_v11 }
 0xea4   :  { %3247 = vmatmul.mubr.bf16.vlgmr.msra.gmra.mxu1 %v1589_v9 }
 0xea5   :  { %1879 = vmatprep.mubr.bf16.mxu1 %v4928_v50  ;;  %1856 = vmatpush1.bf16.msra.mxu1 %v3376_v2 }
 0xea6   :  { %1857 = vmatprep.subr.bf16.mxu1 %v3381_v63 }
 0xea9   :  { %1858 = vmatpush1.bf16.msra.mxu1 %v3379_v5 }
 0xeaa   :  { %1859 = vmatprep.subr.bf16.mxu1 %v3384_v22 }
 0xead   :  { %1860 = vmatpush1.bf16.msra.mxu1 %v3382_v1 }
 0xeae   :  { %1861 = vmatprep.subr.bf16.mxu1 %v3387_v25 }
 0xeb1   :  { %1862 = vmatpush1.bf16.msra.mxu1 %v3385_v17 }
 0xf64   :  { %v3248_v56 = vpop.f32.mrf.mxu1 }
 0xf66   :  { %v1624_v54 = vpop.f32.mrf.mxu1 }
 0xf68   :  { %v3249_v43 = vpop.f32.mrf.mxu1 }
 0xf69   :  { %v1640_v36 = vpack.c.bf16 %v3249_v43, %v3248_v56 }
 0xf6a   :  { %v1627_v33 = vpop.f32.mrf.mxu1 }
 0xf6b   :  { %v1639_v35 = vpack.c.bf16 %v1627_v33, %v1624_v54 }
 0xf6d   :  { %3258 = vmatprep.mubr.msk.bf16.mxu0 %vm147_vm0, %v1639_v35 }
 0xf6e   :  { %3259 = vmatmul.mubr.msk.bf16.vlgmr.msra.gmra.mxu0 %vm147_vm0, %v1640_v36 }
0x102e   :  { %v3260_v24 = vpop.f32.mrf.mxu0 }
0x102f   :  { %v1714_v26 = vadd.f32 %v3260_v24, %v1128_v13 }
0x1030   :  { %v1705_v29 = vpop.f32.mrf.mxu0 }
0x1031   :  { %v1706_v34 = vadd.f32 %v1705_v29, %v1128_v13  ;;  %v1722_v21 = vmul.f32 %v1714_v26, %v1129_v14 }
0x1032   :  { %v3261_v16 = vpop.f32.mrf.mxu0 }
0x1033   :  { %v1720_v27 = vmul.f32 %v1706_v34, %v1129_v14  ;;  %v1717_v31 = vadd.f32 %v3261_v16, %v1128_v13  ;;  %v4517_v20 = vadd.f32 %v1722_v21, %v4265_v4 }
0x1034   :  { %v1708_v51 = vpop.f32.mrf.mxu0 }
0x1035   :  { %v4514_v8 = vadd.f32 %v1720_v27, %v4262_v0  ;;  %v1709_v57 = vadd.f32 %v1708_v51, %v1128_v13  ;;  %v1723_v28 = vmul.f32 %v1717_v31, %v1129_v14  ;;  %v1734_v30 = vsel %vm147_vm0, %v4517_v20, 0.0  ;;  %v1131_v27 = vld [vmem:[%s4910_s4 + $0x20] ss:$0 sm:$0xff] }
0x1037   :  { %v1721_v60 = vmul.f32 %v1709_v57, %v1129_v14  ;;  %v1728_v38 = vsel %vm147_vm0, %v4514_v8, 0.0  ;;  %v4525_v49 = vadd.f32 %v1723_v28, %v4273_v18  ;;  %v1130_v14 = vld [vmem:[%s4910_s4 + $0x17] ss:$0 sm:$0xff] }
0x1038   :  { %1729 = vadd.xlane.f32.xlu0 %v1728_v38 }
0x1039   :  { %v4522_v37 = vadd.f32 %v1721_v60, %v4270_v45  ;;  %v1737_v4 = vsel %vm147_vm0, %v4525_v49, 0.0 }
0x103b   :  { %v1731_v0 = vsel %vm147_vm0, %v4522_v37, 0.0 }
0x103c   :  { %1732 = vadd.xlane.f32.xlu1 %v1731_v0  ;;  %1735 = vadd.xlane.f32.xlu0 %v1734_v30 }
0x1040   :  { %1738 = vadd.xlane.f32.xlu1 %v1737_v4 }
0x10c1   :  { %v1730_v46 = vpop.xlane.xlu0 %1729 }
0x10c2   :  { %v1740_v10 = vmul.f32 0.015625, %v1730_v46 }
0x10c4   :  { %v1744_v45 = vsub.f32 %v4514_v8, %v1740_v10 }
0x10c5   :  { %v1733_v3 = vpop.xlane.xlu1 %1732  ;;  %v1736_v41 = vpop.xlane.xlu0 %1735 }
0x10c6   :  { %v1741_v18 = vmul.f32 0.015625, %v1733_v3  ;;  %v1742_v6 = vmul.f32 0.015625, %v1736_v41  ;;  %v1748_v61 = vmul.f32 %v1744_v45, %v1744_v45  ;;  %v3388_v3 = vld [vmem:[%s4918_s12 + $0x38] sm:$0xff]   ;;  %v3389_v41 = vld [vmem:[%s4918_s12 + $0x30] sm:$0xff]  }
0x10c7   :  { %3262 = vmatprep.subr.bf16.mxu0 %v3388_v3 }
0x10c8   :  { %v1745_v47 = vsub.f32 %v4522_v37, %v1741_v18  ;;  %v1746_v39 = vsub.f32 %v4517_v20, %v1742_v6  ;;  %v1752_v48 = vsel %vm147_vm0, %v1748_v61, 0.0  ;;  %3263 = vmatpush3.bf16.msra.mxu0 %v3388_v3  ;;  %v3390_v18 = vld [vmem:[%s4918_s12 + $0x28] sm:$0xff]   ;;  %v3391_v6 = vld [vmem:[%s4918_s12 + $0x20] sm:$0xff]   ;;  %v3392_v61 = vld [vmem:[%s4918_s12 + $0x18] sm:$0xff]  }
0x10c9   :  { %v1739_v55 = vpop.xlane.xlu1 %1738  ;;  %1753 = vadd.xlane.f32.xlu0 %v1752_v48  ;;  %3264 = vmatprep.subr.bf16.mxu0 %v3389_v41  ;;  %v3395_v48 = vld [vmem:[%s4918_s12] sm:$0xff]  }
0x10ca   :  { %v1743_v62 = vmul.f32 0.015625, %v1739_v55  ;;  %v1749_v7 = vmul.f32 %v1745_v47, %v1745_v47  ;;  %v1750_v40 = vmul.f32 %v1746_v39, %v1746_v39  ;;  %v2898_v55 = vld [vmem:[%s4910_s4 + $0x21] ss:$8 sm:$0x3] }
0x10cc   :  { %v1747_v15 = vsub.f32 %v4525_v49, %v1743_v62  ;;  %v1755_v12 = vsel %vm147_vm0, %v1749_v7, 0.0  ;;  %v1758_v23 = vsel %vm147_vm0, %v1750_v40, 0.0  ;;  %3265 = vmatpush3.bf16.msra.mxu0 %v3389_v41  ;;  %v1798_v62 = vrot.slane %v2898_v55, %v3979_v59 }
0x10cd   :  { %1756 = vadd.xlane.f32.xlu1 %v1755_v12  ;;  %1759 = vadd.xlane.f32.xlu0 %v1758_v23 }
0x10ce   :  { %v1751_v44 = vmul.f32 %v1747_v15, %v1747_v15  ;;  %3266 = vmatprep.subr.bf16.mxu0 %v3390_v18 }
0x10d0   :  { %v1761_v53 = vsel %vm147_vm0, %v1751_v44, 0.0  ;;  %3267 = vmatpush3.bf16.msra.mxu0 %v3390_v18 }
0x10d1   :  { %1762 = vadd.xlane.f32.xlu1 %v1761_v53  ;;  %3268 = vmatprep.subr.bf16.mxu0 %v3391_v6 }
0x10d4   :  { %3269 = vmatpush3.bf16.msra.mxu0 %v3391_v6 }
0x10d5   :  { %3270 = vmatprep.subr.bf16.mxu0 %v3392_v61 }
0x10d8   :  { %3271 = vmatpush3.bf16.msra.mxu0 %v3392_v61 }
0x1152   :  { %v1754_v19 = vpop.xlane.xlu0 %1753 }
0x1153   :  { %v1764_v11 = vmul.f32 0.015625, %v1754_v19 }
0x1155   :  { %v1768_v9 = vadd.f32 1e-05, %v1764_v11 }
0x1156   :  { %v1757_v42 = vpop.xlane.xlu1 %1756  ;;  %v1760_v32 = vpop.xlane.xlu0 %1759 }
0x1157   :  { %3500 = vrsqrt.f32 %v1768_v9  ;;  %v1765_v56 = vmul.f32 0.015625, %v1757_v42  ;;  %v1766_v54 = vmul.f32 0.015625, %v1760_v32 }
0x1159   :  { %v1769_v43 = vadd.f32 1e-05, %v1765_v56  ;;  %v1770_v33 = vadd.f32 1e-05, %v1766_v54 }
0x115a   :  { %v1763_v35 = vpop.xlane.xlu1 %1762 }
0x115b   :  { %3502 = vrsqrt.f32 %v1769_v43  ;;  %v1767_v36 = vmul.f32 0.015625, %v1763_v35 }
0x115c   :  { %3504 = vrsqrt.f32 %v1770_v33 }
0x115d   :  { %v1771_v13 = vadd.f32 1e-05, %v1767_v36  ;;  %v1794_v36 = vrot.slane %v2898_v55, %v3977_v58 }
0x115f   :  { %3506 = vrsqrt.f32 %v1771_v13 }
0x1164   :  { %v3501_v24 = vpop.eup %3500 }
0x1165   :  { %v1776_v26 = vmul.f32 %v3501_v24, %v1744_v45 }
0x1167   :  { %v1780_v16 = vmul.f32 %v1776_v26, %v1130_v14 }
0x1168   :  { %v3503_v29 = vpop.eup %3502 }
0x1169   :  { %v1777_v34 = vmul.f32 %v3503_v29, %v1745_v47  ;;  %v3505_v21 = vpop.eup %3504  ;;  %v1784_v57 = vadd.f32 %v1780_v16, %v1131_v27  ;;  %v3393_v47 = vld [vmem:[%s4918_s12 + $0x10] sm:$0xff]  }
0x116a   :  { %v1778_v60 = vmul.f32 %v3505_v21, %v1746_v39  ;;  %3272 = vmatprep.subr.bf16.mxu0 %v3393_v47  ;;  %v3394_v39 = vld [vmem:[%s4918_s12 + $0x8] sm:$0xff]  }
0x116b   :  { %v1781_v31 = vmul.f32 %v1777_v34, %v1130_v14  ;;  %3273 = vmatpush3.bf16.msra.mxu0 %v3393_v47 }
0x116c   :  { %v3507_v51 = vpop.eup %3506  ;;  %v1782_v4 = vmul.f32 %v1778_v60, %v1130_v14  ;;  %3274 = vmatprep.subr.bf16.mxu0 %v3394_v39 }
0x116d   :  { %v1785_v28 = vadd.f32 %v1781_v31, %v1131_v27  ;;  %v1779_v38 = vmul.f32 %v3507_v51, %v1747_v15 }
0x116e   :  { %v1786_v10 = vadd.f32 %v1782_v4, %v1131_v27  ;;  %v1134_v4 = vld [vmem:[%s4910_s4 + $0x22] ss:$0 sm:$0xff] }
0x116f   :  { %v1788_v0 = vpack.c.bf16 %v1785_v28, %v1784_v57  ;;  %v1783_v30 = vmul.f32 %v1779_v38, %v1130_v14  ;;  %3275 = vmatpush3.bf16.msra.mxu0 %v3394_v39 }
0x1170   :  { %3276 = vmatprep.subr.bf16.mxu0 %v3395_v48 }
0x1171   :  { %2925 = vmatmul.mubr.msk.bf16.vlgmr.msra.gmra.mxu1 %vm147_vm0, %v1788_v0  ;;  %v1787_v46 = vadd.f32 %v1783_v30, %v1131_v27 }
0x1172   :  { %1889 = vmatprep.mubr.bf16.mxu1 %v4928_v50 }
0x1173   :  { %v1789_v45 = vpack.c.bf16 %v1787_v46, %v1786_v10  ;;  %3277 = vmatpush3.bf16.msra.mxu0 %v3395_v48 }
0x1179   :  { %2926 = vmatmul.mubr.msk.bf16.gmra.mxu1 %vm147_vm0, %v1789_v45  ;;  %v1135_v45 = vld [vmem:[%s4910_s4 + $0x23] ss:$0 sm:$0xff] }
0x117a   :  { %2248 = vmatprep.mubr.bf16.mxu1 %v4928_v50 }
0x1231   :  { %v1881_v7 = vpop.f32.mrf.mxu1 }
0x1232   :  { %v1882_v26 = vadd.f32 %v1881_v7, %v1794_v36 }
0x1233   :  { %v1883_v40 = vpop.f32.mrf.mxu1 }
0x1234   :  { %v1884_v15 = vadd.f32 %v1883_v40, %v1798_v62 }
0x1235   :  { %v1885_v12 = vpop.f32.mrf.mxu1 }
0x1236   :  { %v2927_v23 = vmul.f32 -1.442695, %v1884_v15  ;;  %v1886_v14 = vadd.f32 %v1885_v12, %v1794_v36 }
0x1237   :  { %v1887_v44 = vpop.f32.mrf.mxu1 }
0x1238   :  { %3508 = vpow2.f32 %v2927_v23  ;;  %v1888_v53 = vadd.f32 %v1887_v44, %v1798_v62 }
0x1239   :  { %v1891_v52 = vpop.f32.mrf.mxu1 }
0x123a   :  { %v2928_v2 = vmul.f32 -1.442695, %v1888_v53  ;;  %v1892_v57 = vadd.f32 %v1891_v52, %v1794_v36 }
0x123b   :  { %v1893_v63 = vpop.f32.mrf.mxu1 }
0x123c   :  { %3510 = vpow2.f32 %v2928_v2  ;;  %v1894_v5 = vadd.f32 %v1893_v63, %v1798_v62 }
0x123d   :  { %v1895_v22 = vpop.f32.mrf.mxu1 }
0x123e   :  { %v2929_v1 = vmul.f32 -1.442695, %v1894_v5  ;;  %v1896_v28 = vadd.f32 %v1895_v22, %v1794_v36  ;;  %v3396_v36 = vld [vmem:[%s4919_s13 + $0x30] ss:$8 sps:$4 sm:$0xff]  }
0x123f   :  { %v1897_v25 = vpop.f32.mrf.mxu1 }
0x1240   :  { %3512 = vpow2.f32 %v2929_v1  ;;  %v1898_v17 = vadd.f32 %v1897_v25, %v1798_v62 }
0x1242   :  { %v2930_v19 = vmul.f32 -1.442695, %v1898_v17 }
0x1244   :  { %3514 = vpow2.f32 %v2930_v19 }
0x1245   :  { %v3509_v11 = vpop.eup %3508 }
0x1246   :  { %v1912_v9 = vadd.f32 1.0, %v3509_v11 }
0x1248   :  { %3516 = vrcp.f32 %v1912_v9 }
0x1249   :  { %v3511_v42 = vpop.eup %3510 }
0x124a   :  { %v1913_v32 = vadd.f32 1.0, %v3511_v42 }
0x124c   :  { %3518 = vrcp.f32 %v1913_v32 }
0x124d   :  { %v3513_v56 = vpop.eup %3512 }
0x124e   :  { %v1914_v54 = vadd.f32 1.0, %v3513_v56 }
0x1250   :  { %3520 = vrcp.f32 %v1914_v54 }
0x1251   :  { %v3515_v43 = vpop.eup %3514 }
0x1252   :  { %v1915_v33 = vadd.f32 1.0, %v3515_v43 }
0x1254   :  { %3522 = vrcp.f32 %v1915_v33 }
0x1255   :  { %v3517_v35 = vpop.eup %3516 }
0x1256   :  { %v1924_v13 = vmul.f32 %v3517_v35, %v1884_v15  ;;  %v3398_v35 = vld [vmem:[%s4919_s13 + $0x34] ss:$8 sps:$4 sm:$0xff]  }
0x1257   :  { %2224 = vmatprep.subr.bf16.mxu1 %v3398_v35 }
0x1258   :  { %v1928_v34 = vmul.f32 %v1924_v13, %v1882_v26  ;;  %2225 = vmatpush1.bf16.msra.mxu1 %v3396_v36  ;;  %v3401_v13 = vld [vmem:[%s4919_s13 + $0x24] ss:$8 sps:$4 sm:$0xff]   ;;  %v3402_v26 = vld [vmem:[%s4919_s13 + $0x10] ss:$8 sps:$4 sm:$0xff]  }
0x1259   :  { %v3519_v24 = vpop.eup %3518  ;;  %2226 = vmatprep.subr.bf16.mxu1 %v3401_v13 }
0x125a   :  { %v1925_v29 = vmul.f32 %v3519_v24, %v1888_v53  ;;  %v3399_v24 = vld [vmem:[%s4919_s13 + $0x20] ss:$8 sps:$4 sm:$0xff]  }
0x125c   :  { %v1929_v16 = vmul.f32 %v1925_v29, %v1886_v14  ;;  %2227 = vmatpush1.bf16.msra.mxu1 %v3399_v24  ;;  %v3404_v14 = vld [vmem:[%s4919_s13 + $0x14] ss:$8 sps:$4 sm:$0xff]   ;;  %v3407_v29 = vld [vmem:[%s4919_s13 + $0x4] ss:$8 sps:$4 sm:$0xff]  }
0x125d   :  { %v3521_v21 = vpop.eup %3520  ;;  %2228 = vmatprep.subr.bf16.mxu1 %v3404_v14 }
0x125e   :  { %v1932_v27 = vpack.c.bf16 %v1929_v16, %v1928_v34  ;;  %v1926_v31 = vmul.f32 %v3521_v21, %v1894_v5  ;;  %v3405_v34 = vld [vmem:[%s4919_s13] ss:$8 sps:$4 sm:$0xff]  }
0x1260   :  { %3278 = vmatprep.mubr.bf16.mxu0 %v1932_v27  ;;  %v1930_v38 = vmul.f32 %v1926_v31, %v1892_v57  ;;  %2229 = vmatpush1.bf16.msra.mxu1 %v3402_v26 }
0x1261   :  { %v3523_v51 = vpop.eup %3522  ;;  %2230 = vmatprep.subr.bf16.mxu1 %v3407_v29 }
0x1262   :  { %v1927_v60 = vmul.f32 %v3523_v51, %v1898_v17 }
0x1264   :  { %v1931_v0 = vmul.f32 %v1927_v60, %v1896_v28  ;;  %2231 = vmatpush1.bf16.msra.mxu1 %v3405_v34 }
0x1266   :  { %v1933_v30 = vpack.c.bf16 %v1931_v0, %v1930_v38 }
0x1268   :  { %3279 = vmatmul.mubr.bf16.vlgmr.msra.gmra.mxu0 %v1933_v30 }
0x1328   :  { %v3280_v46 = vpop.f32.mrf.mxu0 }
0x1329   :  { %v2025_v10 = vadd.f32 %v3280_v46, %v1134_v4 }
0x132a   :  { %v2016_v3 = vpop.f32.mrf.mxu0 }
0x132b   :  { %v2017_v41 = vadd.f32 %v2016_v3, %v1134_v4  ;;  %v2033_v6 = vmul.f32 %v2025_v10, %v1135_v45 }
0x132c   :  { %v3281_v18 = vpop.f32.mrf.mxu0 }
0x132d   :  { %v2031_v61 = vmul.f32 %v2017_v41, %v1135_v45  ;;  %v2028_v47 = vadd.f32 %v3281_v18, %v1134_v4  ;;  %v2037_v15 = vadd.f32 %v2033_v6, %v4517_v20 }
0x132e   :  { %v2019_v39 = vpop.f32.mrf.mxu0 }
0x132f   :  { %v2020_v48 = vadd.f32 %v2019_v39, %v1134_v4  ;;  %v2035_v55 = vadd.f32 %v2031_v61, %v4514_v8  ;;  %v2034_v62 = vmul.f32 %v2028_v47, %v1135_v45  ;;  %v2103_v44 = vsel %vm147_vm0, %v2037_v15, 0.0  ;;  %v2040_v61 = vld [vmem:[%s4910_s4 + $0x25] ss:$0 sm:$0xff] }
0x1331   :  { %v2032_v7 = vmul.f32 %v2020_v48, %v1135_v45  ;;  %v2097_v40 = vsel %vm147_vm0, %v2035_v55, 0.0  ;;  %v2038_v53 = vadd.f32 %v2034_v62, %v4525_v49  ;;  %v2039_v45 = vld [vmem:[%s4910_s4 + $0x24] ss:$0 sm:$0xff] }
0x1332   :  { %2098 = vadd.xlane.f32.xlu0 %v2097_v40 }
0x1333   :  { %v2036_v12 = vadd.f32 %v2032_v7, %v4522_v37  ;;  %v2106_v52 = vsel %vm147_vm0, %v2038_v53, 0.0 }
0x1335   :  { %v2100_v23 = vsel %vm147_vm0, %v2036_v12, 0.0 }
0x1336   :  { %2101 = vadd.xlane.f32.xlu1 %v2100_v23  ;;  %2104 = vadd.xlane.f32.xlu0 %v2103_v44 }
0x133a   :  { %2107 = vadd.xlane.f32.xlu1 %v2106_v52  ;;  %v3408_v52 = vld [vmem:[%s4920_s14 + $0x78] sm:$0xff]  }
0x133b   :  { %3064 = vmatprep.subr.bf16.mxu1 %v3408_v52 }
0x13bb   :  { %v2099_v8 = vpop.xlane.xlu0 %2098 }
0x13bc   :  { %v2109_v2 = vmul.f32 0.015625, %v2099_v8  ;;  %v3409_v8 = vld [vmem:[%s4920_s14 + $0x38] sm:$0xff]  }
0x13be   :  { %v2113_v63 = vsub.f32 %v2035_v55, %v2109_v2  ;;  %v3410_v2 = vld [vmem:[%s4920_s14 + $0x70] sm:$0xff]  }
0x13bf   :  { %v2102_v5 = vpop.xlane.xlu1 %2101  ;;  %v2105_v22 = vpop.xlane.xlu0 %2104 }
0x13c0   :  { %v2110_v20 = vmul.f32 0.015625, %v2102_v5  ;;  %v2111_v1 = vmul.f32 0.015625, %v2105_v22  ;;  %v2117_v25 = vmul.f32 %v2113_v63, %v2113_v63  ;;  %v3413_v5 = vld [vmem:[%s4920_s14 + $0x28] sm:$0xff]   ;;  %v3414_v22 = vld [vmem:[%s4920_s14 + $0x60] sm:$0xff]  }
0x13c2   :  { %v2114_v37 = vsub.f32 %v2036_v12, %v2110_v20  ;;  %v2115_v17 = vsub.f32 %v2037_v15, %v2111_v1  ;;  %v2121_v19 = vsel %vm147_vm0, %v2117_v25, 0.0  ;;  %v3415_v20 = vld [vmem:[%s4920_s14 + $0x20] sm:$0xff]   ;;  %v3416_v1 = vld [vmem:[%s4920_s14 + $0x58] sm:$0xff]  }
0x13c3   :  { %v2108_v11 = vpop.xlane.xlu1 %2107  ;;  %2122 = vadd.xlane.f32.xlu0 %v2121_v19  ;;  %v3417_v25 = vld [vmem:[%s4920_s14 + $0x18] sm:$0xff]   ;;  %v3420_v19 = vld [vmem:[%s4920_s14 + $0x48] sm:$0xff]  }
0x13c4   :  { %v2112_v49 = vmul.f32 0.015625, %v2108_v11  ;;  %v2118_v9 = vmul.f32 %v2114_v37, %v2114_v37  ;;  %v2119_v42 = vmul.f32 %v2115_v17, %v2115_v17  ;;  %v3421_v11 = vld [vmem:[%s4920_s14 + $0x8] sm:$0xff]  }
0x13c6   :  { %v2116_v32 = vsub.f32 %v2038_v53, %v2112_v49  ;;  %v2124_v56 = vsel %vm147_vm0, %v2118_v9, 0.0  ;;  %v2127_v54 = vsel %vm147_vm0, %v2119_v42, 0.0  ;;  %v3422_v49 = vld [vmem:[%s4920_s14 + $0x40] sm:$0xff]  }
0x13c7   :  { %2125 = vadd.xlane.f32.xlu1 %v2124_v56  ;;  %2128 = vadd.xlane.f32.xlu0 %v2127_v54  ;;  %v3423_v9 = vld [vmem:[%s4920_s14] sm:$0xff]  }
0x13c8   :  { %v2120_v43 = vmul.f32 %v2116_v32, %v2116_v32  ;;  %v2939_v42 = vld [vmem:[%s4910_s4 + $0x26] ss:$8 sm:$0x3] }
0x13c9   :  { %v2167_v56 = vrot.slane %v2939_v42, %v3979_v59 }
0x13ca   :  { %v2130_v33 = vsel %vm147_vm0, %v2120_v43, 0.0 }
0x13cb   :  { %2131 = vadd.xlane.f32.xlu1 %v2130_v33 }
0x144c   :  { %v2123_v16 = vpop.xlane.xlu0 %2122 }
0x144d   :  { %v2133_v21 = vmul.f32 0.015625, %v2123_v16 }
0x144f   :  { %v2137_v27 = vadd.f32 1e-05, %v2133_v21 }
0x1450   :  { %v2126_v31 = vpop.xlane.xlu1 %2125  ;;  %v2129_v51 = vpop.xlane.xlu0 %2128 }
0x1451   :  { %3524 = vrsqrt.f32 %v2137_v27  ;;  %v2134_v57 = vmul.f32 0.015625, %v2126_v31  ;;  %v2135_v28 = vmul.f32 0.015625, %v2129_v51 }
0x1453   :  { %v2138_v60 = vadd.f32 1e-05, %v2134_v57  ;;  %v2139_v38 = vadd.f32 1e-05, %v2135_v28 }
0x1454   :  { %v2132_v0 = vpop.xlane.xlu1 %2131 }
0x1455   :  { %3526 = vrsqrt.f32 %v2138_v60  ;;  %v2136_v30 = vmul.f32 0.015625, %v2132_v0 }
0x1456   :  { %3528 = vrsqrt.f32 %v2139_v38 }
0x1457   :  { %v2140_v4 = vadd.f32 1e-05, %v2136_v30 }
0x1459   :  { %3530 = vrsqrt.f32 %v2140_v4 }
0x145e   :  { %v3525_v46 = vpop.eup %3524 }
0x145f   :  { %v2145_v10 = vmul.f32 %v3525_v46, %v2113_v63  ;;  %v3412_v63 = vld [vmem:[%s4920_s14 + $0x68] sm:$0xff]  }
0x1461   :  { %v2149_v41 = vmul.f32 %v2145_v10, %v2039_v45 }
0x1462   :  { %v3527_v3 = vpop.eup %3526 }
0x1463   :  { %v2146_v18 = vmul.f32 %v3527_v3, %v2114_v37  ;;  %v3529_v6 = vpop.eup %3528  ;;  %v2153_v48 = vadd.f32 %v2149_v41, %v2040_v61  ;;  %v3418_v37 = vld [vmem:[%s4920_s14 + $0x50] sm:$0xff]  }
0x1464   :  { %v2147_v62 = vmul.f32 %v3529_v6, %v2115_v17  ;;  %v3419_v17 = vld [vmem:[%s4920_s14 + $0x10] sm:$0xff]  }
0x1465   :  { %v2150_v47 = vmul.f32 %v2146_v18, %v2039_v45 }
0x1466   :  { %v3531_v39 = vpop.eup %3530  ;;  %v2151_v12 = vmul.f32 %v2147_v62, %v2039_v45 }
0x1467   :  { %v2154_v55 = vadd.f32 %v2150_v47, %v2040_v61  ;;  %v2148_v7 = vmul.f32 %v3531_v39, %v2116_v32  ;;  %v2163_v32 = vrot.slane %v2939_v42, %v3977_v58 }
0x1468   :  { %v2155_v44 = vadd.f32 %v2151_v12, %v2040_v61 }
0x1469   :  { %v2157_v40 = vpack.c.bf16 %v2154_v55, %v2153_v48  ;;  %v2152_v15 = vmul.f32 %v2148_v7, %v2039_v45 }
0x146b   :  { %2948 = vmatmul.mubr.msk.bf16.vlgmr.msra.gmra.mxu1 %vm147_vm0, %v2157_v40  ;;  %v2156_v23 = vadd.f32 %v2152_v15, %v2040_v61 }
0x146c   :  { %2258 = vmatprep.mubr.bf16.mxu1 %v4928_v50  ;;  %3065 = vmatpush3.bf16.msra.mxu1 %v3409_v8  ;;  %v3411_v50 = vld [vmem:[%s4920_s14 + $0x30] sm:$0xff]  }
0x146d   :  { %v2158_v53 = vpack.c.bf16 %v2156_v23, %v2155_v44  ;;  %3066 = vmatprep.subr.bf16.mxu1 %v3410_v2 }
0x1470   :  { %3067 = vmatpush3.bf16.msra.mxu1 %v3411_v50 }
0x1471   :  { %3068 = vmatprep.subr.bf16.mxu1 %v3412_v63 }
0x1473   :  { %2949 = vmatmul.mubr.msk.bf16.gmra.mxu1 %vm147_vm0, %v2158_v53 }
0x1474   :  { %3069 = vmatpush3.bf16.msra.mxu1 %v3413_v5 }
0x1475   :  { %3070 = vmatprep.subr.bf16.mxu1 %v3414_v22 }
0x1478   :  { %3071 = vmatpush3.bf16.msra.mxu1 %v3415_v20 }
0x1479   :  { %3072 = vmatprep.subr.bf16.mxu1 %v3416_v1 }
0x147c   :  { %3073 = vmatpush3.bf16.msra.mxu1 %v3417_v25 }
0x147d   :  { %3074 = vmatprep.subr.bf16.mxu1 %v3418_v37 }
0x1480   :  { %3075 = vmatpush3.bf16.msra.mxu1 %v3419_v17 }
0x1481   :  { %3076 = vmatprep.subr.bf16.mxu1 %v3420_v19 }
0x1484   :  { %3077 = vmatpush3.bf16.msra.mxu1 %v3421_v11 }
0x1485   :  { %3078 = vmatprep.subr.bf16.mxu1 %v3422_v49 }
0x1488   :  { %3079 = vmatpush3.bf16.msra.mxu1 %v3423_v9 }
0x152b   :  { %v2250_v54 = vpop.f32.mrf.mxu1 }
0x152c   :  { %v4708_v43 = vadd.f32 %v2250_v54, %v2163_v32 }
0x152d   :  { %v2252_v33 = vpop.f32.mrf.mxu1 }
0x152e   :  { %v4711_v35 = vmul.f32 0.70710677, %v4708_v43  ;;  %v4713_v36 = vadd.f32 %v2252_v33, %v2167_v56 }
0x152f   :  { %v2254_v13 = vpop.f32.mrf.mxu1 }
0x1530   :  { %v2301_v24 = vand.u32 2147483647, %v4711_v35  ;;  %v4717_v26 = vmul.f32 0.70710677, %v4713_v36  ;;  %v4719_v14 = vadd.f32 %v2254_v13, %v2163_v32  ;;  %vm2285_vm1 = vcmp.lt.f32.partialorder %v4711_v35, 0.0 }
0x1531   :  { %v2256_v58 = vpop.f32.mrf.mxu1 }
0x1532   :  { %v2309_v29 = vmul.f32 0.3275911, %v2301_v24  ;;  %v2302_v59 = vand.u32 2147483647, %v4717_v26  ;;  %v4723_v34 = vmul.f32 0.70710677, %v4719_v14  ;;  %v4725_v16 = vadd.f32 %v2256_v58, %v2167_v56 }
0x1533   :  { %v2260_v21 = vpop.f32.mrf.mxu1  ;;  %v2405_v3 = vsub.f32 0.0, %v2301_v24  ;;  %vm2286_vm2 = vcmp.lt.f32.partialorder %v4717_v26, 0.0 }
0x1534   :  { %v2317_v27 = vadd.f32 1.0, %v2309_v29  ;;  %v2310_v31 = vmul.f32 0.3275911, %v2302_v59  ;;  %v2303_v51 = vand.u32 2147483647, %v4723_v34  ;;  %v4732_v4 = vadd.f32 %v2260_v21, %v2163_v32 }
0x1535   :  { %v4729_v57 = vmul.f32 0.70710677, %v4725_v16  ;;  %v2262_v28 = vpop.f32.mrf.mxu1  ;;  %v2406_v61 = vsub.f32 0.0, %v2302_v59  ;;  %v2413_v55 = vmul.f32 %v2405_v3, %v2301_v24  ;;  %vm2287_vm3 = vcmp.lt.f32.partialorder %v4723_v34, 0.0 }
0x1536   :  { %3532 = vrcp.f32 %v2317_v27  ;;  %v2318_v60 = vadd.f32 1.0, %v2310_v31  ;;  %v2311_v38 = vmul.f32 0.3275911, %v2303_v51  ;;  %v4734_v45 = vadd.f32 %v2262_v28, %v2167_v56 }
0x1537   :  { %v2304_v0 = vand.u32 2147483647, %v4729_v57  ;;  %v2264_v46 = vpop.f32.mrf.mxu1  ;;  %v4737_v41 = vmul.f32 0.70710677, %v4732_v4  ;;  %v2407_v40 = vsub.f32 0.0, %v2303_v51  ;;  %v2414_v23 = vmul.f32 %v2406_v61, %v2302_v59 }
0x1538   :  { %3534 = vrcp.f32 %v2318_v60  ;;  %v2319_v30 = vadd.f32 1.0, %v2311_v38  ;;  %v4740_v6 = vmul.f32 0.70710677, %v4734_v45  ;;  %v4743_v39 = vadd.f32 %v2264_v46, %v2163_v32 }
0x1539   :  { %v2312_v10 = vmul.f32 0.3275911, %v2304_v0  ;;  %v2305_v47 = vand.u32 2147483647, %v4737_v41  ;;  %v2266_v48 = vpop.f32.mrf.mxu1  ;;  %v2421_v50 = vmul.f32 1.442695, %v2413_v55  ;;  %v2415_v22 = vmul.f32 %v2407_v40, %v2303_v51 }
0x153a   :  { %3536 = vrcp.f32 %v2319_v30  ;;  %v2306_v7 = vand.u32 2147483647, %v4740_v6  ;;  %v4747_v15 = vmul.f32 0.70710677, %v4743_v39  ;;  %v4749_v12 = vadd.f32 %v2266_v48, %v2167_v56 }
0x153b   :  { %v2320_v18 = vadd.f32 1.0, %v2312_v10  ;;  %v2313_v62 = vmul.f32 0.3275911, %v2305_v47  ;;  %v2408_v20 = vsub.f32 0.0, %v2304_v0  ;;  %v2423_v25 = vmul.f32 1.442695, %v2414_v23 }
0x153c   :  { %v2314_v53 = vmul.f32 0.3275911, %v2306_v7  ;;  %v2307_v52 = vand.u32 2147483647, %v4747_v15  ;;  %v4753_v8 = vmul.f32 0.70710677, %v4749_v12 }
0x153d   :  { %3538 = vrcp.f32 %v2320_v18  ;;  %v2321_v44 = vadd.f32 1.0, %v2313_v62  ;;  %v2409_v11 = vsub.f32 0.0, %v2305_v47  ;;  %v2425_v54 = vmul.f32 1.442695, %v2415_v22 }
0x153e   :  { %v2322_v63 = vadd.f32 1.0, %v2314_v53  ;;  %v2315_v1 = vmul.f32 0.3275911, %v2307_v52  ;;  %v4760_v37 = vand.u32 2147483647, %v4753_v8  ;;  %v2416_v33 = vmul.f32 %v2408_v20, %v2304_v0 }
0x153f   :  { %3540 = vrcp.f32 %v2321_v44  ;;  %v2410_v58 = vsub.f32 0.0, %v2306_v7  ;;  %v3628_v59 = vmov 1.0   ;;  %v2417_v31 = vmul.f32 %v2409_v11, %v2305_v47 }
0x1540   :  { %3542 = vrcp.f32 %v2322_v63  ;;  %v2323_v49 = vadd.f32 1.0, %v2315_v1  ;;  %v2316_v42 = vmul.f32 0.3275911, %v4760_v37  ;;  %v4774_v21 = vsel %vm2285_vm1, -1.0, %v3628_v59 }
0x1541   :  { %3544 = vpow2.f32 %v2421_v50  ;;  %v2411_v38 = vsub.f32 0.0, %v2307_v52  ;;  %v4783_v30 = vsel %vm2286_vm2, -1.0, %v3628_v59  ;;  %v2427_v46 = vmul.f32 1.442695, %v2416_v33 }
0x1542   :  { %3546 = vrcp.f32 %v2323_v49  ;;  %v2324_v29 = vadd.f32 1.0, %v2316_v42  ;;  %v2418_v18 = vmul.f32 %v2410_v58, %v2306_v7  ;;  %v2429_v48 = vmul.f32 1.442695, %v2417_v31 }
0x1543   :  { %v4755_v2 = vpop.eup %3532  ;;  %3548 = vpow2.f32 %v2423_v25  ;;  %v2419_v40 = vmul.f32 %v2411_v38, %v2307_v52  ;;  %v2412_v53 = vsub.f32 0.0, %v4760_v37  ;;  %v2295_v34 = vsel %vm2287_vm3, -1.0, %v3628_v59 }
0x1544   :  { %v2333_v5 = vmul.f32 1.0614054, %v4755_v2  ;;  %3550 = vrcp.f32 %v2324_v29  ;;  %vm2288_vm4 = vcmp.lt.f32.partialorder %v4729_v57, 0.0  ;;  %vm2289_vm5 = vcmp.lt.f32.partialorder %v4737_v41, 0.0 }
0x1545   :  { %v4762_v17 = vpop.eup %3534  ;;  %3552 = vpow2.f32 %v2425_v54  ;;  %v2433_v11 = vmul.f32 1.442695, %v2419_v40  ;;  %v2420_v54 = vmul.f32 %v2412_v53, %v4760_v37  ;;  %vm2290_vm6 = vcmp.lt.f32.partialorder %v4740_v6, 0.0 }
0x1546   :  { %v2341_v19 = vadd.f32 -1.4531521, %v2333_v5  ;;  %v2334_v9 = vmul.f32 1.0614054, %v4762_v17  ;;  %3554 = vpow2.f32 %v2427_v46  ;;  %v2431_v5 = vmul.f32 1.442695, %v2418_v18 }
0x1547   :  { %v4767_v32 = vpop.eup %3536  ;;  %3556 = vpow2.f32 %v2429_v48  ;;  %vm2291_vm7 = vcmp.lt.f32.partialorder %v4747_v15, 0.0  ;;  %vm2292_vm8 = vcmp.lt.f32.partialorder %v4753_v8, 0.0  ;;  %v2273_v8 = vmul.f32 0.5, %v4732_v4 }
0x1548   :  { %v2349_v56 = vmul.f32 %v4755_v2, %v2341_v19  ;;  %v2342_v13 = vadd.f32 -1.4531521, %v2334_v9  ;;  %v2335_v24 = vmul.f32 1.0614054, %v4767_v32  ;;  %3558 = vpow2.f32 %v2431_v5 }
0x1549   :  { %3560 = vpow2.f32 %v2433_v11  ;;  %v2299_v15 = vsel %vm2291_vm7, -1.0, %v3628_v59 }
0x154a   :  { %v2357_v27 = vadd.f32 1.4214138, %v2349_v56  ;;  %v4776_v51 = vpop.eup %3538  ;;  %v2350_v28 = vmul.f32 %v4762_v17, %v2342_v13  ;;  %v2343_v60 = vadd.f32 -1.4531521, %v2335_v24 }
0x154b   :  { %v2336_v35 = vmul.f32 1.0614054, %v4776_v51 }
0x154c   :  { %v2365_v0 = vmul.f32 %v4755_v2, %v2357_v27  ;;  %v2358_v10 = vadd.f32 1.4214138, %v2350_v28  ;;  %v2351_v3 = vmul.f32 %v4767_v32, %v2343_v60  ;;  %v4789_v26 = vpop.eup %3540 }
0x154d   :  { %v2344_v47 = vadd.f32 -1.4531521, %v2336_v35  ;;  %v2337_v63 = vmul.f32 1.0614054, %v4789_v26  ;;  %v4797_v52 = vpop.eup %3542 }
0x154e   :  { %v2373_v61 = vadd.f32 -0.28449672, %v2365_v0  ;;  %v2366_v55 = vmul.f32 %v4762_v17, %v2358_v10  ;;  %v2359_v62 = vadd.f32 1.4214138, %v2351_v3  ;;  %v3545_v49 = vpop.eup %3544  ;;  %v2338_v56 = vmul.f32 1.0614054, %v4797_v52 }
0x154f   :  { %v2352_v44 = vmul.f32 %v4776_v51, %v2344_v47  ;;  %v2345_v19 = vadd.f32 -1.4531521, %v2337_v63  ;;  %v4804_v33 = vpop.eup %3546  ;;  %v2435_v3 = vmul.f32 1.442695, %v2420_v54 }
0x1550   :  { %v2381_v23 = vmul.f32 %v4755_v2, %v2373_v61  ;;  %v2374_v50 = vadd.f32 -0.28449672, %v2366_v55  ;;  %v2367_v7 = vmul.f32 %v4767_v32, %v2359_v62  ;;  %v2346_v31 = vadd.f32 -1.4531521, %v2338_v56 }
0x1551   :  { %v2360_v20 = vadd.f32 1.4214138, %v2352_v44  ;;  %v2353_v58 = vmul.f32 %v4789_v26, %v2345_v19  ;;  %v2339_v28 = vmul.f32 1.0614054, %v4804_v33  ;;  %3562 = vpow2.f32 %v2435_v3 }
0x1552   :  { %v2389_v22 = vadd.f32 0.2548296, %v2381_v23  ;;  %v2382_v1 = vmul.f32 %v4762_v17, %v2374_v50  ;;  %v2375_v25 = vadd.f32 -0.28449672, %v2367_v7  ;;  %v2354_v46 = vmul.f32 %v4797_v52, %v2346_v31 }
0x1553   :  { %v2368_v42 = vmul.f32 %v4776_v51, %v2360_v20  ;;  %v2361_v0 = vadd.f32 1.4214138, %v2353_v58  ;;  %v2347_v10 = vadd.f32 -1.4531521, %v2339_v28 }
0x1554   :  { %v2397_v9 = vmul.f32 %v4755_v2, %v2389_v22  ;;  %v2390_v13 = vadd.f32 0.2548296, %v2382_v1  ;;  %v2383_v24 = vmul.f32 %v4767_v32, %v2375_v25  ;;  %v3549_v2 = vpop.eup %3548  ;;  %v2362_v40 = vadd.f32 1.4214138, %v2354_v46 }
0x1555   :  { %v2376_v27 = vadd.f32 -0.28449672, %v2368_v42  ;;  %v4810_v37 = vpop.eup %3550  ;;  %v2369_v47 = vmul.f32 %v4789_v26, %v2361_v0  ;;  %v2355_v23 = vmul.f32 %v4804_v33, %v2347_v10  ;;  %v2272_v46 = vmul.f32 0.5, %v4725_v16 }
0x1556   :  { %v2437_v29 = vmul.f32 %v3545_v49, %v2397_v9  ;;  %v2398_v60 = vmul.f32 %v4762_v17, %v2390_v13  ;;  %v2391_v38 = vadd.f32 0.2548296, %v2383_v24  ;;  %v2340_v48 = vmul.f32 1.0614054, %v4810_v37  ;;  %v3553_v55 = vpop.eup %3552 }
0x1557   :  { %v2384_v35 = vmul.f32 %v4776_v51, %v2376_v27  ;;  %v2377_v50 = vadd.f32 -0.28449672, %v2369_v47  ;;  %v2363_v5 = vadd.f32 1.4214138, %v2355_v23  ;;  %v3555_v22 = vpop.eup %3554  ;;  %v2270_v24 = vmul.f32 0.5, %v4713_v36 }
0x1558   :  { %v2438_v18 = vmul.f32 %v3549_v2, %v2398_v60  ;;  %v2399_v61 = vmul.f32 %v4767_v32, %v2391_v38  ;;  %v2445_v17 = vsub.f32 1.0, %v2437_v29  ;;  %v2348_v7 = vadd.f32 -1.4531521, %v2340_v48  ;;  %v3557_v42 = vpop.eup %3556 }
0x1559   :  { %v2392_v62 = vadd.f32 0.2548296, %v2384_v35  ;;  %v2370_v32 = vmul.f32 %v4797_v52, %v2362_v40  ;;  %v2385_v1 = vmul.f32 %v4789_v26, %v2377_v50  ;;  %v2371_v9 = vmul.f32 %v4804_v33, %v2363_v5  ;;  %v3559_v60 = vpop.eup %3558 }
0x155a   :  { %v2446_v44 = vsub.f32 1.0, %v2438_v18  ;;  %v2439_v53 = vmul.f32 %v3553_v55, %v2399_v61  ;;  %v2356_v25 = vmul.f32 %v4810_v37, %v2348_v7  ;;  %v2453_v56 = vmul.f32 %v2445_v17, %v4774_v21  ;;  %v3561_v3 = vpop.eup %3560 }
0x155b   :  { %v2400_v63 = vmul.f32 %v4776_v51, %v2392_v62  ;;  %v2378_v49 = vadd.f32 -0.28449672, %v2370_v32  ;;  %v2393_v54 = vadd.f32 0.2548296, %v2385_v1  ;;  %v2379_v27 = vadd.f32 -0.28449672, %v2371_v9 }
0x155c   :  { %v2447_v20 = vsub.f32 1.0, %v2439_v53  ;;  %v2454_v19 = vmul.f32 %v2446_v44, %v4783_v30  ;;  %v2364_v13 = vadd.f32 1.4214138, %v2356_v25  ;;  %v2296_v30 = vsel %vm2288_vm4, -1.0, %v3628_v59 }
0x155d   :  { %v2440_v11 = vmul.f32 %v3555_v22, %v2400_v63  ;;  %v2386_v29 = vmul.f32 %v4797_v52, %v2378_v49  ;;  %v2401_v28 = vmul.f32 %v4789_v26, %v2393_v54  ;;  %v2387_v0 = vmul.f32 %v4804_v33, %v2379_v27 }
0x155e   :  { %v2455_v51 = vmul.f32 %v2447_v20, %v2295_v34  ;;  %v2372_v2 = vmul.f32 %v4810_v37, %v2364_v13  ;;  %v2462_v21 = vadd.f32 1.0, %v2454_v19  ;;  %v2461_v36 = vadd.f32 1.0, %v2453_v56  ;;  %v3563_v63 = vpop.eup %3562 }
0x155f   :  { %v2448_v58 = vsub.f32 1.0, %v2440_v11  ;;  %v2394_v38 = vadd.f32 0.2548296, %v2386_v29  ;;  %v2271_v35 = vmul.f32 0.5, %v4719_v14  ;;  %v2441_v57 = vmul.f32 %v3557_v42, %v2401_v28 }
0x1560   :  { %v2463_v31 = vadd.f32 1.0, %v2455_v51  ;;  %v2380_v10 = vadd.f32 -0.28449672, %v2372_v2  ;;  %v2395_v26 = vadd.f32 0.2548296, %v2387_v0  ;;  %v2269_v47 = vmul.f32 0.5, %v4708_v43 }
0x1561   :  { %v2456_v34 = vmul.f32 %v2448_v58, %v2296_v30  ;;  %v2402_v61 = vmul.f32 %v4797_v52, %v2394_v38  ;;  %v2470_v17 = vmul.f32 %v2462_v21, %v2270_v24  ;;  %v2449_v52 = vsub.f32 1.0, %v2441_v57 }
0x1562   :  { %v2471_v48 = vmul.f32 %v2463_v31, %v2271_v35  ;;  %v2388_v55 = vmul.f32 %v4810_v37, %v2380_v10  ;;  %v2403_v14 = vmul.f32 %v4804_v33, %v2395_v26  ;;  %v2469_v16 = vmul.f32 %v2461_v36, %v2269_v47 }
0x1563   :  { %v2464_v18 = vadd.f32 1.0, %v2456_v34  ;;  %v2442_v40 = vmul.f32 %v3559_v60, %v2402_v61  ;;  %v2297_v32 = vsel %vm2289_vm5, -1.0, %v3628_v59  ;;  %v2298_v33 = vsel %vm2290_vm6, -1.0, %v3628_v59 }
0x1564   :  { %v2396_v23 = vadd.f32 0.2548296, %v2388_v55  ;;  %v2443_v53 = vmul.f32 %v3561_v3, %v2403_v14  ;;  %v2477_v50 = vpack.c.bf16 %v2471_v48, %v2469_v16  ;;  %v2457_v20 = vmul.f32 %v2449_v52, %v2297_v32 }
0x1565   :  { %v2472_v62 = vmul.f32 %v2464_v18, %v2272_v46  ;;  %v2450_v44 = vsub.f32 1.0, %v2442_v40  ;;  %v2300_v19 = vsel %vm2292_vm8, -1.0, %v3628_v59  ;;  %v2275_v9 = vmul.f32 0.5, %v4743_v39  ;;  %v2043_v39 = vld [vmem:[%s4910_s4 + $0x27] ss:$0 sm:$0xff] }
0x1566   :  { %v2404_v7 = vmul.f32 %v4810_v37, %v2396_v23  ;;  %v2451_v5 = vsub.f32 1.0, %v2443_v53  ;;  %v2465_v49 = vadd.f32 1.0, %v2457_v20  ;;  %v2274_v42 = vmul.f32 0.5, %v4734_v45 }
0x1567   :  { %v2478_v43 = vpack.c.bf16 %v2472_v62, %v2470_v17  ;;  %v2458_v6 = vmul.f32 %v2450_v44, %v2298_v33  ;;  %v2276_v56 = vmul.f32 0.5, %v4749_v12 }
0x1568   :  { %v2444_v22 = vmul.f32 %v3563_v63, %v2404_v7  ;;  %v2459_v1 = vmul.f32 %v2451_v5, %v2299_v15  ;;  %v2473_v58 = vmul.f32 %v2465_v49, %v2273_v8 }
0x1569   :  { %2609 = vmatprep.mubr.bf16.mxu1 %v2478_v43  ;;  %v2466_v11 = vadd.f32 1.0, %v2458_v6 }
0x156a   :  { %2610 = vmatmul.mubr.bf16.vlgmr.msra.gmra.mxu1 %v2477_v50  ;;  %v2452_v25 = vsub.f32 1.0, %v2444_v22  ;;  %v2467_v37 = vadd.f32 1.0, %v2459_v1 }
0x156b   :  { %v2474_v13 = vmul.f32 %v2466_v11, %v2274_v42 }
0x156c   :  { %v2460_v41 = vmul.f32 %v2452_v25, %v2300_v19  ;;  %v2475_v54 = vmul.f32 %v2467_v37, %v2275_v9  ;;  %v2044_v9 = vld [vmem:[%s4910_s4 + $0x30] ss:$0 sm:$0xff] }
0x156e   :  { %v2468_v51 = vadd.f32 1.0, %v2460_v41  ;;  %v2479_v27 = vpack.c.bf16 %v2475_v54, %v2473_v58 }
0x1570   :  { %v2476_v24 = vmul.f32 %v2468_v51, %v2276_v56  ;;  %v2045_v51 = vld [vmem:[%s4910_s4 + $0x31] ss:$0 sm:$0xff] }
0x1572   :  { %v2480_v29 = vpack.c.bf16 %v2476_v24, %v2474_v13 }
0x1574   :  { %2617 = vmatprep.mubr.bf16.mxu1 %v2480_v29 }
0x1575   :  { %2618 = vmatmul.mubr.bf16.gmra.mxu1 %v2479_v27 }
0x162a   :  { %v3080_v59 = vpop.f32.mrf.mxu1 }
0x162c   :  { %v3081_v31 = vpop.f32.mrf.mxu1 }
0x162d   :  { %v3082_v45 = vadd.f32 %v3081_v31, %v3080_v59 }
0x162e   :  { %v3083_v30 = vpop.f32.mrf.mxu1 }
0x162f   :  { %v2612_v12 = vadd.f32 %v3082_v45, %v2043_v39 }
0x1630   :  { %v3084_v28 = vpop.f32.mrf.mxu1 }
0x1631   :  { %v3085_v2 = vadd.f32 %v3084_v28, %v3083_v30  ;;  %v2626_v4 = vsel %vm147_vm0, %v2612_v12, 0.0 }
0x1632   :  { %2627 = vadd.xlane.f32.xlu0 %v2626_v4 }
0x1633   :  { %v2615_v60 = vadd.f32 %v3085_v2, %v2043_v39 }
0x1635   :  { %v2629_v21 = vsel %vm147_vm0, %v2615_v60, 0.0  ;;  %v3086_v34 = vpop.f32.mrf.mxu1 }
0x1636   :  { %2630 = vadd.xlane.f32.xlu1 %v2629_v21 }
0x1637   :  { %v3087_v38 = vpop.f32.mrf.mxu1 }
0x1638   :  { %v3088_v0 = vadd.f32 %v3087_v38, %v3086_v34 }
0x1639   :  { %v3089_v36 = vpop.f32.mrf.mxu1 }
0x163a   :  { %v2620_v35 = vadd.f32 %v3088_v0, %v2043_v39 }
0x163b   :  { %v3090_v46 = vpop.f32.mrf.mxu1 }
0x163c   :  { %v3091_v10 = vadd.f32 %v3090_v46, %v3089_v36  ;;  %v2632_v3 = vsel %vm147_vm0, %v2620_v35, 0.0 }
0x163d   :  { %2633 = vadd.xlane.f32.xlu0 %v2632_v3 }
0x163e   :  { %v2623_v18 = vadd.f32 %v3091_v10, %v2043_v39 }
0x1640   :  { %v2635_v57 = vsel %vm147_vm0, %v2623_v18, 0.0 }
0x1641   :  { %2636 = vadd.xlane.f32.xlu1 %v2635_v57 }
0x16bb   :  { %v2628_v61 = vpop.xlane.xlu0 %2627 }
0x16bc   :  { %v2638_v26 = vmul.f32 0.015625, %v2628_v61 }
0x16be   :  { %v2642_v47 = vsub.f32 %v2612_v12, %v2638_v26 }
0x16bf   :  { %v2631_v48 = vpop.xlane.xlu1 %2630 }
0x16c0   :  { %v2639_v55 = vmul.f32 0.015625, %v2631_v48  ;;  %v2646_v17 = vmul.f32 %v2642_v47, %v2642_v47 }
0x16c2   :  { %v2643_v62 = vsub.f32 %v2615_v60, %v2639_v55  ;;  %v2650_v40 = vsel %vm147_vm0, %v2646_v17, 0.0 }
0x16c3   :  { %2651 = vadd.xlane.f32.xlu0 %v2650_v40 }
0x16c4   :  { %v2647_v14 = vmul.f32 %v2643_v62, %v2643_v62 }
0x16c6   :  { %v2653_v16 = vsel %vm147_vm0, %v2647_v14, 0.0  ;;  %v2634_v23 = vpop.xlane.xlu0 %2633 }
0x16c7   :  { %2654 = vadd.xlane.f32.xlu1 %v2653_v16  ;;  %v2640_v52 = vmul.f32 0.015625, %v2634_v23  ;;  %v3424_v23 = vld [vmem:[%s4921_s15 + $0x18] sm:$0xff]  }
0x16c8   :  { %3282 = vmatprep.subr.bf16.mxu0 %v3424_v23 }
0x16c9   :  { %v2644_v44 = vsub.f32 %v2620_v35, %v2640_v52  ;;  %3283 = vmatpush3.bf16.msra.mxu0 %v3424_v23  ;;  %v3425_v52 = vld [vmem:[%s4921_s15 + $0x10] sm:$0xff]  }
0x16ca   :  { %v2637_v53 = vpop.xlane.xlu1 %2636  ;;  %3284 = vmatprep.subr.bf16.mxu0 %v3425_v52 }
0x16cb   :  { %v2641_v43 = vmul.f32 0.015625, %v2637_v53  ;;  %v2648_v50 = vmul.f32 %v2644_v44, %v2644_v44  ;;  %v3427_v53 = vld [vmem:[%s4921_s15] sm:$0xff]  }
0x16cd   :  { %v2645_v7 = vsub.f32 %v2623_v18, %v2641_v43  ;;  %v2656_v63 = vsel %vm147_vm0, %v2648_v50, 0.0  ;;  %3285 = vmatpush3.bf16.msra.mxu0 %v3425_v52 }
0x16ce   :  { %2657 = vadd.xlane.f32.xlu0 %v2656_v63 }
0x16cf   :  { %v2649_v32 = vmul.f32 %v2645_v7, %v2645_v7 }
0x16d1   :  { %v2659_v33 = vsel %vm147_vm0, %v2649_v32, 0.0 }
0x16d2   :  { %2660 = vadd.xlane.f32.xlu1 %v2659_v33 }
0x174c   :  { %v2652_v5 = vpop.xlane.xlu0 %2651 }
0x174d   :  { %v2662_v6 = vmul.f32 0.015625, %v2652_v5 }
0x174f   :  { %v2666_v15 = vadd.f32 1e-05, %v2662_v6 }
0x1750   :  { %v2655_v22 = vpop.xlane.xlu1 %2654 }
0x1751   :  { %3564 = vrsqrt.f32 %v2666_v15  ;;  %v2663_v20 = vmul.f32 0.015625, %v2655_v22 }
0x1753   :  { %v2667_v1 = vadd.f32 1e-05, %v2663_v20 }
0x1755   :  { %3566 = vrsqrt.f32 %v2667_v1 }
0x1757   :  { %v2658_v25 = vpop.xlane.xlu0 %2657 }
0x1758   :  { %v2664_v37 = vmul.f32 0.015625, %v2658_v25 }
0x175a   :  { %v2668_v19 = vadd.f32 1e-05, %v2664_v37 }
0x175b   :  { %v2661_v11 = vpop.xlane.xlu1 %2660 }
0x175c   :  { %3568 = vrsqrt.f32 %v2668_v19  ;;  %v2665_v49 = vmul.f32 0.015625, %v2661_v11  ;;  %v2046_v19 = vld [vmem:[%s4910_s4 + $0x32] ss:$0 sm:$0xff] }
0x175e   :  { %v3565_v41 = vpop.eup %3564  ;;  %v2669_v56 = vadd.f32 1e-05, %v2665_v49 }
0x175f   :  { %v2674_v42 = vmul.f32 %v3565_v41, %v2642_v47 }
0x1760   :  { %3570 = vrsqrt.f32 %v2669_v56 }
0x1761   :  { %v2678_v8 = vmul.f32 %v2674_v42, %v2044_v9 }
0x1762   :  { %v3567_v54 = vpop.eup %3566 }
0x1763   :  { %v2682_v13 = vadd.f32 %v2678_v8, %v2045_v51  ;;  %v2675_v24 = vmul.f32 %v3567_v54, %v2643_v62 }
0x1765   :  { %v2686_v58 = vsel %vm147_vm0, %v2682_v13, 0.0  ;;  %v2679_v29 = vmul.f32 %v2675_v24, %v2044_v9 }
0x1766   :  { %2687 = vadd.xlane.f32.xlu0 %v2686_v58 }
0x1767   :  { %v2683_v27 = vadd.f32 %v2679_v29, %v2045_v51 }
0x1769   :  { %v2689_v59 = vsel %vm147_vm0, %v2683_v27, 0.0  ;;  %v3569_v31 = vpop.eup %3568 }
0x176a   :  { %2690 = vadd.xlane.f32.xlu1 %v2689_v59  ;;  %v2676_v39 = vmul.f32 %v3569_v31, %v2644_v44  ;;  %v3426_v44 = vld [vmem:[%s4921_s15 + $0x8] sm:$0xff]  }
0x176b   :  { %3286 = vmatprep.subr.bf16.mxu0 %v3426_v44 }
0x176c   :  { %v2680_v45 = vmul.f32 %v2676_v39, %v2044_v9  ;;  %3287 = vmatpush3.bf16.msra.mxu0 %v3426_v44 }
0x176d   :  { %v3571_v30 = vpop.eup %3570  ;;  %3288 = vmatprep.subr.bf16.mxu0 %v3427_v53 }
0x176e   :  { %v2684_v12 = vadd.f32 %v2680_v45, %v2045_v51  ;;  %v2677_v28 = vmul.f32 %v3571_v30, %v2645_v7  ;;  %v2048_v45 = vld [vmem:[%s4910_s4 + $0x34] ss:$0 sm:$0xff] }
0x1770   :  { %v2692_v2 = vsel %vm147_vm0, %v2684_v12, 0.0  ;;  %v2681_v4 = vmul.f32 %v2677_v28, %v2044_v9  ;;  %3289 = vmatpush3.bf16.msra.mxu0 %v3427_v53  ;;  %v2047_v9 = vld [vmem:[%s4910_s4 + $0x33] ss:$0 sm:$0xff] }
0x1771   :  { %2693 = vadd.xlane.f32.xlu0 %v2692_v2 }
0x1772   :  { %v2685_v60 = vadd.f32 %v2681_v4, %v2045_v51 }
0x1774   :  { %v2695_v21 = vsel %vm147_vm0, %v2685_v60, 0.0 }
0x1775   :  { %2696 = vadd.xlane.f32.xlu1 %v2695_v21 }
0x17ef   :  { %v2688_v34 = vpop.xlane.xlu0 %2687 }
0x17f0   :  { %v2698_v38 = vmul.f32 0.015625, %v2688_v34 }
0x17f2   :  { %v2702_v0 = vsub.f32 %v2682_v13, %v2698_v38 }
0x17f3   :  { %v2691_v36 = vpop.xlane.xlu1 %2690 }
0x17f4   :  { %v2699_v35 = vmul.f32 0.015625, %v2691_v36  ;;  %v2706_v46 = vmul.f32 %v2702_v0, %v2702_v0 }
0x17f6   :  { %v2703_v10 = vsub.f32 %v2683_v27, %v2699_v35  ;;  %v2710_v3 = vsel %vm147_vm0, %v2706_v46, 0.0 }
0x17f7   :  { %2711 = vadd.xlane.f32.xlu0 %v2710_v3 }
0x17f8   :  { %v2707_v18 = vmul.f32 %v2703_v10, %v2703_v10 }
0x17fa   :  { %v2713_v57 = vsel %vm147_vm0, %v2707_v18, 0.0  ;;  %v2694_v61 = vpop.xlane.xlu0 %2693 }
0x17fb   :  { %2714 = vadd.xlane.f32.xlu1 %v2713_v57  ;;  %v2700_v26 = vmul.f32 0.015625, %v2694_v61 }
0x17fd   :  { %v2704_v47 = vsub.f32 %v2684_v12, %v2700_v26 }
0x17fe   :  { %v2697_v48 = vpop.xlane.xlu1 %2696 }
0x17ff   :  { %v2701_v55 = vmul.f32 0.015625, %v2697_v48  ;;  %v2708_v17 = vmul.f32 %v2704_v47, %v2704_v47 }
0x1801   :  { %v2705_v62 = vsub.f32 %v2685_v60, %v2701_v55  ;;  %v2716_v40 = vsel %vm147_vm0, %v2708_v17, 0.0 }
0x1802   :  { %2717 = vadd.xlane.f32.xlu0 %v2716_v40 }
0x1803   :  { %v2709_v14 = vmul.f32 %v2705_v62, %v2705_v62 }
0x1805   :  { %v2719_v16 = vsel %vm147_vm0, %v2709_v14, 0.0 }
0x1806   :  { %2720 = vadd.xlane.f32.xlu1 %v2719_v16 }
0x1880   :  { %v2712_v43 = vpop.xlane.xlu0 %2711 }
0x1881   :  { %v2722_v50 = vmul.f32 0.015625, %v2712_v43 }
0x1883   :  { %v2726_v7 = vadd.f32 1e-05, %v2722_v50 }
0x1884   :  { %v2715_v63 = vpop.xlane.xlu1 %2714 }
0x1885   :  { %3572 = vrsqrt.f32 %v2726_v7  ;;  %v2723_v32 = vmul.f32 0.015625, %v2715_v63 }
0x1887   :  { %v2727_v33 = vadd.f32 1e-05, %v2723_v32 }
0x1889   :  { %3574 = vrsqrt.f32 %v2727_v33 }
0x188b   :  { %v2718_v5 = vpop.xlane.xlu0 %2717 }
0x188c   :  { %v2724_v6 = vmul.f32 0.015625, %v2718_v5 }
0x188e   :  { %v2728_v15 = vadd.f32 1e-05, %v2724_v6 }
0x188f   :  { %v2721_v22 = vpop.xlane.xlu1 %2720 }
0x1890   :  { %3576 = vrsqrt.f32 %v2728_v15  ;;  %v2725_v1 = vmul.f32 0.015625, %v2721_v22 }
0x1892   :  { %v3573_v20 = vpop.eup %3572  ;;  %v2729_v37 = vadd.f32 1e-05, %v2725_v1 }
0x1893   :  { %v2734_v25 = vmul.f32 %v3573_v20, %v2702_v0 }
0x1894   :  { %3578 = vrsqrt.f32 %v2729_v37 }
0x1895   :  { %v2738_v49 = vmul.f32 %v2734_v25, %v2046_v19 }
0x1896   :  { %v3575_v11 = vpop.eup %3574 }
0x1897   :  { %v2735_v41 = vmul.f32 %v3575_v11, %v2703_v10  ;;  %v2742_v56 = vadd.f32 %v2738_v49, %v2047_v9 }
0x1899   :  { %v2739_v42 = vmul.f32 %v2735_v41, %v2046_v19 }
0x189b   :  { %v2743_v51 = vadd.f32 %v2739_v42, %v2047_v9 }
0x189d   :  { %v2746_v8 = vpack.c.bf16 %v2743_v51, %v2742_v56  ;;  %v3577_v54 = vpop.eup %3576 }
0x189e   :  { %v2736_v13 = vmul.f32 %v3577_v54, %v2704_v47 }
0x189f   :  { %3290 = vmatprep.mubr.msk.bf16.mxu0 %vm147_vm0, %v2746_v8 }
0x18a0   :  { %v2740_v29 = vmul.f32 %v2736_v13, %v2046_v19 }
0x18a1   :  { %v3579_v24 = vpop.eup %3578 }
0x18a2   :  { %v2737_v58 = vmul.f32 %v3579_v24, %v2705_v62  ;;  %v2744_v59 = vadd.f32 %v2740_v29, %v2047_v9 }
0x18a4   :  { %v2741_v27 = vmul.f32 %v2737_v58, %v2046_v19 }
0x18a6   :  { %v2745_v31 = vadd.f32 %v2741_v27, %v2047_v9 }
0x18a8   :  { %v2747_v39 = vpack.c.bf16 %v2745_v31, %v2744_v59 }
0x18aa   :  { %3291 = vmatmul.mubr.msk.bf16.vlgmr.msra.gmra.mxu0 %vm147_vm0, %v2747_v39 }
0x196a   :  { %v3292_v30 = vpop.f32.mrf.mxu0 }
0x196b   :  { %v2821_v12 = vadd.f32 %v3292_v30, %v2048_v45 }
0x196c   :  { %v2812_v28 = vpop.f32.mrf.mxu0 }
0x196d   :  { %2829 = vst [vmem:[#allocation2 + $0x10] sm:$0xff] %v2821_v12  ;;  %v2813_v2 = vadd.f32 %v2812_v28, %v2048_v45 }
0x196e   :  { %v3293_v4 = vpop.f32.mrf.mxu0 }
0x196f   :  { %2827 = vst [vmem:[#allocation2] sm:$0xff] %v2813_v2  ;;  %v2824_v60 = vadd.f32 %v3293_v4, %v2048_v45 }
0x1970   :  { %v2815_v21 = vpop.f32.mrf.mxu0 }
0x1971   :  { %2830 = vst [vmem:[#allocation2 + $0x18] sm:$0xff] %v2824_v60  ;;  %v2816_v34 = vadd.f32 %v2815_v21, %v2048_v45 }
0x1973   :  { %2828 = vst [vmem:[#allocation2 + $0x8] sm:$0xff] %v2816_v34 }
0x1974   :  { %3615 = shalt.err (!%p3612_p4)
}
0x1975   :  { %s3630_s4 = smov 128   ;;  %s3631_s29 = smov 8  }
0x1976   :  { %2842 = dma.vmem_to_hbm [thread:$0]  %s2837_s3, 512, %s4922_s16, [#allocation3], %s3630_s4, %s3630_s4, %s3631_s29  }
0x1977   :  { %3624 = dma.done.wait [#allocation3], 512  }
0x1978   :  { %3625 = vsyncadd [#allocation3], 4294966784 }
0x1979   :  { %2846 = vsyncpa [#allocation3], 1 }

</bundles_post_ra>
